<compile_context>
chip_gen: v5e
topology: v5e:2x2
jax: 0.10.0
libtpu: 0.0.40
codegen_flags: <defaults>
</compile_context>

<pallas_src>
import functools
import math

import jax
import jax.numpy as jnp
from jax import lax
from jax.experimental import pallas as pl
from jax.experimental.pallas import tpu as pltpu

_LN_EPS = 1e-5
_BN_EPS = 1e-5
_SQRT_HALF = 0.7071067811865476


# ----------------------------------------------------------------------------
# In-kernel math helpers
# ----------------------------------------------------------------------------
def _erf_f32(x):
    # Abramowitz & Stegun 7.1.26 (|err| < 1.5e-7): exact-GELU quality using
    # only exp/abs/mul/where so it lowers cleanly inside Mosaic.
    a1, a2, a3, a4, a5 = (0.254829592, -0.284496736, 1.421413741,
                          -1.453152027, 1.061405429)
    p = 0.3275911
    sign = jnp.where(x >= 0.0, 1.0, -1.0)
    z = jnp.abs(x)
    t = 1.0 / (1.0 + p * z)
    poly = ((((a5 * t + a4) * t + a3) * t + a2) * t + a1) * t
    return sign * (1.0 - poly * jnp.exp(-z * z))


def _gelu(x):
    # torch.nn.functional.gelu default (erf form).
    return 0.5 * x * (1.0 + _erf_f32(x * _SQRT_HALF))


def _layernorm(y, g, b):
    mu = jnp.mean(y, axis=-1, keepdims=True)
    yc = y - mu
    var = jnp.mean(yc * yc, axis=-1, keepdims=True)
    return yc * lax.rsqrt(var + _LN_EPS) * g + b


# ----------------------------------------------------------------------------
# Pallas kernels
# ----------------------------------------------------------------------------
def _attn_block_kernel(xq_ref, xkv_ref, wq_ref, bq_ref, wk_ref, bk_ref,
                       wv_ref, bv_ref, wo_ref, bo_ref, g_ref, b_ref, o_ref,
                       *, n_heads, scale, causal):
    """LayerNorm(xq + OutProj(MultiHeadAttention(Q(xq), K(xkv), V(xkv))))."""
    f32, bf16 = jnp.float32, jnp.bfloat16
    xq = xq_ref[...]                                   # [Lq, D] f32 (residual)
    xkv = xkv_ref[...]                                 # [Lk, D] f32

    # Fused Q/K/V projections: bf16 MXU inputs, f32 accumulation.
    q = jnp.dot(xq.astype(bf16), wq_ref[...], preferred_element_type=f32) + bq_ref[...]
    k = jnp.dot(xkv.astype(bf16), wk_ref[...], preferred_element_type=f32) + bk_ref[...]
    v = jnp.dot(xkv.astype(bf16), wv_ref[...], preferred_element_type=f32) + bv_ref[...]
    Lq, D = q.shape
    Lk = k.shape[0]
    Dh = D // n_heads

    q_bf = (q * scale).astype(bf16)                    # fold 1/sqrt(Dh) into Q
    k_bf = k.astype(bf16)
    v_bf = v.astype(bf16)

    lane = lax.broadcasted_iota(jnp.int32, (1, D), 1)
    if causal:
        row = lax.broadcasted_iota(jnp.int32, (Lq, Lk), 0)
        col = lax.broadcasted_iota(jnp.int32, (Lq, Lk), 1)
        neg = jnp.where(col <= row, 0.0, -1e30).astype(f32)   # mask stays f32

    # Heads stay packed in the lane dim; per-head contraction via channel
    # masking (avoids lane slicing / concat and BH-sized grids).
    o = jnp.zeros((Lq, D), f32)
    for h in range(n_heads):                           # static unroll, tiny H
        maskf = jnp.logical_and(lane >= h * Dh, lane < (h + 1) * Dh).astype(f32)
        qh = q_bf * maskf.astype(bf16)
        s = lax.dot_general(qh, k_bf, (((1,), (1,)), ((), ())),
                            preferred_element_type=f32)          # [Lq, Lk] f32
        if causal:
            s = s + neg
        m = jnp.max(s, axis=-1, keepdims=True)
        p = jnp.exp(s - m)
        denom = jnp.sum(p, axis=-1, keepdims=True)
        p = p * pl.reciprocal(denom, approx=True)                 # EUP, ~free
        oh = jnp.dot(p.astype(bf16), v_bf, preferred_element_type=f32)  # [Lq, D]
        o = o + oh * maskf

    out = jnp.dot(o.astype(bf16), wo_ref[...], preferred_element_type=f32) + bo_ref[...]
    # Fused residual + LayerNorm epilogue (f32).
    o_ref[...] = _layernorm(xq + out, g_ref[...], b_ref[...]).astype(o_ref.dtype)


def _ffn_body(x, w1, b1, w2, b2, g, bln):
    """LayerNorm(x + W2(GELU(W1 x)))  — core of the FFN sub-block."""
    f32, bf16 = jnp.float32, jnp.bfloat16
    h = jnp.dot(x.astype(bf16), w1, preferred_element_type=f32) + b1
    h = _gelu(h)                                                 # fused, f32
    y = jnp.dot(h.astype(bf16), w2, preferred_element_type=f32) + b2
    return _layernorm(x + y, g, bln)


def _ffn_block_kernel(x_ref, w1_ref, b1_ref, w2_ref, b2_ref, g_ref, bln_ref, o_ref):
    y = _ffn_body(x_ref[...], w1_ref[...], b1_ref[...], w2_ref[...], b2_ref[...],
                  g_ref[...], bln_ref[...])
    o_ref[...] = y.astype(o_ref.dtype)


def _ffn_block_final_ln_kernel(x_ref, w1_ref, b1_ref, w2_ref, b2_ref, g_ref,
                               bln_ref, g2_ref, b2ln_ref, o_ref):
    """FFN sub-block with the encoder's final LayerNorm folded in."""
    y = _ffn_body(x_ref[...], w1_ref[...], b1_ref[...], w2_ref[...], b2_ref[...],
                  g_ref[...], bln_ref[...])
    o_ref[...] = _layernorm(y, g2_ref[...], b2ln_ref[...]).astype(o_ref.dtype)


def _matmul_add_kernel(x_ref, w_ref, add_ref, o_ref):
    """y = x @ w + add  (add is [1,N] bias or a full [M,N] additive epilogue)."""
    y = jnp.dot(x_ref[...].astype(jnp.bfloat16), w_ref[...],
                preferred_element_type=jnp.float32) + add_ref[...]
    o_ref[...] = y.astype(o_ref.dtype)


def _ln_matmul_add_kernel(x_ref, g_ref, b_ref, w_ref, add_ref, o_ref):
    """y = LayerNorm(x) @ w + add  (fused decoder-final norm + projection)."""
    y = _layernorm(x_ref[...], g_ref[...], b_ref[...])
    o_ref[...] = (jnp.dot(y.astype(jnp.bfloat16), w_ref[...],
                          preferred_element_type=jnp.float32)
                  + add_ref[...]).astype(o_ref.dtype)


def _distil_kernel(x_ref, w_ref, b_ref, g_ref, beta_ref, o_ref):
    """circular-conv matmul + BatchNorm1d(batch stats) + ELU, fused."""
    y = jnp.dot(x_ref[...].astype(jnp.bfloat16), w_ref[...],
                preferred_element_type=jnp.float32) + b_ref[...]
    mu = jnp.mean(y, axis=0, keepdims=True)
    var = jnp.mean((y - mu) ** 2, axis=0, keepdims=True)
    y = (y - mu) * lax.rsqrt(var + _BN_EPS) * g_ref[...] + beta_ref[...]
    o_ref[...] = jnp.where(y > 0, y,
                           jnp.exp(jnp.minimum(y, 0.0)) - 1.0).astype(o_ref.dtype)


# ----------------------------------------------------------------------------
# Pallas wrappers
# ----------------------------------------------------------------------------
# TODO(synk): at realistic Informer sizes (L~720, d_model=512, d_ff=2048) these
# single-block kernels need an M/N grid + explicit vmem_limit_bytes (esp. on
# v7x's 64 MiB VMEM) and a flash-style Lk-blocked attention; at these toy
# shapes everything fits a single VMEM block so no grid is needed.
def attention_block(xq, xkv, p, ln_g, ln_b, n_heads, causal):
    B, Lq, D = xq.shape
    Lk = xkv.shape[1]
    f32, bf16 = jnp.float32, jnp.bfloat16
    wcast = lambda a: a.astype(bf16)
    rcast = lambda a: a.reshape(1, -1).astype(f32)
    full = lambda shape: pl.BlockSpec(shape, lambda i: (0,) * len(shape))
    kernel = functools.partial(_attn_block_kernel, n_heads=n_heads,
                               scale=1.0 / math.sqrt(D // n_heads),
                               causal=causal)
    return pl.pallas_call(
        kernel,
        grid=(B,),
        in_specs=[
            pl.BlockSpec((None, Lq, D), lambda i: (i, 0, 0)),
            pl.BlockSpec((None, Lk, D), lambda i: (i, 0, 0)),
            full((D, D)), full((1, D)),   # wq, bq
            full((D, D)), full((1, D)),   # wk, bk
            full((D, D)), full((1, D)),   # wv, bv
            full((D, D)), full((1, D)),   # wo, bo
            full((1, D)), full((1, D)),   # ln gamma / beta
        ],
        out_specs=pl.BlockSpec((None, Lq, D), lambda i: (i, 0, 0)),
        out_shape=jax.ShapeDtypeStruct((B, Lq, D), f32),
        compiler_params=pltpu.CompilerParams(dimension_semantics=("parallel",)),
    )(xq.astype(f32), xkv.astype(f32),
      wcast(p["wq"]), rcast(p["bq"]), wcast(p["wk"]), rcast(p["bk"]),
      wcast(p["wv"]), rcast(p["bv"]), wcast(p["wo"]), rcast(p["bo"]),
      rcast(ln_g), rcast(ln_b))


def ffn_block(x, p, ln_g, ln_b, final_ln=None):
    B, L, D = x.shape
    M = B * L
    Fd = p["w1"].shape[1]
    f32, bf16 = jnp.float32, jnp.bfloat16
    args = [x.reshape(M, D).astype(f32),
            p["w1"].astype(bf16), p["b1"].reshape(1, Fd).astype(f32),
            p["w2"].astype(bf16), p["b2"].reshape(1, D).astype(f32),
            ln_g.reshape(1, D).astype(f32), ln_b.reshape(1, D).astype(f32)]
    if final_ln is None:
        kernel = _ffn_block_kernel
    else:
        kernel = _ffn_block_final_ln_kernel
        g2, b2 = final_ln
        args += [g2.reshape(1, D).astype(f32), b2.reshape(1, D).astype(f32)]
    out = pl.pallas_call(
        kernel, out_shape=jax.ShapeDtypeStruct((M, D), f32))(*args)
    return out.reshape(B, L, D)


def pallas_matmul_add(x2d, w, add):
    M, _ = x2d.shape
    N = int(w.shape[1])
    return pl.pallas_call(
        _matmul_add_kernel,
        out_shape=jax.ShapeDtypeStruct((M, N), jnp.float32),
    )(x2d.astype(jnp.float32), w.astype(jnp.bfloat16), add.astype(jnp.float32))


def pallas_ln_matmul_add(x2d, gamma, beta, w, add):
    M, D = x2d.shape
    N = int(w.shape[1])
    return pl.pallas_call(
        _ln_matmul_add_kernel,
        out_shape=jax.ShapeDtypeStruct((M, N), jnp.float32),
    )(x2d.astype(jnp.float32),
      gamma.reshape(1, D).astype(jnp.float32),
      beta.reshape(1, D).astype(jnp.float32),
      w.astype(jnp.bfloat16), add.astype(jnp.float32))


# ----------------------------------------------------------------------------
# Building blocks (glue in JAX, heavy math via the Pallas kernels above)
# ----------------------------------------------------------------------------
def _circular_k3_cat(x, conv_w):
    """Conv1d(k=3, padding=1, circular) in NLC layout as a single matmul:
    returns x_cat [B*L, 3*Cin] and w_cat [3*Cin, Cout] (torch w is [Cout,Cin,3])."""
    B, L, Cin = x.shape
    x_prev = jnp.roll(x, 1, axis=1)     # x[(l-1) mod L]
    x_next = jnp.roll(x, -1, axis=1)    # x[(l+1) mod L]
    x_cat = jnp.concatenate([x_prev, x, x_next], axis=-1).reshape(B * L, 3 * Cin)
    w_cat = jnp.concatenate(
        [conv_w[:, :, 0].T, conv_w[:, :, 1].T, conv_w[:, :, 2].T], axis=0)
    return x_cat, w_cat


def sinusoid_table(n_pos, d_model):
    position = jnp.arange(n_pos, dtype=jnp.float32)[:, None]
    div_term = jnp.exp(jnp.arange(0, d_model, 2, dtype=jnp.float32)
                       * (-math.log(10000.0) / d_model))
    pe = jnp.zeros((n_pos, d_model), dtype=jnp.float32)
    pe = pe.at[:, 0::2].set(jnp.sin(position * div_term))
    pe = pe.at[:, 1::2].set(jnp.cos(position * div_term))
    return pe


def temporal_embedding(x_mark, d_model):
    # embed='fixed', freq='h': month(13), day(32), weekday(7), hour(24)
    month = jnp.take(sinusoid_table(13, d_model), x_mark[..., 0], axis=0)
    day = jnp.take(sinusoid_table(32, d_model), x_mark[..., 1], axis=0)
    weekday = jnp.take(sinusoid_table(7, d_model), x_mark[..., 2], axis=0)
    hour = jnp.take(sinusoid_table(24, d_model), x_mark[..., 3], axis=0)
    return month + day + weekday + hour


def data_embedding(x, x_mark, p, d_model):
    B, L, _ = x.shape
    x_cat, w_cat = _circular_k3_cat(x, p["conv_w"])
    # Positional + fixed temporal embeddings (tiny table lookups, JAX glue)
    # folded into the additive epilogue of the token-embedding conv matmul.
    add = (p["conv_b"][None, None, :]
           + sinusoid_table(L, d_model)[None, :, :]
           + temporal_embedding(x_mark, d_model)).reshape(B * L, d_model)
    return pallas_matmul_add(x_cat, w_cat, add).reshape(B, L, d_model)


def conv_distil_layer(x, p):
    # Conv1d(c,c,3, circular) -> BatchNorm1d(batch stats) -> ELU  (one kernel)
    # -> MaxPool1d(kernel=3, stride=2, padding=1)                  (JAX glue)
    B, L, C = x.shape
    x_cat, w_cat = _circular_k3_cat(x, p["conv_w"])
    y = pl.pallas_call(
        _distil_kernel,
        out_shape=jax.ShapeDtypeStruct((B * L, C), jnp.float32),
    )(x_cat.astype(jnp.float32), w_cat.astype(jnp.bfloat16),
      p["conv_b"].reshape(1, C).astype(jnp.float32),
      p["bn_g"].reshape(1, C).astype(jnp.float32),
      p["bn_b"].reshape(1, C).astype(jnp.float32))
    y = y.reshape(B, L, C)
    neg = jnp.full((B, 1, C), -jnp.inf, dtype=y.dtype)
    yp = jnp.concatenate([neg, y, neg], axis=1)     # every window has >=1 real
    Lout = (L - 1) // 2 + 1
    idx = 2 * jnp.arange(Lout)
    return jnp.maximum(jnp.maximum(yp[:, idx], yp[:, idx + 1]), yp[:, idx + 2])


def encoder_layer(x, p, n_heads, final_ln=None):
    x = attention_block(x, x, p["attn"], p["ln1_g"], p["ln1_b"], n_heads, causal=False)
    return ffn_block(x, p, p["ln2_g"], p["ln2_b"], final_ln=final_ln)


def decoder_layer(x, cross, p, n_heads):
    # ProbAttention(mask_flag=True) == causal dense attention at these lengths
    x = attention_block(x, x, p["self_attn"], p["ln1_g"], p["ln1_b"], n_heads, causal=True)
    x = attention_block(x, cross, p["cross_attn"], p["ln2_g"], p["ln2_b"], n_heads, causal=False)
    return ffn_block(x, p, p["ln3_g"], p["ln3_b"])


def informer_forward(params, x_enc, x_mark_enc, x_dec, x_mark_dec, cfg):
    d_model, n_heads = cfg["d_model"], cfg["n_heads"]
    # --- encoder embedding + encoder (with distillation conv layers) ---
    enc_out = data_embedding(x_enc, x_mark_enc, params["enc_emb"], d_model)
    enc_layers = params["enc_layers"]
    for i in range(len(enc_layers) - 1):
        enc_out = encoder_layer(enc_out, enc_layers[i], n_heads)
        enc_out = conv_distil_layer(enc_out, params["enc_convs"][i])
    # Encoder's final LayerNorm is folded into the last layer's FFN kernel.
    enc_out = encoder_layer(enc_out, enc_layers[-1], n_heads,
                            final_ln=(params["enc_norm_g"], params["enc_norm_b"]))
    # --- decoder embedding + decoder ---
    dec_out = data_embedding(x_dec, x_mark_dec, params["dec_emb"], d_model)
    for lp in params["dec_layers"]:
        dec_out = decoder_layer(dec_out, enc_out, lp, n_heads)
    # --- final LayerNorm + projection, fused, applied only to the predicted
    #     window (both are row-wise so slicing first is exact). ---
    pred_len = cfg["pred_len"]
    dec_tail = dec_out[:, -pred_len:, :]
    B, Lp, D = dec_tail.shape
    proj = pallas_ln_matmul_add(dec_tail.reshape(B * Lp, D),
                                params["dec_norm_g"], params["dec_norm_b"],
                                params["proj_w"], params["proj_b"].reshape(1, -1))
    return proj.reshape(B, Lp, -1)


# ----------------------------------------------------------------------------
# Deterministic parameter initialization (synthetic weights, no checkpoint)
# ----------------------------------------------------------------------------
def init_params(key, cfg):
    d_model, d_ff, n_heads = cfg["d_model"], cfg["d_ff"], cfg["n_heads"]
    enc_in, dec_in, c_out = cfg["enc_in"], cfg["dec_in"], cfg["c_out"]
    keys = iter(jax.random.split(key, 256))

    def nk():
        return next(keys)

    def normal(shape, scale=0.02):
        return scale * jax.random.normal(nk(), shape, dtype=jnp.float32)

    def lin(in_d, out_d):
        return normal((in_d, out_d)), normal((out_d,))

    def attn_params():
        wq, bq = lin(d_model, d_model)
        wk, bk = lin(d_model, d_model)
        wv, bv = lin(d_model, d_model)
        wo, bo = lin(d_model, d_model)
        return dict(wq=wq, bq=bq, wk=wk, bk=bk, wv=wv, bv=bv, wo=wo, bo=bo)

    def enc_layer_params():
        w1, b1 = lin(d_model, d_ff)
        w2, b2 = lin(d_ff, d_model)
        return dict(attn=attn_params(), w1=w1, b1=b1, w2=w2, b2=b2,
                    ln1_g=jnp.ones(d_model), ln1_b=jnp.zeros(d_model),
                    ln2_g=jnp.ones(d_model), ln2_b=jnp.zeros(d_model))

    def dec_layer_params():
        w1, b1 = lin(d_model, d_ff)
        w2, b2 = lin(d_ff, d_model)
        return dict(self_attn=attn_params(), cross_attn=attn_params(),
                    w1=w1, b1=b1, w2=w2, b2=b2,
                    ln1_g=jnp.ones(d_model), ln1_b=jnp.zeros(d_model),
                    ln2_g=jnp.ones(d_model), ln2_b=jnp.zeros(d_model),
                    ln3_g=jnp.ones(d_model), ln3_b=jnp.zeros(d_model))

    def conv_distil_params():
        return dict(conv_w=normal((d_model, d_model, 3)),
                    conv_b=normal((d_model,)),
                    bn_g=jnp.ones(d_model), bn_b=jnp.zeros(d_model))

    params = dict(
        # TokenEmbedding conv bias kept at zero (matches bias-free reference).
        enc_emb=dict(conv_w=normal((d_model, enc_in, 3)), conv_b=jnp.zeros(d_model)),
        dec_emb=dict(conv_w=normal((d_model, dec_in, 3)), conv_b=jnp.zeros(d_model)),
        enc_layers=[enc_layer_params() for _ in range(cfg["e_layers"])],
        enc_convs=[conv_distil_params() for _ in range(cfg["e_layers"] - 1)],
        enc_norm_g=jnp.ones(d_model), enc_norm_b=jnp.zeros(d_model),
        dec_layers=[dec_layer_params() for _ in range(cfg["d_layers"])],
        dec_norm_g=jnp.ones(d_model), dec_norm_b=jnp.zeros(d_model),
        proj_w=normal((d_model, c_out)), proj_b=normal((c_out,)),
    )
    return params


def make_time_marks(key, B, L):
    # [month(0..12), day(0..31), weekday(0..6), hour(0..23)] integer indices
    k1, k2, k3, k4 = jax.random.split(key, 4)
    month = jax.random.randint(k1, (B, L), 0, 13)
    day = jax.random.randint(k2, (B, L), 0, 32)
    weekday = jax.random.randint(k3, (B, L), 0, 7)
    hour = jax.random.randint(k4, (B, L), 0, 24)
    return jnp.stack([month, day, weekday, hour], axis=-1).astype(jnp.int32)


# ----------------------------------------------------------------------------
# Main
# ----------------------------------------------------------------------------
if __name__ == "__main__":
    cfg = dict(enc_in=4, dec_in=4, c_out=4,
               seq_len=8, label_len=4, pred_len=4,
               d_model=32, n_heads=4, e_layers=2, d_layers=1, d_ff=64,
               factor=5)

    root = jax.random.PRNGKey(0)
    kp, k1, k2, k3, k4 = jax.random.split(root, 5)
    params = init_params(kp, cfg)

    B = 2
    Ldec = cfg["label_len"] + cfg["pred_len"]
    x_enc = jax.random.normal(k1, (B, cfg["seq_len"], cfg["enc_in"]), jnp.float32)
    x_dec = jax.random.normal(k2, (B, Ldec, cfg["dec_in"]), jnp.float32)
    x_mark_enc = make_time_marks(k3, B, cfg["seq_len"])
    x_mark_dec = make_time_marks(k4, B, Ldec)

    fwd = jax.jit(lambda p, a, b_, c, d: informer_forward(p, a, b_, c, d, cfg))
    out = fwd(params, x_enc, x_mark_enc, x_dec, x_mark_dec)
    out = jax.block_until_ready(out)

    assert out.shape == (B, cfg["pred_len"], cfg["c_out"]), out.shape
    assert bool(jnp.all(jnp.isfinite(out)))
    # TODO(synk): ProbAttention's random key-subsampling / top-u query selection
    # is not implemented as such; at these lengths (factor*ceil(ln L) >= L) it is
    # mathematically identical to the dense (causal) attention computed here.
    print("KERNEL_OK")
</pallas_src>

<mosaic_0001>
module attributes {stable_mosaic.version = 11 : i64} {
  func.func @_matmul_add_kernel(%arg0: memref<16x12xf32, #tpu.memory_space<vmem>>, %arg1: memref<12x32xbf16, #tpu.memory_space<vmem>>, %arg2: memref<16x32xf32, #tpu.memory_space<vmem>>, %arg3: memref<16x32xf32, #tpu.memory_space<vmem>>) attributes {dimension_semantics = [], scalar_prefetch = 0 : i64, scratch_operands = 0 : i64, tpu.core_type = #tpu.core_type<tc>} {
    %c0 = arith.constant 0 : index
    %c0_0 = arith.constant 0 : index
    %0 = vector.load %arg0[%c0, %c0_0] : memref<16x12xf32, #tpu.memory_space<vmem>>, vector<16x12xf32>
    %1 = arith.truncf %0 : vector<16x12xf32> to vector<16x12xbf16>
    %c0_1 = arith.constant 0 : index
    %c0_2 = arith.constant 0 : index
    %2 = vector.load %arg1[%c0_1, %c0_2] : memref<12x32xbf16, #tpu.memory_space<vmem>>, vector<12x32xbf16>
    %cst = arith.constant dense<0.000000e+00> : vector<16x32xf32>
    %3 = tpu.matmul %1, %2, %cst {dimension_numbers = #tpu.dot_dimension_numbers<[1], [0], [0], [1], [0, 0, 1, 1], [], []>} : vector<16x12xbf16>, vector<12x32xbf16>, vector<16x32xf32> -> vector<16x32xf32>
    %c0_3 = arith.constant 0 : index
    %c0_4 = arith.constant 0 : index
    %4 = vector.load %arg2[%c0_3, %c0_4] : memref<16x32xf32, #tpu.memory_space<vmem>>, vector<16x32xf32>
    %5 = arith.addf %3, %4 : vector<16x32xf32>
    %c0_5 = arith.constant 0 : index
    %c0_6 = arith.constant 0 : index
    %6 = vector.load %arg3[%c0_5, %c0_6] : memref<16x32xf32, #tpu.memory_space<vmem>>, vector<16x32xf32>
    tpu.vector_store %arg3[%c0_5, %c0_6], %5 {strides = array<i32>} : memref<16x32xf32, #tpu.memory_space<vmem>>, vector<16x32xf32>,
    return
  }
}

module attributes {stable_mosaic.version = 11 : i64} {
  func.func @_attn_block_kernel(%arg0: i32, %arg1: memref<1x8x32xf32, #tpu.memory_space<vmem>>, %arg2: memref<1x8x32xf32, #tpu.memory_space<vmem>>, %arg3: memref<32x32xbf16, #tpu.memory_space<vmem>>, %arg4: memref<1x32xf32, #tpu.memory_space<vmem>>, %arg5: memref<32x32xbf16, #tpu.memory_space<vmem>>, %arg6: memref<1x32xf32, #tpu.memory_space<vmem>>, %arg7: memref<32x32xbf16, #tpu.memory_space<vmem>>, %arg8: memref<1x32xf32, #tpu.memory_space<vmem>>, %arg9: memref<32x32xbf16, #tpu.memory_space<vmem>>, %arg10: memref<1x32xf32, #tpu.memory_space<vmem>>, %arg11: memref<1x32xf32, #tpu.memory_space<vmem>>, %arg12: memref<1x32xf32, #tpu.memory_space<vmem>>, %arg13: memref<1x8x32xf32, #tpu.memory_space<vmem>>) attributes {dimension_semantics = [#tpu.dimension_semantics<parallel>], iteration_bounds = array<i64: 2>, scalar_prefetch = 0 : i64, scratch_operands = 0 : i64, tpu.core_type = #tpu.core_type<tc>, window_params = [{transform_indices = @transform_0, window_bounds = array<i64: 1, 8, 32>}, {transform_indices = @transform_1, window_bounds = array<i64: 1, 8, 32>}, {pipeline_mode = #tpu.pipeline_mode<synchronous>, transform_indices = @transform_2, window_bounds = array<i64: 32, 32>}, {pipeline_mode = #tpu.pipeline_mode<synchronous>, transform_indices = @transform_3, window_bounds = array<i64: 1, 32>}, {pipeline_mode = #tpu.pipeline_mode<synchronous>, transform_indices = @transform_4, window_bounds = array<i64: 32, 32>}, {pipeline_mode = #tpu.pipeline_mode<synchronous>, transform_indices = @transform_5, window_bounds = array<i64: 1, 32>}, {pipeline_mode = #tpu.pipeline_mode<synchronous>, transform_indices = @transform_6, window_bounds = array<i64: 32, 32>}, {pipeline_mode = #tpu.pipeline_mode<synchronous>, transform_indices = @transform_7, window_bounds = array<i64: 1, 32>}, {pipeline_mode = #tpu.pipeline_mode<synchronous>, transform_indices = @transform_8, window_bounds = array<i64: 32, 32>}, {pipeline_mode = #tpu.pipeline_mode<synchronous>, transform_indices = @transform_9, window_bounds = array<i64: 1, 32>}, {pipeline_mode = #tpu.pipeline_mode<synchronous>, transform_indices = @transform_10, window_bounds = array<i64: 1, 32>}, {pipeline_mode = #tpu.pipeline_mode<synchronous>, transform_indices = @transform_11, window_bounds = array<i64: 1, 32>}, {transform_indices = @transform_12, window_bounds = array<i64: 1, 8, 32>}]} {
    %c0 = arith.constant 0 : index
    %c0_0 = arith.constant 0 : index
    %c0_1 = arith.constant 0 : index
    %0 = vector.load %arg1[%c0, %c0_0, %c0_1] : memref<1x8x32xf32, #tpu.memory_space<vmem>>, vector<1x8x32xf32>
    %1 = vector.shape_cast %0 : vector<1x8x32xf32> to vector<8x32xf32>
    %c0_2 = arith.constant 0 : index
    %c0_3 = arith.constant 0 : index
    %c0_4 = arith.constant 0 : index
    %2 = vector.load %arg2[%c0_2, %c0_3, %c0_4] : memref<1x8x32xf32, #tpu.memory_space<vmem>>, vector<1x8x32xf32>
    %3 = vector.shape_cast %2 : vector<1x8x32xf32> to vector<8x32xf32>
    %4 = arith.truncf %1 : vector<8x32xf32> to vector<8x32xbf16>
    %c0_5 = arith.constant 0 : index
    %c0_6 = arith.constant 0 : index
    %5 = vector.load %arg3[%c0_5, %c0_6] : memref<32x32xbf16, #tpu.memory_space<vmem>>, vector<32x32xbf16>
    %cst = arith.constant dense<0.000000e+00> : vector<8x32xf32>
    %6 = tpu.matmul %4, %5, %cst {dimension_numbers = #tpu.dot_dimension_numbers<[1], [0], [0], [1], [0, 0, 1, 1], [], []>} : vector<8x32xbf16>, vector<32x32xbf16>, vector<8x32xf32> -> vector<8x32xf32>
    %c0_7 = arith.constant 0 : index
    %c0_8 = arith.constant 0 : index
    %7 = vector.load %arg4[%c0_7, %c0_8] : memref<1x32xf32, #tpu.memory_space<vmem>>, vector<1x32xf32>
    %8 = vector.broadcast %7 : vector<1x32xf32> to vector<8x32xf32>
    %9 = arith.addf %6, %8 : vector<8x32xf32>
    %10 = arith.truncf %3 : vector<8x32xf32> to vector<8x32xbf16>
    %c0_9 = arith.constant 0 : index
    %c0_10 = arith.constant 0 : index
    %11 = vector.load %arg5[%c0_9, %c0_10] : memref<32x32xbf16, #tpu.memory_space<vmem>>, vector<32x32xbf16>
    %cst_11 = arith.constant dense<0.000000e+00> : vector<8x32xf32>
    %12 = tpu.matmul %10, %11, %cst_11 {dimension_numbers = #tpu.dot_dimension_numbers<[1], [0], [0], [1], [0, 0, 1, 1], [], []>} : vector<8x32xbf16>, vector<32x32xbf16>, vector<8x32xf32> -> vector<8x32xf32>
    %c0_12 = arith.constant 0 : index
    %c0_13 = arith.constant 0 : index
    %13 = vector.load %arg6[%c0_12, %c0_13] : memref<1x32xf32, #tpu.memory_space<vmem>>, vector<1x32xf32>
    %14 = vector.broadcast %13 : vector<1x32xf32> to vector<8x32xf32>
    %15 = arith.addf %12, %14 : vector<8x32xf32>
    %16 = arith.truncf %3 : vector<8x32xf32> to vector<8x32xbf16>
    %c0_14 = arith.constant 0 : index
    %c0_15 = arith.constant 0 : index
    %17 = vector.load %arg7[%c0_14, %c0_15] : memref<32x32xbf16, #tpu.memory_space<vmem>>, vector<32x32xbf16>
    %cst_16 = arith.constant dense<0.000000e+00> : vector<8x32xf32>
    %18 = tpu.matmul %16, %17, %cst_16 {dimension_numbers = #tpu.dot_dimension_numbers<[1], [0], [0], [1], [0, 0, 1, 1], [], []>} : vector<8x32xbf16>, vector<32x32xbf16>, vector<8x32xf32> -> vector<8x32xf32>
    %c0_17 = arith.constant 0 : index
    %c0_18 = arith.constant 0 : index
    %19 = vector.load %arg8[%c0_17, %c0_18] : memref<1x32xf32, #tpu.memory_space<vmem>>, vector<1x32xf32>
    %20 = vector.broadcast %19 : vector<1x32xf32> to vector<8x32xf32>
    %21 = arith.addf %18, %20 : vector<8x32xf32>
    %cst_19 = arith.constant 0.353553385 : f32
    %22 = vector.broadcast %cst_19 : f32 to vector<8x32xf32>
    %23 = arith.mulf %9, %22 : vector<8x32xf32>
    %24 = arith.truncf %23 : vector<8x32xf32> to vector<8x32xbf16>
    %25 = arith.truncf %15 : vector<8x32xf32> to vector<8x32xbf16>
    %26 = arith.truncf %21 : vector<8x32xf32> to vector<8x32xbf16>
    %27 = tpu.iota {dimensions = array<i32: 1>} : vector<1x32xi32>
    %cst_20 = arith.constant 0.000000e+00 : f32
    %28 = vector.broadcast %cst_20 : f32 to vector<8x32xf32>
    %c0_i32 = arith.constant 0 : i32
    %29 = vector.broadcast %c0_i32 : i32 to vector<1x32xi32>
    %30 = arith.cmpi sge, %27, %29 : vector<1x32xi32>
    %c8_i32 = arith.constant 8 : i32
    %31 = vector.broadcast %c8_i32 : i32 to vector<1x32xi32>
    %32 = arith.cmpi slt, %27, %31 : vector<1x32xi32>
    %33 = arith.andi %30, %32 : vector<1x32xi1>
    %34 = arith.extui %33 : vector<1x32xi1> to vector<1x32xi32>
    %35 = arith.sitofp %34 : vector<1x32xi32> to vector<1x32xf32>
    %36 = arith.truncf %35 : vector<1x32xf32> to vector<1x32xbf16>
    %37 = vector.broadcast %36 : vector<1x32xbf16> to vector<8x32xbf16>
    %38 = arith.mulf %24, %37 : vector<8x32xbf16>
    %cst_21 = arith.constant dense<0.000000e+00> : vector<8x8xf32>
    %39 = tpu.matmul %38, %25, %cst_21 {dimension_numbers = #tpu.dot_dimension_numbers<[1], [1], [0], [0], [0, 0, 1, 0], [], []>} : vector<8x32xbf16>, vector<8x32xbf16>, vector<8x8xf32> -> vector<8x8xf32>
    %cst_22 = arith.constant dense<0xFF800000> : vector<8xf32>
    %40 = vector.multi_reduction <maximumf>, %39, %cst_22 [1] : vector<8x8xf32> to vector<8xf32>
    %41 = vector.shape_cast %40 : vector<8xf32> to vector<8x1xf32>
    %42 = vector.broadcast %41 : vector<8x1xf32> to vector<8x8xf32>
    %43 = arith.subf %39, %42 : vector<8x8xf32>
    %44 = math.exp %43 : vector<8x8xf32>
    %cst_23 = arith.constant dense<0.000000e+00> : vector<8xf32>
    %45 = vector.multi_reduction <add>, %44, %cst_23 [1] : vector<8x8xf32> to vector<8xf32>
    %46 = vector.shape_cast %45 : vector<8xf32> to vector<8x1xf32>
    %47 = tpu.reciprocal %46 {approx = true} : vector<8x1xf32> -> vector<8x1xf32>
    %48 = vector.broadcast %47 : vector<8x1xf32> to vector<8x8xf32>
    %49 = arith.mulf %44, %48 : vector<8x8xf32>
    %50 = arith.truncf %49 : vector<8x8xf32> to vector<8x8xbf16>
    %cst_24 = arith.constant dense<0.000000e+00> : vector<8x32xf32>
    %51 = tpu.matmul %50, %26, %cst_24 {dimension_numbers = #tpu.dot_dimension_numbers<[1], [0], [0], [1], [0, 0, 1, 1], [], []>} : vector<8x8xbf16>, vector<8x32xbf16>, vector<8x32xf32> -> vector<8x32xf32>
    %52 = vector.broadcast %35 : vector<1x32xf32> to vector<8x32xf32>
    %53 = arith.mulf %51, %52 : vector<8x32xf32>
    %54 = arith.addf %28, %53 : vector<8x32xf32>
    %c8_i32_25 = arith.constant 8 : i32
    %55 = vector.broadcast %c8_i32_25 : i32 to vector<1x32xi32>
    %56 = arith.cmpi sge, %27, %55 : vector<1x32xi32>
    %c16_i32 = arith.constant 16 : i32
    %57 = vector.broadcast %c16_i32 : i32 to vector<1x32xi32>
    %58 = arith.cmpi slt, %27, %57 : vector<1x32xi32>
    %59 = arith.andi %56, %58 : vector<1x32xi1>
    %60 = arith.extui %59 : vector<1x32xi1> to vector<1x32xi32>
    %61 = arith.sitofp %60 : vector<1x32xi32> to vector<1x32xf32>
    %62 = arith.truncf %61 : vector<1x32xf32> to vector<1x32xbf16>
    %63 = vector.broadcast %62 : vector<1x32xbf16> to vector<8x32xbf16>
    %64 = arith.mulf %24, %63 : vector<8x32xbf16>
    %cst_26 = arith.constant dense<0.000000e+00> : vector<8x8xf32>
    %65 = tpu.matmul %64, %25, %cst_26 {dimension_numbers = #tpu.dot_dimension_numbers<[1], [1], [0], [0], [0, 0, 1, 0], [], []>} : vector<8x32xbf16>, vector<8x32xbf16>, vector<8x8xf32> -> vector<8x8xf32>
    %cst_27 = arith.constant dense<0xFF800000> : vector<8xf32>
    %66 = vector.multi_reduction <maximumf>, %65, %cst_27 [1] : vector<8x8xf32> to vector<8xf32>
    %67 = vector.shape_cast %66 : vector<8xf32> to vector<8x1xf32>
    %68 = vector.broadcast %67 : vector<8x1xf32> to vector<8x8xf32>
    %69 = arith.subf %65, %68 : vector<8x8xf32>
    %70 = math.exp %69 : vector<8x8xf32>
    %cst_28 = arith.constant dense<0.000000e+00> : vector<8xf32>
    %71 = vector.multi_reduction <add>, %70, %cst_28 [1] : vector<8x8xf32> to vector<8xf32>
    %72 = vector.shape_cast %71 : vector<8xf32> to vector<8x1xf32>
    %73 = tpu.reciprocal %72 {approx = true} : vector<8x1xf32> -> vector<8x1xf32>
    %74 = vector.broadcast %73 : vector<8x1xf32> to vector<8x8xf32>
    %75 = arith.mulf %70, %74 : vector<8x8xf32>
    %76 = arith.truncf %75 : vector<8x8xf32> to vector<8x8xbf16>
    %cst_29 = arith.constant dense<0.000000e+00> : vector<8x32xf32>
    %77 = tpu.matmul %76, %26, %cst_29 {dimension_numbers = #tpu.dot_dimension_numbers<[1], [0], [0], [1], [0, 0, 1, 1], [], []>} : vector<8x8xbf16>, vector<8x32xbf16>, vector<8x32xf32> -> vector<8x32xf32>
    %78 = vector.broadcast %61 : vector<1x32xf32> to vector<8x32xf32>
    %79 = arith.mulf %77, %78 : vector<8x32xf32>
    %80 = arith.addf %54, %79 : vector<8x32xf32>
    %c16_i32_30 = arith.constant 16 : i32
    %81 = vector.broadcast %c16_i32_30 : i32 to vector<1x32xi32>
    %82 = arith.cmpi sge, %27, %81 : vector<1x32xi32>
    %c24_i32 = arith.constant 24 : i32
    %83 = vector.broadcast %c24_i32 : i32 to vector<1x32xi32>
    %84 = arith.cmpi slt, %27, %83 : vector<1x32xi32>
    %85 = arith.andi %82, %84 : vector<1x32xi1>
    %86 = arith.extui %85 : vector<1x32xi1> to vector<1x32xi32>
    %87 = arith.sitofp %86 : vector<1x32xi32> to vector<1x32xf32>
    %88 = arith.truncf %87 : vector<1x32xf32> to vector<1x32xbf16>
    %89 = vector.broadcast %88 : vector<1x32xbf16> to vector<8x32xbf16>
    %90 = arith.mulf %24, %89 : vector<8x32xbf16>
    %cst_31 = arith.constant dense<0.000000e+00> : vector<8x8xf32>
    %91 = tpu.matmul %90, %25, %cst_31 {dimension_numbers = #tpu.dot_dimension_numbers<[1], [1], [0], [0], [0, 0, 1, 0], [], []>} : vector<8x32xbf16>, vector<8x32xbf16>, vector<8x8xf32> -> vector<8x8xf32>
    %cst_32 = arith.constant dense<0xFF800000> : vector<8xf32>
    %92 = vector.multi_reduction <maximumf>, %91, %cst_32 [1] : vector<8x8xf32> to vector<8xf32>
    %93 = vector.shape_cast %92 : vector<8xf32> to vector<8x1xf32>
    %94 = vector.broadcast %93 : vector<8x1xf32> to vector<8x8xf32>
    %95 = arith.subf %91, %94 : vector<8x8xf32>
    %96 = math.exp %95 : vector<8x8xf32>
    %cst_33 = arith.constant dense<0.000000e+00> : vector<8xf32>
    %97 = vector.multi_reduction <add>, %96, %cst_33 [1] : vector<8x8xf32> to vector<8xf32>
    %98 = vector.shape_cast %97 : vector<8xf32> to vector<8x1xf32>
    %99 = tpu.reciprocal %98 {approx = true} : vector<8x1xf32> -> vector<8x1xf32>
    %100 = vector.broadcast %99 : vector<8x1xf32> to vector<8x8xf32>
    %101 = arith.mulf %96, %100 : vector<8x8xf32>
    %102 = arith.truncf %101 : vector<8x8xf32> to vector<8x8xbf16>
    %cst_34 = arith.constant dense<0.000000e+00> : vector<8x32xf32>
    %103 = tpu.matmul %102, %26, %cst_34 {dimension_numbers = #tpu.dot_dimension_numbers<[1], [0], [0], [1], [0, 0, 1, 1], [], []>} : vector<8x8xbf16>, vector<8x32xbf16>, vector<8x32xf32> -> vector<8x32xf32>
    %104 = vector.broadcast %87 : vector<1x32xf32> to vector<8x32xf32>
    %105 = arith.mulf %103, %104 : vector<8x32xf32>
    %106 = arith.addf %80, %105 : vector<8x32xf32>
    %c24_i32_35 = arith.constant 24 : i32
    %107 = vector.broadcast %c24_i32_35 : i32 to vector<1x32xi32>
    %108 = arith.cmpi sge, %27, %107 : vector<1x32xi32>
    %c32_i32 = arith.constant 32 : i32
    %109 = vector.broadcast %c32_i32 : i32 to vector<1x32xi32>
    %110 = arith.cmpi slt, %27, %109 : vector<1x32xi32>
    %111 = arith.andi %108, %110 : vector<1x32xi1>
    %112 = arith.extui %111 : vector<1x32xi1> to vector<1x32xi32>
    %113 = arith.sitofp %112 : vector<1x32xi32> to vector<1x32xf32>
    %114 = arith.truncf %113 : vector<1x32xf32> to vector<1x32xbf16>
    %115 = vector.broadcast %114 : vector<1x32xbf16> to vector<8x32xbf16>
    %116 = arith.mulf %24, %115 : vector<8x32xbf16>
    %cst_36 = arith.constant dense<0.000000e+00> : vector<8x8xf32>
    %117 = tpu.matmul %116, %25, %cst_36 {dimension_numbers = #tpu.dot_dimension_numbers<[1], [1], [0], [0], [0, 0, 1, 0], [], []>} : vector<8x32xbf16>, vector<8x32xbf16>, vector<8x8xf32> -> vector<8x8xf32>
    %cst_37 = arith.constant dense<0xFF800000> : vector<8xf32>
    %118 = vector.multi_reduction <maximumf>, %117, %cst_37 [1] : vector<8x8xf32> to vector<8xf32>
    %119 = vector.shape_cast %118 : vector<8xf32> to vector<8x1xf32>
    %120 = vector.broadcast %119 : vector<8x1xf32> to vector<8x8xf32>
    %121 = arith.subf %117, %120 : vector<8x8xf32>
    %122 = math.exp %121 : vector<8x8xf32>
    %cst_38 = arith.constant dense<0.000000e+00> : vector<8xf32>
    %123 = vector.multi_reduction <add>, %122, %cst_38 [1] : vector<8x8xf32> to vector<8xf32>
    %124 = vector.shape_cast %123 : vector<8xf32> to vector<8x1xf32>
    %125 = tpu.reciprocal %124 {approx = true} : vector<8x1xf32> -> vector<8x1xf32>
    %126 = vector.broadcast %125 : vector<8x1xf32> to vector<8x8xf32>
    %127 = arith.mulf %122, %126 : vector<8x8xf32>
    %128 = arith.truncf %127 : vector<8x8xf32> to vector<8x8xbf16>
    %cst_39 = arith.constant dense<0.000000e+00> : vector<8x32xf32>
    %129 = tpu.matmul %128, %26, %cst_39 {dimension_numbers = #tpu.dot_dimension_numbers<[1], [0], [0], [1], [0, 0, 1, 1], [], []>} : vector<8x8xbf16>, vector<8x32xbf16>, vector<8x32xf32> -> vector<8x32xf32>
    %130 = vector.broadcast %113 : vector<1x32xf32> to vector<8x32xf32>
    %131 = arith.mulf %129, %130 : vector<8x32xf32>
    %132 = arith.addf %106, %131 : vector<8x32xf32>
    %133 = arith.truncf %132 : vector<8x32xf32> to vector<8x32xbf16>
    %c0_40 = arith.constant 0 : index
    %c0_41 = arith.constant 0 : index
    %134 = vector.load %arg9[%c0_40, %c0_41] : memref<32x32xbf16, #tpu.memory_space<vmem>>, vector<32x32xbf16>
    %cst_42 = arith.constant dense<0.000000e+00> : vector<8x32xf32>
    %135 = tpu.matmul %133, %134, %cst_42 {dimension_numbers = #tpu.dot_dimension_numbers<[1], [0], [0], [1], [0, 0, 1, 1], [], []>} : vector<8x32xbf16>, vector<32x32xbf16>, vector<8x32xf32> -> vector<8x32xf32>
    %c0_43 = arith.constant 0 : index
    %c0_44 = arith.constant 0 : index
    %136 = vector.load %arg10[%c0_43, %c0_44] : memref<1x32xf32, #tpu.memory_space<vmem>>, vector<1x32xf32>
    %137 = vector.broadcast %136 : vector<1x32xf32> to vector<8x32xf32>
    %138 = arith.addf %135, %137 : vector<8x32xf32>
    %139 = arith.addf %1, %138 : vector<8x32xf32>
    %c0_45 = arith.constant 0 : index
    %c0_46 = arith.constant 0 : index
    %140 = vector.load %arg11[%c0_45, %c0_46] : memref<1x32xf32, #tpu.memory_space<vmem>>, vector<1x32xf32>
    %c0_47 = arith.constant 0 : index
    %c0_48 = arith.constant 0 : index
    %141 = vector.load %arg12[%c0_47, %c0_48] : memref<1x32xf32, #tpu.memory_space<vmem>>, vector<1x32xf32>
    %cst_49 = arith.constant dense<0.000000e+00> : vector<8xf32>
    %142 = vector.multi_reduction <add>, %139, %cst_49 [1] : vector<8x32xf32> to vector<8xf32>
    %143 = vector.shape_cast %142 : vector<8xf32> to vector<8x1xf32>
    %cst_50 = arith.constant 3.200000e+01 : f32
    %144 = vector.broadcast %cst_50 : f32 to vector<8x1xf32>
    %145 = arith.divf %143, %144 : vector<8x1xf32>
    %146 = vector.broadcast %145 : vector<8x1xf32> to vector<8x32xf32>
    %147 = arith.subf %139, %146 : vector<8x32xf32>
    %148 = arith.mulf %147, %147 : vector<8x32xf32>
    %cst_51 = arith.constant dense<0.000000e+00> : vector<8xf32>
    %149 = vector.multi_reduction <add>, %148, %cst_51 [1] : vector<8x32xf32> to vector<8xf32>
    %150 = vector.shape_cast %149 : vector<8xf32> to vector<8x1xf32>
    %cst_52 = arith.constant 3.200000e+01 : f32
    %151 = vector.broadcast %cst_52 : f32 to vector<8x1xf32>
    %152 = arith.divf %150, %151 : vector<8x1xf32>
    %cst_53 = arith.constant 9.99999974E-6 : f32
    %153 = vector.broadcast %cst_53 : f32 to vector<8x1xf32>
    %154 = arith.addf %152, %153 : vector<8x1xf32>
    %155 = math.rsqrt %154 : vector<8x1xf32>
    %156 = vector.broadcast %155 : vector<8x1xf32> to vector<8x32xf32>
    %157 = arith.mulf %147, %156 : vector<8x32xf32>
    %158 = vector.broadcast %140 : vector<1x32xf32> to vector<8x32xf32>
    %159 = arith.mulf %157, %158 : vector<8x32xf32>
    %160 = vector.broadcast %141 : vector<1x32xf32> to vector<8x32xf32>
    %161 = arith.addf %159, %160 : vector<8x32xf32>
    %c0_54 = arith.constant 0 : index
    %c0_55 = arith.constant 0 : index
    %c0_56 = arith.constant 0 : index
    %162 = vector.load %arg13[%c0_54, %c0_55, %c0_56] : memref<1x8x32xf32, #tpu.memory_space<vmem>>, vector<1x8x32xf32>
    %163 = vector.shape_cast %162 : vector<1x8x32xf32> to vector<8x32xf32>
    %164 = vector.shape_cast %161 : vector<8x32xf32> to vector<1x8x32xf32>
    tpu.vector_store %arg13[%c0_54, %c0_55, %c0_56], %164 {strides = array<i32>} : memref<1x8x32xf32, #tpu.memory_space<vmem>>, vector<1x8x32xf32>,
    return
  }
  func.func @transform_0(%arg0: i32) -> (i32, i32, i32) {
    %c0_i32 = arith.constant 0 : i32
    %c0_i32_0 = arith.constant 0 : i32
    %c0_i32_1 = arith.constant 0 : i32
    return %arg0, %c0_i32, %c0_i32_0 : i32, i32, i32
  }
  func.func @transform_1(%arg0: i32) -> (i32, i32, i32) {
    %c0_i32 = arith.constant 0 : i32
    %c0_i32_0 = arith.constant 0 : i32
    %c0_i32_1 = arith.constant 0 : i32
    return %arg0, %c0_i32, %c0_i32_0 : i32, i32, i32
  }
  func.func @transform_2(%arg0: i32) -> (i32, i32) {
    %c0_i32 = arith.constant 0 : i32
    %c0_i32_0 = arith.constant 0 : i32
    %c0_i32_1 = arith.constant 0 : i32
    return %c0_i32, %c0_i32_0 : i32, i32
  }
  func.func @transform_3(%arg0: i32) -> (i32, i32) {
    %c0_i32 = arith.constant 0 : i32
    %c0_i32_0 = arith.constant 0 : i32
    %c0_i32_1 = arith.constant 0 : i32
    return %c0_i32, %c0_i32_0 : i32, i32
  }
  func.func @transform_4(%arg0: i32) -> (i32, i32) {
    %c0_i32 = arith.constant 0 : i32
    %c0_i32_0 = arith.constant 0 : i32
    %c0_i32_1 = arith.constant 0 : i32
    return %c0_i32, %c0_i32_0 : i32, i32
  }
  func.func @transform_5(%arg0: i32) -> (i32, i32) {
    %c0_i32 = arith.constant 0 : i32
    %c0_i32_0 = arith.constant 0 : i32
    %c0_i32_1 = arith.constant 0 : i32
    return %c0_i32, %c0_i32_0 : i32, i32
  }
  func.func @transform_6(%arg0: i32) -> (i32, i32) {
    %c0_i32 = arith.constant 0 : i32
    %c0_i32_0 = arith.constant 0 : i32
    %c0_i32_1 = arith.constant 0 : i32
    return %c0_i32, %c0_i32_0 : i32, i32
  }
  func.func @transform_7(%arg0: i32) -> (i32, i32) {
    %c0_i32 = arith.constant 0 : i32
    %c0_i32_0 = arith.constant 0 : i32
    %c0_i32_1 = arith.constant 0 : i32
    return %c0_i32, %c0_i32_0 : i32, i32
  }
  func.func @transform_8(%arg0: i32) -> (i32, i32) {
    %c0_i32 = arith.constant 0 : i32
    %c0_i32_0 = arith.constant 0 : i32
    %c0_i32_1 = arith.constant 0 : i32
    return %c0_i32, %c0_i32_0 : i32, i32
  }
  func.func @transform_9(%arg0: i32) -> (i32, i32) {
    %c0_i32 = arith.constant 0 : i32
    %c0_i32_0 = arith.constant 0 : i32
    %c0_i32_1 = arith.constant 0 : i32
    return %c0_i32, %c0_i32_0 : i32, i32
  }
  func.func @transform_10(%arg0: i32) -> (i32, i32) {
    %c0_i32 = arith.constant 0 : i32
    %c0_i32_0 = arith.constant 0 : i32
    %c0_i32_1 = arith.constant 0 : i32
    return %c0_i32, %c0_i32_0 : i32, i32
  }
  func.func @transform_11(%arg0: i32) -> (i32, i32) {
    %c0_i32 = arith.constant 0 : i32
    %c0_i32_0 = arith.constant 0 : i32
    %c0_i32_1 = arith.constant 0 : i32
    return %c0_i32, %c0_i32_0 : i32, i32
  }
  func.func @transform_12(%arg0: i32) -> (i32, i32, i32) {
    %c0_i32 = arith.constant 0 : i32
    %c0_i32_0 = arith.constant 0 : i32
    %c0_i32_1 = arith.constant 0 : i32
    return %arg0, %c0_i32, %c0_i32_0 : i32, i32, i32
  }
}

module attributes {stable_mosaic.version = 11 : i64} {
  func.func @_ffn_block_kernel(%arg0: memref<16x32xf32, #tpu.memory_space<vmem>>, %arg1: memref<32x64xbf16, #tpu.memory_space<vmem>>, %arg2: memref<1x64xf32, #tpu.memory_space<vmem>>, %arg3: memref<64x32xbf16, #tpu.memory_space<vmem>>, %arg4: memref<1x32xf32, #tpu.memory_space<vmem>>, %arg5: memref<1x32xf32, #tpu.memory_space<vmem>>, %arg6: memref<1x32xf32, #tpu.memory_space<vmem>>, %arg7: memref<16x32xf32, #tpu.memory_space<vmem>>) attributes {dimension_semantics = [], scalar_prefetch = 0 : i64, scratch_operands = 0 : i64, tpu.core_type = #tpu.core_type<tc>} {
    %c0 = arith.constant 0 : index
    %c0_0 = arith.constant 0 : index
    %0 = vector.load %arg0[%c0, %c0_0] : memref<16x32xf32, #tpu.memory_space<vmem>>, vector<16x32xf32>
    %c0_1 = arith.constant 0 : index
    %c0_2 = arith.constant 0 : index
    %1 = vector.load %arg1[%c0_1, %c0_2] : memref<32x64xbf16, #tpu.memory_space<vmem>>, vector<32x64xbf16>
    %c0_3 = arith.constant 0 : index
    %c0_4 = arith.constant 0 : index
    %2 = vector.load %arg2[%c0_3, %c0_4] : memref<1x64xf32, #tpu.memory_space<vmem>>, vector<1x64xf32>
    %c0_5 = arith.constant 0 : index
    %c0_6 = arith.constant 0 : index
    %3 = vector.load %arg3[%c0_5, %c0_6] : memref<64x32xbf16, #tpu.memory_space<vmem>>, vector<64x32xbf16>
    %c0_7 = arith.constant 0 : index
    %c0_8 = arith.constant 0 : index
    %4 = vector.load %arg4[%c0_7, %c0_8] : memref<1x32xf32, #tpu.memory_space<vmem>>, vector<1x32xf32>
    %c0_9 = arith.constant 0 : index
    %c0_10 = arith.constant 0 : index
    %5 = vector.load %arg5[%c0_9, %c0_10] : memref<1x32xf32, #tpu.memory_space<vmem>>, vector<1x32xf32>
    %c0_11 = arith.constant 0 : index
    %c0_12 = arith.constant 0 : index
    %6 = vector.load %arg6[%c0_11, %c0_12] : memref<1x32xf32, #tpu.memory_space<vmem>>, vector<1x32xf32>
    %7 = arith.truncf %0 : vector<16x32xf32> to vector<16x32xbf16>
    %cst = arith.constant dense<0.000000e+00> : vector<16x64xf32>
    %8 = tpu.matmul %7, %1, %cst {dimension_numbers = #tpu.dot_dimension_numbers<[1], [0], [0], [1], [0, 0, 1, 1], [], []>} : vector<16x32xbf16>, vector<32x64xbf16>, vector<16x64xf32> -> vector<16x64xf32>
    %9 = vector.broadcast %2 : vector<1x64xf32> to vector<16x64xf32>
    %10 = arith.addf %8, %9 : vector<16x64xf32>
    %cst_13 = arith.constant 5.000000e-01 : f32
    %11 = vector.broadcast %cst_13 : f32 to vector<16x64xf32>
    %12 = arith.mulf %11, %10 : vector<16x64xf32>
    %cst_14 = arith.constant 0.707106769 : f32
    %13 = vector.broadcast %cst_14 : f32 to vector<16x64xf32>
    %14 = arith.mulf %10, %13 : vector<16x64xf32>
    %cst_15 = arith.constant 0.000000e+00 : f32
    %15 = vector.broadcast %cst_15 : f32 to vector<16x64xf32>
    %16 = arith.cmpf oge, %14, %15 : vector<16x64xf32>
    %cst_16 = arith.constant 1.000000e+00 : f32
    %cst_17 = arith.constant -1.000000e+00 : f32
    %17 = vector.broadcast %cst_16 : f32 to vector<16x64xf32>
    %18 = vector.broadcast %cst_17 : f32 to vector<16x64xf32>
    %19 = arith.select %16, %17, %18 : vector<16x64xi1>, vector<16x64xf32>
    %20 = math.absf %14 : vector<16x64xf32>
    %cst_18 = arith.constant 0.327591091 : f32
    %21 = vector.broadcast %cst_18 : f32 to vector<16x64xf32>
    %22 = arith.mulf %21, %20 : vector<16x64xf32>
    %cst_19 = arith.constant 1.000000e+00 : f32
    %23 = vector.broadcast %cst_19 : f32 to vector<16x64xf32>
    %24 = arith.addf %23, %22 : vector<16x64xf32>
    %cst_20 = arith.constant 1.000000e+00 : f32
    %25 = vector.broadcast %cst_20 : f32 to vector<16x64xf32>
    %26 = arith.divf %25, %24 : vector<16x64xf32>
    %cst_21 = arith.constant 1.06140542 : f32
    %27 = vector.broadcast %cst_21 : f32 to vector<16x64xf32>
    %28 = arith.mulf %27, %26 : vector<16x64xf32>
    %cst_22 = arith.constant -1.45315206 : f32
    %29 = vector.broadcast %cst_22 : f32 to vector<16x64xf32>
    %30 = arith.addf %28, %29 : vector<16x64xf32>
    %31 = arith.mulf %30, %26 : vector<16x64xf32>
    %cst_23 = arith.constant 1.42141378 : f32
    %32 = vector.broadcast %cst_23 : f32 to vector<16x64xf32>
    %33 = arith.addf %31, %32 : vector<16x64xf32>
    %34 = arith.mulf %33, %26 : vector<16x64xf32>
    %cst_24 = arith.constant -0.284496725 : f32
    %35 = vector.broadcast %cst_24 : f32 to vector<16x64xf32>
    %36 = arith.addf %34, %35 : vector<16x64xf32>
    %37 = arith.mulf %36, %26 : vector<16x64xf32>
    %cst_25 = arith.constant 0.254829586 : f32
    %38 = vector.broadcast %cst_25 : f32 to vector<16x64xf32>
    %39 = arith.addf %37, %38 : vector<16x64xf32>
    %40 = arith.mulf %39, %26 : vector<16x64xf32>
    %cst_26 = arith.constant 0.000000e+00 : f32
    %41 = vector.broadcast %cst_26 : f32 to vector<16x64xf32>
    %42 = arith.subf %41, %20 : vector<16x64xf32>
    %43 = arith.mulf %42, %20 : vector<16x64xf32>
    %44 = math.exp %43 : vector<16x64xf32>
    %45 = arith.mulf %40, %44 : vector<16x64xf32>
    %cst_27 = arith.constant 1.000000e+00 : f32
    %46 = vector.broadcast %cst_27 : f32 to vector<16x64xf32>
    %47 = arith.subf %46, %45 : vector<16x64xf32>
    %48 = arith.mulf %19, %47 : vector<16x64xf32>
    %cst_28 = arith.constant 1.000000e+00 : f32
    %49 = vector.broadcast %cst_28 : f32 to vector<16x64xf32>
    %50 = arith.addf %49, %48 : vector<16x64xf32>
    %51 = arith.mulf %12, %50 : vector<16x64xf32>
    %52 = arith.truncf %51 : vector<16x64xf32> to vector<16x64xbf16>
    %cst_29 = arith.constant dense<0.000000e+00> : vector<16x32xf32>
    %53 = tpu.matmul %52, %3, %cst_29 {dimension_numbers = #tpu.dot_dimension_numbers<[1], [0], [0], [1], [0, 0, 1, 1], [], []>} : vector<16x64xbf16>, vector<64x32xbf16>, vector<16x32xf32> -> vector<16x32xf32>
    %54 = vector.broadcast %4 : vector<1x32xf32> to vector<16x32xf32>
    %55 = arith.addf %53, %54 : vector<16x32xf32>
    %56 = arith.addf %0, %55 : vector<16x32xf32>
    %cst_30 = arith.constant dense<0.000000e+00> : vector<16xf32>
    %57 = vector.multi_reduction <add>, %56, %cst_30 [1] : vector<16x32xf32> to vector<16xf32>
    %58 = vector.shape_cast %57 : vector<16xf32> to vector<16x1xf32>
    %cst_31 = arith.constant 3.200000e+01 : f32
    %59 = vector.broadcast %cst_31 : f32 to vector<16x1xf32>
    %60 = arith.divf %58, %59 : vector<16x1xf32>
    %61 = vector.broadcast %60 : vector<16x1xf32> to vector<16x32xf32>
    %62 = arith.subf %56, %61 : vector<16x32xf32>
    %63 = arith.mulf %62, %62 : vector<16x32xf32>
    %cst_32 = arith.constant dense<0.000000e+00> : vector<16xf32>
    %64 = vector.multi_reduction <add>, %63, %cst_32 [1] : vector<16x32xf32> to vector<16xf32>
    %65 = vector.shape_cast %64 : vector<16xf32> to vector<16x1xf32>
    %cst_33 = arith.constant 3.200000e+01 : f32
    %66 = vector.broadcast %cst_33 : f32 to vector<16x1xf32>
    %67 = arith.divf %65, %66 : vector<16x1xf32>
    %cst_34 = arith.constant 9.99999974E-6 : f32
    %68 = vector.broadcast %cst_34 : f32 to vector<16x1xf32>
    %69 = arith.addf %67, %68 : vector<16x1xf32>
    %70 = math.rsqrt %69 : vector<16x1xf32>
    %71 = vector.broadcast %70 : vector<16x1xf32> to vector<16x32xf32>
    %72 = arith.mulf %62, %71 : vector<16x32xf32>
    %73 = vector.broadcast %5 : vector<1x32xf32> to vector<16x32xf32>
    %74 = arith.mulf %72, %73 : vector<16x32xf32>
    %75 = vector.broadcast %6 : vector<1x32xf32> to vector<16x32xf32>
    %76 = arith.addf %74, %75 : vector<16x32xf32>
    %c0_35 = arith.constant 0 : index
    %c0_36 = arith.constant 0 : index
    %77 = vector.load %arg7[%c0_35, %c0_36] : memref<16x32xf32, #tpu.memory_space<vmem>>, vector<16x32xf32>
    tpu.vector_store %arg7[%c0_35, %c0_36], %76 {strides = array<i32>} : memref<16x32xf32, #tpu.memory_space<vmem>>, vector<16x32xf32>,
    return
  }
}

module attributes {stable_mosaic.version = 11 : i64} {
  func.func @_distil_kernel(%arg0: memref<16x96xf32, #tpu.memory_space<vmem>>, %arg1: memref<96x32xbf16, #tpu.memory_space<vmem>>, %arg2: memref<1x32xf32, #tpu.memory_space<vmem>>, %arg3: memref<1x32xf32, #tpu.memory_space<vmem>>, %arg4: memref<1x32xf32, #tpu.memory_space<vmem>>, %arg5: memref<16x32xf32, #tpu.memory_space<vmem>>) attributes {dimension_semantics = [], scalar_prefetch = 0 : i64, scratch_operands = 0 : i64, tpu.core_type = #tpu.core_type<tc>} {
    %c0 = arith.constant 0 : index
    %c0_0 = arith.constant 0 : index
    %0 = vector.load %arg0[%c0, %c0_0] : memref<16x96xf32, #tpu.memory_space<vmem>>, vector<16x96xf32>
    %1 = arith.truncf %0 : vector<16x96xf32> to vector<16x96xbf16>
    %c0_1 = arith.constant 0 : index
    %c0_2 = arith.constant 0 : index
    %2 = vector.load %arg1[%c0_1, %c0_2] : memref<96x32xbf16, #tpu.memory_space<vmem>>, vector<96x32xbf16>
    %cst = arith.constant dense<0.000000e+00> : vector<16x32xf32>
    %3 = tpu.matmul %1, %2, %cst {dimension_numbers = #tpu.dot_dimension_numbers<[1], [0], [0], [1], [0, 0, 1, 1], [], []>} : vector<16x96xbf16>, vector<96x32xbf16>, vector<16x32xf32> -> vector<16x32xf32>
    %c0_3 = arith.constant 0 : index
    %c0_4 = arith.constant 0 : index
    %4 = vector.load %arg2[%c0_3, %c0_4] : memref<1x32xf32, #tpu.memory_space<vmem>>, vector<1x32xf32>
    %5 = vector.broadcast %4 : vector<1x32xf32> to vector<16x32xf32>
    %6 = arith.addf %3, %5 : vector<16x32xf32>
    %cst_5 = arith.constant dense<0.000000e+00> : vector<32xf32>
    %7 = vector.multi_reduction <add>, %6, %cst_5 [0] : vector<16x32xf32> to vector<32xf32>
    %8 = vector.shape_cast %7 : vector<32xf32> to vector<1x32xf32>
    %cst_6 = arith.constant 1.600000e+01 : f32
    %9 = vector.broadcast %cst_6 : f32 to vector<1x32xf32>
    %10 = arith.divf %8, %9 : vector<1x32xf32>
    %11 = vector.broadcast %10 : vector<1x32xf32> to vector<16x32xf32>
    %12 = arith.subf %6, %11 : vector<16x32xf32>
    %13 = arith.mulf %12, %12 : vector<16x32xf32>
    %cst_7 = arith.constant dense<0.000000e+00> : vector<32xf32>
    %14 = vector.multi_reduction <add>, %13, %cst_7 [0] : vector<16x32xf32> to vector<32xf32>
    %15 = vector.shape_cast %14 : vector<32xf32> to vector<1x32xf32>
    %cst_8 = arith.constant 1.600000e+01 : f32
    %16 = vector.broadcast %cst_8 : f32 to vector<1x32xf32>
    %17 = arith.divf %15, %16 : vector<1x32xf32>
    %18 = vector.broadcast %10 : vector<1x32xf32> to vector<16x32xf32>
    %19 = arith.subf %6, %18 : vector<16x32xf32>
    %cst_9 = arith.constant 9.99999974E-6 : f32
    %20 = vector.broadcast %cst_9 : f32 to vector<1x32xf32>
    %21 = arith.addf %17, %20 : vector<1x32xf32>
    %22 = math.rsqrt %21 : vector<1x32xf32>
    %23 = vector.broadcast %22 : vector<1x32xf32> to vector<16x32xf32>
    %24 = arith.mulf %19, %23 : vector<16x32xf32>
    %c0_10 = arith.constant 0 : index
    %c0_11 = arith.constant 0 : index
    %25 = vector.load %arg3[%c0_10, %c0_11] : memref<1x32xf32, #tpu.memory_space<vmem>>, vector<1x32xf32>
    %26 = vector.broadcast %25 : vector<1x32xf32> to vector<16x32xf32>
    %27 = arith.mulf %24, %26 : vector<16x32xf32>
    %c0_12 = arith.constant 0 : index
    %c0_13 = arith.constant 0 : index
    %28 = vector.load %arg4[%c0_12, %c0_13] : memref<1x32xf32, #tpu.memory_space<vmem>>, vector<1x32xf32>
    %29 = vector.broadcast %28 : vector<1x32xf32> to vector<16x32xf32>
    %30 = arith.addf %27, %29 : vector<16x32xf32>
    %cst_14 = arith.constant 0.000000e+00 : f32
    %31 = vector.broadcast %cst_14 : f32 to vector<16x32xf32>
    %32 = arith.cmpf ogt, %30, %31 : vector<16x32xf32>
    %cst_15 = arith.constant 0.000000e+00 : f32
    %33 = vector.broadcast %cst_15 : f32 to vector<16x32xf32>
    %34 = arith.minimumf %30, %33 : vector<16x32xf32>
    %35 = math.exp %34 : vector<16x32xf32>
    %cst_16 = arith.constant 1.000000e+00 : f32
    %36 = vector.broadcast %cst_16 : f32 to vector<16x32xf32>
    %37 = arith.subf %35, %36 : vector<16x32xf32>
    %38 = arith.select %32, %30, %37 : vector<16x32xi1>, vector<16x32xf32>
    %c0_17 = arith.constant 0 : index
    %c0_18 = arith.constant 0 : index
    %39 = vector.load %arg5[%c0_17, %c0_18] : memref<16x32xf32, #tpu.memory_space<vmem>>, vector<16x32xf32>
    tpu.vector_store %arg5[%c0_17, %c0_18], %38 {strides = array<i32>} : memref<16x32xf32, #tpu.memory_space<vmem>>, vector<16x32xf32>,
    return
  }
}

module attributes {stable_mosaic.version = 11 : i64} {
  func.func @_ffn_block_final_ln_kernel(%arg0: memref<8x32xf32, #tpu.memory_space<vmem>>, %arg1: memref<32x64xbf16, #tpu.memory_space<vmem>>, %arg2: memref<1x64xf32, #tpu.memory_space<vmem>>, %arg3: memref<64x32xbf16, #tpu.memory_space<vmem>>, %arg4: memref<1x32xf32, #tpu.memory_space<vmem>>, %arg5: memref<1x32xf32, #tpu.memory_space<vmem>>, %arg6: memref<1x32xf32, #tpu.memory_space<vmem>>, %arg7: memref<1x32xf32, #tpu.memory_space<vmem>>, %arg8: memref<1x32xf32, #tpu.memory_space<vmem>>, %arg9: memref<8x32xf32, #tpu.memory_space<vmem>>) attributes {dimension_semantics = [], scalar_prefetch = 0 : i64, scratch_operands = 0 : i64, tpu.core_type = #tpu.core_type<tc>} {
    %c0 = arith.constant 0 : index
    %c0_0 = arith.constant 0 : index
    %0 = vector.load %arg0[%c0, %c0_0] : memref<8x32xf32, #tpu.memory_space<vmem>>, vector<8x32xf32>
    %c0_1 = arith.constant 0 : index
    %c0_2 = arith.constant 0 : index
    %1 = vector.load %arg1[%c0_1, %c0_2] : memref<32x64xbf16, #tpu.memory_space<vmem>>, vector<32x64xbf16>
    %c0_3 = arith.constant 0 : index
    %c0_4 = arith.constant 0 : index
    %2 = vector.load %arg2[%c0_3, %c0_4] : memref<1x64xf32, #tpu.memory_space<vmem>>, vector<1x64xf32>
    %c0_5 = arith.constant 0 : index
    %c0_6 = arith.constant 0 : index
    %3 = vector.load %arg3[%c0_5, %c0_6] : memref<64x32xbf16, #tpu.memory_space<vmem>>, vector<64x32xbf16>
    %c0_7 = arith.constant 0 : index
    %c0_8 = arith.constant 0 : index
    %4 = vector.load %arg4[%c0_7, %c0_8] : memref<1x32xf32, #tpu.memory_space<vmem>>, vector<1x32xf32>
    %c0_9 = arith.constant 0 : index
    %c0_10 = arith.constant 0 : index
    %5 = vector.load %arg5[%c0_9, %c0_10] : memref<1x32xf32, #tpu.memory_space<vmem>>, vector<1x32xf32>
    %c0_11 = arith.constant 0 : index
    %c0_12 = arith.constant 0 : index
    %6 = vector.load %arg6[%c0_11, %c0_12] : memref<1x32xf32, #tpu.memory_space<vmem>>, vector<1x32xf32>
    %7 = arith.truncf %0 : vector<8x32xf32> to vector<8x32xbf16>
    %cst = arith.constant dense<0.000000e+00> : vector<8x64xf32>
    %8 = tpu.matmul %7, %1, %cst {dimension_numbers = #tpu.dot_dimension_numbers<[1], [0], [0], [1], [0, 0, 1, 1], [], []>} : vector<8x32xbf16>, vector<32x64xbf16>, vector<8x64xf32> -> vector<8x64xf32>
    %9 = vector.broadcast %2 : vector<1x64xf32> to vector<8x64xf32>
    %10 = arith.addf %8, %9 : vector<8x64xf32>
    %cst_13 = arith.constant 5.000000e-01 : f32
    %11 = vector.broadcast %cst_13 : f32 to vector<8x64xf32>
    %12 = arith.mulf %11, %10 : vector<8x64xf32>
    %cst_14 = arith.constant 0.707106769 : f32
    %13 = vector.broadcast %cst_14 : f32 to vector<8x64xf32>
    %14 = arith.mulf %10, %13 : vector<8x64xf32>
    %cst_15 = arith.constant 0.000000e+00 : f32
    %15 = vector.broadcast %cst_15 : f32 to vector<8x64xf32>
    %16 = arith.cmpf oge, %14, %15 : vector<8x64xf32>
    %cst_16 = arith.constant 1.000000e+00 : f32
    %cst_17 = arith.constant -1.000000e+00 : f32
    %17 = vector.broadcast %cst_16 : f32 to vector<8x64xf32>
    %18 = vector.broadcast %cst_17 : f32 to vector<8x64xf32>
    %19 = arith.select %16, %17, %18 : vector<8x64xi1>, vector<8x64xf32>
    %20 = math.absf %14 : vector<8x64xf32>
    %cst_18 = arith.constant 0.327591091 : f32
    %21 = vector.broadcast %cst_18 : f32 to vector<8x64xf32>
    %22 = arith.mulf %21, %20 : vector<8x64xf32>
    %cst_19 = arith.constant 1.000000e+00 : f32
    %23 = vector.broadcast %cst_19 : f32 to vector<8x64xf32>
    %24 = arith.addf %23, %22 : vector<8x64xf32>
    %cst_20 = arith.constant 1.000000e+00 : f32
    %25 = vector.broadcast %cst_20 : f32 to vector<8x64xf32>
    %26 = arith.divf %25, %24 : vector<8x64xf32>
    %cst_21 = arith.constant 1.06140542 : f32
    %27 = vector.broadcast %cst_21 : f32 to vector<8x64xf32>
    %28 = arith.mulf %27, %26 : vector<8x64xf32>
    %cst_22 = arith.constant -1.45315206 : f32
    %29 = vector.broadcast %cst_22 : f32 to vector<8x64xf32>
    %30 = arith.addf %28, %29 : vector<8x64xf32>
    %31 = arith.mulf %30, %26 : vector<8x64xf32>
    %cst_23 = arith.constant 1.42141378 : f32
    %32 = vector.broadcast %cst_23 : f32 to vector<8x64xf32>
    %33 = arith.addf %31, %32 : vector<8x64xf32>
    %34 = arith.mulf %33, %26 : vector<8x64xf32>
    %cst_24 = arith.constant -0.284496725 : f32
    %35 = vector.broadcast %cst_24 : f32 to vector<8x64xf32>
    %36 = arith.addf %34, %35 : vector<8x64xf32>
    %37 = arith.mulf %36, %26 : vector<8x64xf32>
    %cst_25 = arith.constant 0.254829586 : f32
    %38 = vector.broadcast %cst_25 : f32 to vector<8x64xf32>
    %39 = arith.addf %37, %38 : vector<8x64xf32>
    %40 = arith.mulf %39, %26 : vector<8x64xf32>
    %cst_26 = arith.constant 0.000000e+00 : f32
    %41 = vector.broadcast %cst_26 : f32 to vector<8x64xf32>
    %42 = arith.subf %41, %20 : vector<8x64xf32>
    %43 = arith.mulf %42, %20 : vector<8x64xf32>
    %44 = math.exp %43 : vector<8x64xf32>
    %45 = arith.mulf %40, %44 : vector<8x64xf32>
    %cst_27 = arith.constant 1.000000e+00 : f32
    %46 = vector.broadcast %cst_27 : f32 to vector<8x64xf32>
    %47 = arith.subf %46, %45 : vector<8x64xf32>
    %48 = arith.mulf %19, %47 : vector<8x64xf32>
    %cst_28 = arith.constant 1.000000e+00 : f32
    %49 = vector.broadcast %cst_28 : f32 to vector<8x64xf32>
    %50 = arith.addf %49, %48 : vector<8x64xf32>
    %51 = arith.mulf %12, %50 : vector<8x64xf32>
    %52 = arith.truncf %51 : vector<8x64xf32> to vector<8x64xbf16>
    %cst_29 = arith.constant dense<0.000000e+00> : vector<8x32xf32>
    %53 = tpu.matmul %52, %3, %cst_29 {dimension_numbers = #tpu.dot_dimension_numbers<[1], [0], [0], [1], [0, 0, 1, 1], [], []>} : vector<8x64xbf16>, vector<64x32xbf16>, vector<8x32xf32> -> vector<8x32xf32>
    %54 = vector.broadcast %4 : vector<1x32xf32> to vector<8x32xf32>
    %55 = arith.addf %53, %54 : vector<8x32xf32>
    %56 = arith.addf %0, %55 : vector<8x32xf32>
    %cst_30 = arith.constant dense<0.000000e+00> : vector<8xf32>
    %57 = vector.multi_reduction <add>, %56, %cst_30 [1] : vector<8x32xf32> to vector<8xf32>
    %58 = vector.shape_cast %57 : vector<8xf32> to vector<8x1xf32>
    %cst_31 = arith.constant 3.200000e+01 : f32
    %59 = vector.broadcast %cst_31 : f32 to vector<8x1xf32>
    %60 = arith.divf %58, %59 : vector<8x1xf32>
    %61 = vector.broadcast %60 : vector<8x1xf32> to vector<8x32xf32>
    %62 = arith.subf %56, %61 : vector<8x32xf32>
    %63 = arith.mulf %62, %62 : vector<8x32xf32>
    %cst_32 = arith.constant dense<0.000000e+00> : vector<8xf32>
    %64 = vector.multi_reduction <add>, %63, %cst_32 [1] : vector<8x32xf32> to vector<8xf32>
    %65 = vector.shape_cast %64 : vector<8xf32> to vector<8x1xf32>
    %cst_33 = arith.constant 3.200000e+01 : f32
    %66 = vector.broadcast %cst_33 : f32 to vector<8x1xf32>
    %67 = arith.divf %65, %66 : vector<8x1xf32>
    %cst_34 = arith.constant 9.99999974E-6 : f32
    %68 = vector.broadcast %cst_34 : f32 to vector<8x1xf32>
    %69 = arith.addf %67, %68 : vector<8x1xf32>
    %70 = math.rsqrt %69 : vector<8x1xf32>
    %71 = vector.broadcast %70 : vector<8x1xf32> to vector<8x32xf32>
    %72 = arith.mulf %62, %71 : vector<8x32xf32>
    %73 = vector.broadcast %5 : vector<1x32xf32> to vector<8x32xf32>
    %74 = arith.mulf %72, %73 : vector<8x32xf32>
    %75 = vector.broadcast %6 : vector<1x32xf32> to vector<8x32xf32>
    %76 = arith.addf %74, %75 : vector<8x32xf32>
    %c0_35 = arith.constant 0 : index
    %c0_36 = arith.constant 0 : index
    %77 = vector.load %arg7[%c0_35, %c0_36] : memref<1x32xf32, #tpu.memory_space<vmem>>, vector<1x32xf32>
    %c0_37 = arith.constant 0 : index
    %c0_38 = arith.constant 0 : index
    %78 = vector.load %arg8[%c0_37, %c0_38] : memref<1x32xf32, #tpu.memory_space<vmem>>, vector<1x32xf32>
    %cst_39 = arith.constant dense<0.000000e+00> : vector<8xf32>
    %79 = vector.multi_reduction <add>, %76, %cst_39 [1] : vector<8x32xf32> to vector<8xf32>
    %80 = vector.shape_cast %79 : vector<8xf32> to vector<8x1xf32>
    %cst_40 = arith.constant 3.200000e+01 : f32
    %81 = vector.broadcast %cst_40 : f32 to vector<8x1xf32>
    %82 = arith.divf %80, %81 : vector<8x1xf32>
    %83 = vector.broadcast %82 : vector<8x1xf32> to vector<8x32xf32>
    %84 = arith.subf %76, %83 : vector<8x32xf32>
    %85 = arith.mulf %84, %84 : vector<8x32xf32>
    %cst_41 = arith.constant dense<0.000000e+00> : vector<8xf32>
    %86 = vector.multi_reduction <add>, %85, %cst_41 [1] : vector<8x32xf32> to vector<8xf32>
    %87 = vector.shape_cast %86 : vector<8xf32> to vector<8x1xf32>
    %cst_42 = arith.constant 3.200000e+01 : f32
    %88 = vector.broadcast %cst_42 : f32 to vector<8x1xf32>
    %89 = arith.divf %87, %88 : vector<8x1xf32>
    %cst_43 = arith.constant 9.99999974E-6 : f32
    %90 = vector.broadcast %cst_43 : f32 to vector<8x1xf32>
    %91 = arith.addf %89, %90 : vector<8x1xf32>
    %92 = math.rsqrt %91 : vector<8x1xf32>
    %93 = vector.broadcast %92 : vector<8x1xf32> to vector<8x32xf32>
    %94 = arith.mulf %84, %93 : vector<8x32xf32>
    %95 = vector.broadcast %77 : vector<1x32xf32> to vector<8x32xf32>
    %96 = arith.mulf %94, %95 : vector<8x32xf32>
    %97 = vector.broadcast %78 : vector<1x32xf32> to vector<8x32xf32>
    %98 = arith.addf %96, %97 : vector<8x32xf32>
    %c0_44 = arith.constant 0 : index
    %c0_45 = arith.constant 0 : index
    %99 = vector.load %arg9[%c0_44, %c0_45] : memref<8x32xf32, #tpu.memory_space<vmem>>, vector<8x32xf32>
    tpu.vector_store %arg9[%c0_44, %c0_45], %98 {strides = array<i32>} : memref<8x32xf32, #tpu.memory_space<vmem>>, vector<8x32xf32>,
    return
  }
}

module attributes {stable_mosaic.version = 11 : i64} {
  func.func @_attn_block_kernel(%arg0: i32, %arg1: memref<1x4x32xf32, #tpu.memory_space<vmem>>, %arg2: memref<1x4x32xf32, #tpu.memory_space<vmem>>, %arg3: memref<32x32xbf16, #tpu.memory_space<vmem>>, %arg4: memref<1x32xf32, #tpu.memory_space<vmem>>, %arg5: memref<32x32xbf16, #tpu.memory_space<vmem>>, %arg6: memref<1x32xf32, #tpu.memory_space<vmem>>, %arg7: memref<32x32xbf16, #tpu.memory_space<vmem>>, %arg8: memref<1x32xf32, #tpu.memory_space<vmem>>, %arg9: memref<32x32xbf16, #tpu.memory_space<vmem>>, %arg10: memref<1x32xf32, #tpu.memory_space<vmem>>, %arg11: memref<1x32xf32, #tpu.memory_space<vmem>>, %arg12: memref<1x32xf32, #tpu.memory_space<vmem>>, %arg13: memref<1x4x32xf32, #tpu.memory_space<vmem>>) attributes {dimension_semantics = [#tpu.dimension_semantics<parallel>], iteration_bounds = array<i64: 2>, scalar_prefetch = 0 : i64, scratch_operands = 0 : i64, tpu.core_type = #tpu.core_type<tc>, window_params = [{transform_indices = @transform_0, window_bounds = array<i64: 1, 4, 32>}, {transform_indices = @transform_1, window_bounds = array<i64: 1, 4, 32>}, {pipeline_mode = #tpu.pipeline_mode<synchronous>, transform_indices = @transform_2, window_bounds = array<i64: 32, 32>}, {pipeline_mode = #tpu.pipeline_mode<synchronous>, transform_indices = @transform_3, window_bounds = array<i64: 1, 32>}, {pipeline_mode = #tpu.pipeline_mode<synchronous>, transform_indices = @transform_4, window_bounds = array<i64: 32, 32>}, {pipeline_mode = #tpu.pipeline_mode<synchronous>, transform_indices = @transform_5, window_bounds = array<i64: 1, 32>}, {pipeline_mode = #tpu.pipeline_mode<synchronous>, transform_indices = @transform_6, window_bounds = array<i64: 32, 32>}, {pipeline_mode = #tpu.pipeline_mode<synchronous>, transform_indices = @transform_7, window_bounds = array<i64: 1, 32>}, {pipeline_mode = #tpu.pipeline_mode<synchronous>, transform_indices = @transform_8, window_bounds = array<i64: 32, 32>}, {pipeline_mode = #tpu.pipeline_mode<synchronous>, transform_indices = @transform_9, window_bounds = array<i64: 1, 32>}, {pipeline_mode = #tpu.pipeline_mode<synchronous>, transform_indices = @transform_10, window_bounds = array<i64: 1, 32>}, {pipeline_mode = #tpu.pipeline_mode<synchronous>, transform_indices = @transform_11, window_bounds = array<i64: 1, 32>}, {transform_indices = @transform_12, window_bounds = array<i64: 1, 4, 32>}]} {
    %c0 = arith.constant 0 : index
    %c0_0 = arith.constant 0 : index
    %c0_1 = arith.constant 0 : index
    %0 = vector.load %arg1[%c0, %c0_0, %c0_1] : memref<1x4x32xf32, #tpu.memory_space<vmem>>, vector<1x4x32xf32>
    %1 = vector.shape_cast %0 : vector<1x4x32xf32> to vector<4x32xf32>
    %c0_2 = arith.constant 0 : index
    %c0_3 = arith.constant 0 : index
    %c0_4 = arith.constant 0 : index
    %2 = vector.load %arg2[%c0_2, %c0_3, %c0_4] : memref<1x4x32xf32, #tpu.memory_space<vmem>>, vector<1x4x32xf32>
    %3 = vector.shape_cast %2 : vector<1x4x32xf32> to vector<4x32xf32>
    %4 = arith.truncf %1 : vector<4x32xf32> to vector<4x32xbf16>
    %c0_5 = arith.constant 0 : index
    %c0_6 = arith.constant 0 : index
    %5 = vector.load %arg3[%c0_5, %c0_6] : memref<32x32xbf16, #tpu.memory_space<vmem>>, vector<32x32xbf16>
    %cst = arith.constant dense<0.000000e+00> : vector<4x32xf32>
    %6 = tpu.matmul %4, %5, %cst {dimension_numbers = #tpu.dot_dimension_numbers<[1], [0], [0], [1], [0, 0, 1, 1], [], []>} : vector<4x32xbf16>, vector<32x32xbf16>, vector<4x32xf32> -> vector<4x32xf32>
    %c0_7 = arith.constant 0 : index
    %c0_8 = arith.constant 0 : index
    %7 = vector.load %arg4[%c0_7, %c0_8] : memref<1x32xf32, #tpu.memory_space<vmem>>, vector<1x32xf32>
    %8 = vector.broadcast %7 : vector<1x32xf32> to vector<4x32xf32>
    %9 = arith.addf %6, %8 : vector<4x32xf32>
    %10 = arith.truncf %3 : vector<4x32xf32> to vector<4x32xbf16>
    %c0_9 = arith.constant 0 : index
    %c0_10 = arith.constant 0 : index
    %11 = vector.load %arg5[%c0_9, %c0_10] : memref<32x32xbf16, #tpu.memory_space<vmem>>, vector<32x32xbf16>
    %cst_11 = arith.constant dense<0.000000e+00> : vector<4x32xf32>
    %12 = tpu.matmul %10, %11, %cst_11 {dimension_numbers = #tpu.dot_dimension_numbers<[1], [0], [0], [1], [0, 0, 1, 1], [], []>} : vector<4x32xbf16>, vector<32x32xbf16>, vector<4x32xf32> -> vector<4x32xf32>
    %c0_12 = arith.constant 0 : index
    %c0_13 = arith.constant 0 : index
    %13 = vector.load %arg6[%c0_12, %c0_13] : memref<1x32xf32, #tpu.memory_space<vmem>>, vector<1x32xf32>
    %14 = vector.broadcast %13 : vector<1x32xf32> to vector<4x32xf32>
    %15 = arith.addf %12, %14 : vector<4x32xf32>
    %16 = arith.truncf %3 : vector<4x32xf32> to vector<4x32xbf16>
    %c0_14 = arith.constant 0 : index
    %c0_15 = arith.constant 0 : index
    %17 = vector.load %arg7[%c0_14, %c0_15] : memref<32x32xbf16, #tpu.memory_space<vmem>>, vector<32x32xbf16>
    %cst_16 = arith.constant dense<0.000000e+00> : vector<4x32xf32>
    %18 = tpu.matmul %16, %17, %cst_16 {dimension_numbers = #tpu.dot_dimension_numbers<[1], [0], [0], [1], [0, 0, 1, 1], [], []>} : vector<4x32xbf16>, vector<32x32xbf16>, vector<4x32xf32> -> vector<4x32xf32>
    %c0_17 = arith.constant 0 : index
    %c0_18 = arith.constant 0 : index
    %19 = vector.load %arg8[%c0_17, %c0_18] : memref<1x32xf32, #tpu.memory_space<vmem>>, vector<1x32xf32>
    %20 = vector.broadcast %19 : vector<1x32xf32> to vector<4x32xf32>
    %21 = arith.addf %18, %20 : vector<4x32xf32>
    %cst_19 = arith.constant 0.353553385 : f32
    %22 = vector.broadcast %cst_19 : f32 to vector<4x32xf32>
    %23 = arith.mulf %9, %22 : vector<4x32xf32>
    %24 = arith.truncf %23 : vector<4x32xf32> to vector<4x32xbf16>
    %25 = arith.truncf %15 : vector<4x32xf32> to vector<4x32xbf16>
    %26 = arith.truncf %21 : vector<4x32xf32> to vector<4x32xbf16>
    %27 = tpu.iota {dimensions = array<i32: 1>} : vector<1x32xi32>
    %cst_20 = arith.constant 0.000000e+00 : f32
    %28 = vector.broadcast %cst_20 : f32 to vector<4x32xf32>
    %c0_i32 = arith.constant 0 : i32
    %29 = vector.broadcast %c0_i32 : i32 to vector<1x32xi32>
    %30 = arith.cmpi sge, %27, %29 : vector<1x32xi32>
    %c8_i32 = arith.constant 8 : i32
    %31 = vector.broadcast %c8_i32 : i32 to vector<1x32xi32>
    %32 = arith.cmpi slt, %27, %31 : vector<1x32xi32>
    %33 = arith.andi %30, %32 : vector<1x32xi1>
    %34 = arith.extui %33 : vector<1x32xi1> to vector<1x32xi32>
    %35 = arith.sitofp %34 : vector<1x32xi32> to vector<1x32xf32>
    %36 = arith.truncf %35 : vector<1x32xf32> to vector<1x32xbf16>
    %37 = vector.broadcast %36 : vector<1x32xbf16> to vector<4x32xbf16>
    %38 = arith.mulf %24, %37 : vector<4x32xbf16>
    %cst_21 = arith.constant dense<0.000000e+00> : vector<4x4xf32>
    %39 = tpu.matmul %38, %25, %cst_21 {dimension_numbers = #tpu.dot_dimension_numbers<[1], [1], [0], [0], [0, 0, 1, 0], [], []>} : vector<4x32xbf16>, vector<4x32xbf16>, vector<4x4xf32> -> vector<4x4xf32>
    %cst_22 = arith.constant dense<0xFF800000> : vector<4xf32>
    %40 = vector.multi_reduction <maximumf>, %39, %cst_22 [1] : vector<4x4xf32> to vector<4xf32>
    %41 = vector.shape_cast %40 : vector<4xf32> to vector<4x1xf32>
    %42 = vector.broadcast %41 : vector<4x1xf32> to vector<4x4xf32>
    %43 = arith.subf %39, %42 : vector<4x4xf32>
    %44 = math.exp %43 : vector<4x4xf32>
    %cst_23 = arith.constant dense<0.000000e+00> : vector<4xf32>
    %45 = vector.multi_reduction <add>, %44, %cst_23 [1] : vector<4x4xf32> to vector<4xf32>
    %46 = vector.shape_cast %45 : vector<4xf32> to vector<4x1xf32>
    %47 = tpu.reciprocal %46 {approx = true} : vector<4x1xf32> -> vector<4x1xf32>
    %48 = vector.broadcast %47 : vector<4x1xf32> to vector<4x4xf32>
    %49 = arith.mulf %44, %48 : vector<4x4xf32>
    %50 = arith.truncf %49 : vector<4x4xf32> to vector<4x4xbf16>
    %cst_24 = arith.constant dense<0.000000e+00> : vector<4x32xf32>
    %51 = tpu.matmul %50, %26, %cst_24 {dimension_numbers = #tpu.dot_dimension_numbers<[1], [0], [0], [1], [0, 0, 1, 1], [], []>} : vector<4x4xbf16>, vector<4x32xbf16>, vector<4x32xf32> -> vector<4x32xf32>
    %52 = vector.broadcast %35 : vector<1x32xf32> to vector<4x32xf32>
    %53 = arith.mulf %51, %52 : vector<4x32xf32>
    %54 = arith.addf %28, %53 : vector<4x32xf32>
    %c8_i32_25 = arith.constant 8 : i32
    %55 = vector.broadcast %c8_i32_25 : i32 to vector<1x32xi32>
    %56 = arith.cmpi sge, %27, %55 : vector<1x32xi32>
    %c16_i32 = arith.constant 16 : i32
    %57 = vector.broadcast %c16_i32 : i32 to vector<1x32xi32>
    %58 = arith.cmpi slt, %27, %57 : vector<1x32xi32>
    %59 = arith.andi %56, %58 : vector<1x32xi1>
    %60 = arith.extui %59 : vector<1x32xi1> to vector<1x32xi32>
    %61 = arith.sitofp %60 : vector<1x32xi32> to vector<1x32xf32>
    %62 = arith.truncf %61 : vector<1x32xf32> to vector<1x32xbf16>
    %63 = vector.broadcast %62 : vector<1x32xbf16> to vector<4x32xbf16>
    %64 = arith.mulf %24, %63 : vector<4x32xbf16>
    %cst_26 = arith.constant dense<0.000000e+00> : vector<4x4xf32>
    %65 = tpu.matmul %64, %25, %cst_26 {dimension_numbers = #tpu.dot_dimension_numbers<[1], [1], [0], [0], [0, 0, 1, 0], [], []>} : vector<4x32xbf16>, vector<4x32xbf16>, vector<4x4xf32> -> vector<4x4xf32>
    %cst_27 = arith.constant dense<0xFF800000> : vector<4xf32>
    %66 = vector.multi_reduction <maximumf>, %65, %cst_27 [1] : vector<4x4xf32> to vector<4xf32>
    %67 = vector.shape_cast %66 : vector<4xf32> to vector<4x1xf32>
    %68 = vector.broadcast %67 : vector<4x1xf32> to vector<4x4xf32>
    %69 = arith.subf %65, %68 : vector<4x4xf32>
    %70 = math.exp %69 : vector<4x4xf32>
    %cst_28 = arith.constant dense<0.000000e+00> : vector<4xf32>
    %71 = vector.multi_reduction <add>, %70, %cst_28 [1] : vector<4x4xf32> to vector<4xf32>
    %72 = vector.shape_cast %71 : vector<4xf32> to vector<4x1xf32>
    %73 = tpu.reciprocal %72 {approx = true} : vector<4x1xf32> -> vector<4x1xf32>
    %74 = vector.broadcast %73 : vector<4x1xf32> to vector<4x4xf32>
    %75 = arith.mulf %70, %74 : vector<4x4xf32>
    %76 = arith.truncf %75 : vector<4x4xf32> to vector<4x4xbf16>
    %cst_29 = arith.constant dense<0.000000e+00> : vector<4x32xf32>
    %77 = tpu.matmul %76, %26, %cst_29 {dimension_numbers = #tpu.dot_dimension_numbers<[1], [0], [0], [1], [0, 0, 1, 1], [], []>} : vector<4x4xbf16>, vector<4x32xbf16>, vector<4x32xf32> -> vector<4x32xf32>
    %78 = vector.broadcast %61 : vector<1x32xf32> to vector<4x32xf32>
    %79 = arith.mulf %77, %78 : vector<4x32xf32>
    %80 = arith.addf %54, %79 : vector<4x32xf32>
    %c16_i32_30 = arith.constant 16 : i32
    %81 = vector.broadcast %c16_i32_30 : i32 to vector<1x32xi32>
    %82 = arith.cmpi sge, %27, %81 : vector<1x32xi32>
    %c24_i32 = arith.constant 24 : i32
    %83 = vector.broadcast %c24_i32 : i32 to vector<1x32xi32>
    %84 = arith.cmpi slt, %27, %83 : vector<1x32xi32>
    %85 = arith.andi %82, %84 : vector<1x32xi1>
    %86 = arith.extui %85 : vector<1x32xi1> to vector<1x32xi32>
    %87 = arith.sitofp %86 : vector<1x32xi32> to vector<1x32xf32>
    %88 = arith.truncf %87 : vector<1x32xf32> to vector<1x32xbf16>
    %89 = vector.broadcast %88 : vector<1x32xbf16> to vector<4x32xbf16>
    %90 = arith.mulf %24, %89 : vector<4x32xbf16>
    %cst_31 = arith.constant dense<0.000000e+00> : vector<4x4xf32>
    %91 = tpu.matmul %90, %25, %cst_31 {dimension_numbers = #tpu.dot_dimension_numbers<[1], [1], [0], [0], [0, 0, 1, 0], [], []>} : vector<4x32xbf16>, vector<4x32xbf16>, vector<4x4xf32> -> vector<4x4xf32>
    %cst_32 = arith.constant dense<0xFF800000> : vector<4xf32>
    %92 = vector.multi_reduction <maximumf>, %91, %cst_32 [1] : vector<4x4xf32> to vector<4xf32>
    %93 = vector.shape_cast %92 : vector<4xf32> to vector<4x1xf32>
    %94 = vector.broadcast %93 : vector<4x1xf32> to vector<4x4xf32>
    %95 = arith.subf %91, %94 : vector<4x4xf32>
    %96 = math.exp %95 : vector<4x4xf32>
    %cst_33 = arith.constant dense<0.000000e+00> : vector<4xf32>
    %97 = vector.multi_reduction <add>, %96, %cst_33 [1] : vector<4x4xf32> to vector<4xf32>
    %98 = vector.shape_cast %97 : vector<4xf32> to vector<4x1xf32>
    %99 = tpu.reciprocal %98 {approx = true} : vector<4x1xf32> -> vector<4x1xf32>
    %100 = vector.broadcast %99 : vector<4x1xf32> to vector<4x4xf32>
    %101 = arith.mulf %96, %100 : vector<4x4xf32>
    %102 = arith.truncf %101 : vector<4x4xf32> to vector<4x4xbf16>
    %cst_34 = arith.constant dense<0.000000e+00> : vector<4x32xf32>
    %103 = tpu.matmul %102, %26, %cst_34 {dimension_numbers = #tpu.dot_dimension_numbers<[1], [0], [0], [1], [0, 0, 1, 1], [], []>} : vector<4x4xbf16>, vector<4x32xbf16>, vector<4x32xf32> -> vector<4x32xf32>
    %104 = vector.broadcast %87 : vector<1x32xf32> to vector<4x32xf32>
    %105 = arith.mulf %103, %104 : vector<4x32xf32>
    %106 = arith.addf %80, %105 : vector<4x32xf32>
    %c24_i32_35 = arith.constant 24 : i32
    %107 = vector.broadcast %c24_i32_35 : i32 to vector<1x32xi32>
    %108 = arith.cmpi sge, %27, %107 : vector<1x32xi32>
    %c32_i32 = arith.constant 32 : i32
    %109 = vector.broadcast %c32_i32 : i32 to vector<1x32xi32>
    %110 = arith.cmpi slt, %27, %109 : vector<1x32xi32>
    %111 = arith.andi %108, %110 : vector<1x32xi1>
    %112 = arith.extui %111 : vector<1x32xi1> to vector<1x32xi32>
    %113 = arith.sitofp %112 : vector<1x32xi32> to vector<1x32xf32>
    %114 = arith.truncf %113 : vector<1x32xf32> to vector<1x32xbf16>
    %115 = vector.broadcast %114 : vector<1x32xbf16> to vector<4x32xbf16>
    %116 = arith.mulf %24, %115 : vector<4x32xbf16>
    %cst_36 = arith.constant dense<0.000000e+00> : vector<4x4xf32>
    %117 = tpu.matmul %116, %25, %cst_36 {dimension_numbers = #tpu.dot_dimension_numbers<[1], [1], [0], [0], [0, 0, 1, 0], [], []>} : vector<4x32xbf16>, vector<4x32xbf16>, vector<4x4xf32> -> vector<4x4xf32>
    %cst_37 = arith.constant dense<0xFF800000> : vector<4xf32>
    %118 = vector.multi_reduction <maximumf>, %117, %cst_37 [1] : vector<4x4xf32> to vector<4xf32>
    %119 = vector.shape_cast %118 : vector<4xf32> to vector<4x1xf32>
    %120 = vector.broadcast %119 : vector<4x1xf32> to vector<4x4xf32>
    %121 = arith.subf %117, %120 : vector<4x4xf32>
    %122 = math.exp %121 : vector<4x4xf32>
    %cst_38 = arith.constant dense<0.000000e+00> : vector<4xf32>
    %123 = vector.multi_reduction <add>, %122, %cst_38 [1] : vector<4x4xf32> to vector<4xf32>
    %124 = vector.shape_cast %123 : vector<4xf32> to vector<4x1xf32>
    %125 = tpu.reciprocal %124 {approx = true} : vector<4x1xf32> -> vector<4x1xf32>
    %126 = vector.broadcast %125 : vector<4x1xf32> to vector<4x4xf32>
    %127 = arith.mulf %122, %126 : vector<4x4xf32>
    %128 = arith.truncf %127 : vector<4x4xf32> to vector<4x4xbf16>
    %cst_39 = arith.constant dense<0.000000e+00> : vector<4x32xf32>
    %129 = tpu.matmul %128, %26, %cst_39 {dimension_numbers = #tpu.dot_dimension_numbers<[1], [0], [0], [1], [0, 0, 1, 1], [], []>} : vector<4x4xbf16>, vector<4x32xbf16>, vector<4x32xf32> -> vector<4x32xf32>
    %130 = vector.broadcast %113 : vector<1x32xf32> to vector<4x32xf32>
    %131 = arith.mulf %129, %130 : vector<4x32xf32>
    %132 = arith.addf %106, %131 : vector<4x32xf32>
    %133 = arith.truncf %132 : vector<4x32xf32> to vector<4x32xbf16>
    %c0_40 = arith.constant 0 : index
    %c0_41 = arith.constant 0 : index
    %134 = vector.load %arg9[%c0_40, %c0_41] : memref<32x32xbf16, #tpu.memory_space<vmem>>, vector<32x32xbf16>
    %cst_42 = arith.constant dense<0.000000e+00> : vector<4x32xf32>
    %135 = tpu.matmul %133, %134, %cst_42 {dimension_numbers = #tpu.dot_dimension_numbers<[1], [0], [0], [1], [0, 0, 1, 1], [], []>} : vector<4x32xbf16>, vector<32x32xbf16>, vector<4x32xf32> -> vector<4x32xf32>
    %c0_43 = arith.constant 0 : index
    %c0_44 = arith.constant 0 : index
    %136 = vector.load %arg10[%c0_43, %c0_44] : memref<1x32xf32, #tpu.memory_space<vmem>>, vector<1x32xf32>
    %137 = vector.broadcast %136 : vector<1x32xf32> to vector<4x32xf32>
    %138 = arith.addf %135, %137 : vector<4x32xf32>
    %139 = arith.addf %1, %138 : vector<4x32xf32>
    %c0_45 = arith.constant 0 : index
    %c0_46 = arith.constant 0 : index
    %140 = vector.load %arg11[%c0_45, %c0_46] : memref<1x32xf32, #tpu.memory_space<vmem>>, vector<1x32xf32>
    %c0_47 = arith.constant 0 : index
    %c0_48 = arith.constant 0 : index
    %141 = vector.load %arg12[%c0_47, %c0_48] : memref<1x32xf32, #tpu.memory_space<vmem>>, vector<1x32xf32>
    %cst_49 = arith.constant dense<0.000000e+00> : vector<4xf32>
    %142 = vector.multi_reduction <add>, %139, %cst_49 [1] : vector<4x32xf32> to vector<4xf32>
    %143 = vector.shape_cast %142 : vector<4xf32> to vector<4x1xf32>
    %cst_50 = arith.constant 3.200000e+01 : f32
    %144 = vector.broadcast %cst_50 : f32 to vector<4x1xf32>
    %145 = arith.divf %143, %144 : vector<4x1xf32>
    %146 = vector.broadcast %145 : vector<4x1xf32> to vector<4x32xf32>
    %147 = arith.subf %139, %146 : vector<4x32xf32>
    %148 = arith.mulf %147, %147 : vector<4x32xf32>
    %cst_51 = arith.constant dense<0.000000e+00> : vector<4xf32>
    %149 = vector.multi_reduction <add>, %148, %cst_51 [1] : vector<4x32xf32> to vector<4xf32>
    %150 = vector.shape_cast %149 : vector<4xf32> to vector<4x1xf32>
    %cst_52 = arith.constant 3.200000e+01 : f32
    %151 = vector.broadcast %cst_52 : f32 to vector<4x1xf32>
    %152 = arith.divf %150, %151 : vector<4x1xf32>
    %cst_53 = arith.constant 9.99999974E-6 : f32
    %153 = vector.broadcast %cst_53 : f32 to vector<4x1xf32>
    %154 = arith.addf %152, %153 : vector<4x1xf32>
    %155 = math.rsqrt %154 : vector<4x1xf32>
    %156 = vector.broadcast %155 : vector<4x1xf32> to vector<4x32xf32>
    %157 = arith.mulf %147, %156 : vector<4x32xf32>
    %158 = vector.broadcast %140 : vector<1x32xf32> to vector<4x32xf32>
    %159 = arith.mulf %157, %158 : vector<4x32xf32>
    %160 = vector.broadcast %141 : vector<1x32xf32> to vector<4x32xf32>
    %161 = arith.addf %159, %160 : vector<4x32xf32>
    %c0_54 = arith.constant 0 : index
    %c0_55 = arith.constant 0 : index
    %c0_56 = arith.constant 0 : index
    %162 = vector.load %arg13[%c0_54, %c0_55, %c0_56] : memref<1x4x32xf32, #tpu.memory_space<vmem>>, vector<1x4x32xf32>
    %163 = vector.shape_cast %162 : vector<1x4x32xf32> to vector<4x32xf32>
    %164 = vector.shape_cast %161 : vector<4x32xf32> to vector<1x4x32xf32>
    tpu.vector_store %arg13[%c0_54, %c0_55, %c0_56], %164 {strides = array<i32>} : memref<1x4x32xf32, #tpu.memory_space<vmem>>, vector<1x4x32xf32>,
    return
  }
  func.func @transform_0(%arg0: i32) -> (i32, i32, i32) {
    %c0_i32 = arith.constant 0 : i32
    %c0_i32_0 = arith.constant 0 : i32
    %c0_i32_1 = arith.constant 0 : i32
    return %arg0, %c0_i32, %c0_i32_0 : i32, i32, i32
  }
  func.func @transform_1(%arg0: i32) -> (i32, i32, i32) {
    %c0_i32 = arith.constant 0 : i32
    %c0_i32_0 = arith.constant 0 : i32
    %c0_i32_1 = arith.constant 0 : i32
    return %arg0, %c0_i32, %c0_i32_0 : i32, i32, i32
  }
  func.func @transform_2(%arg0: i32) -> (i32, i32) {
    %c0_i32 = arith.constant 0 : i32
    %c0_i32_0 = arith.constant 0 : i32
    %c0_i32_1 = arith.constant 0 : i32
    return %c0_i32, %c0_i32_0 : i32, i32
  }
  func.func @transform_3(%arg0: i32) -> (i32, i32) {
    %c0_i32 = arith.constant 0 : i32
    %c0_i32_0 = arith.constant 0 : i32
    %c0_i32_1 = arith.constant 0 : i32
    return %c0_i32, %c0_i32_0 : i32, i32
  }
  func.func @transform_4(%arg0: i32) -> (i32, i32) {
    %c0_i32 = arith.constant 0 : i32
    %c0_i32_0 = arith.constant 0 : i32
    %c0_i32_1 = arith.constant 0 : i32
    return %c0_i32, %c0_i32_0 : i32, i32
  }
  func.func @transform_5(%arg0: i32) -> (i32, i32) {
    %c0_i32 = arith.constant 0 : i32
    %c0_i32_0 = arith.constant 0 : i32
    %c0_i32_1 = arith.constant 0 : i32
    return %c0_i32, %c0_i32_0 : i32, i32
  }
  func.func @transform_6(%arg0: i32) -> (i32, i32) {
    %c0_i32 = arith.constant 0 : i32
    %c0_i32_0 = arith.constant 0 : i32
    %c0_i32_1 = arith.constant 0 : i32
    return %c0_i32, %c0_i32_0 : i32, i32
  }
  func.func @transform_7(%arg0: i32) -> (i32, i32) {
    %c0_i32 = arith.constant 0 : i32
    %c0_i32_0 = arith.constant 0 : i32
    %c0_i32_1 = arith.constant 0 : i32
    return %c0_i32, %c0_i32_0 : i32, i32
  }
  func.func @transform_8(%arg0: i32) -> (i32, i32) {
    %c0_i32 = arith.constant 0 : i32
    %c0_i32_0 = arith.constant 0 : i32
    %c0_i32_1 = arith.constant 0 : i32
    return %c0_i32, %c0_i32_0 : i32, i32
  }
  func.func @transform_9(%arg0: i32) -> (i32, i32) {
    %c0_i32 = arith.constant 0 : i32
    %c0_i32_0 = arith.constant 0 : i32
    %c0_i32_1 = arith.constant 0 : i32
    return %c0_i32, %c0_i32_0 : i32, i32
  }
  func.func @transform_10(%arg0: i32) -> (i32, i32) {
    %c0_i32 = arith.constant 0 : i32
    %c0_i32_0 = arith.constant 0 : i32
    %c0_i32_1 = arith.constant 0 : i32
    return %c0_i32, %c0_i32_0 : i32, i32
  }
  func.func @transform_11(%arg0: i32) -> (i32, i32) {
    %c0_i32 = arith.constant 0 : i32
    %c0_i32_0 = arith.constant 0 : i32
    %c0_i32_1 = arith.constant 0 : i32
    return %c0_i32, %c0_i32_0 : i32, i32
  }
  func.func @transform_12(%arg0: i32) -> (i32, i32, i32) {
    %c0_i32 = arith.constant 0 : i32
    %c0_i32_0 = arith.constant 0 : i32
    %c0_i32_1 = arith.constant 0 : i32
    return %arg0, %c0_i32, %c0_i32_0 : i32, i32, i32
  }
}

module attributes {stable_mosaic.version = 11 : i64} {
  func.func @_attn_block_kernel(%arg0: i32, %arg1: memref<1x8x32xf32, #tpu.memory_space<vmem>>, %arg2: memref<1x8x32xf32, #tpu.memory_space<vmem>>, %arg3: memref<32x32xbf16, #tpu.memory_space<vmem>>, %arg4: memref<1x32xf32, #tpu.memory_space<vmem>>, %arg5: memref<32x32xbf16, #tpu.memory_space<vmem>>, %arg6: memref<1x32xf32, #tpu.memory_space<vmem>>, %arg7: memref<32x32xbf16, #tpu.memory_space<vmem>>, %arg8: memref<1x32xf32, #tpu.memory_space<vmem>>, %arg9: memref<32x32xbf16, #tpu.memory_space<vmem>>, %arg10: memref<1x32xf32, #tpu.memory_space<vmem>>, %arg11: memref<1x32xf32, #tpu.memory_space<vmem>>, %arg12: memref<1x32xf32, #tpu.memory_space<vmem>>, %arg13: memref<1x8x32xf32, #tpu.memory_space<vmem>>) attributes {dimension_semantics = [#tpu.dimension_semantics<parallel>], iteration_bounds = array<i64: 2>, scalar_prefetch = 0 : i64, scratch_operands = 0 : i64, tpu.core_type = #tpu.core_type<tc>, window_params = [{transform_indices = @transform_0, window_bounds = array<i64: 1, 8, 32>}, {transform_indices = @transform_1, window_bounds = array<i64: 1, 8, 32>}, {pipeline_mode = #tpu.pipeline_mode<synchronous>, transform_indices = @transform_2, window_bounds = array<i64: 32, 32>}, {pipeline_mode = #tpu.pipeline_mode<synchronous>, transform_indices = @transform_3, window_bounds = array<i64: 1, 32>}, {pipeline_mode = #tpu.pipeline_mode<synchronous>, transform_indices = @transform_4, window_bounds = array<i64: 32, 32>}, {pipeline_mode = #tpu.pipeline_mode<synchronous>, transform_indices = @transform_5, window_bounds = array<i64: 1, 32>}, {pipeline_mode = #tpu.pipeline_mode<synchronous>, transform_indices = @transform_6, window_bounds = array<i64: 32, 32>}, {pipeline_mode = #tpu.pipeline_mode<synchronous>, transform_indices = @transform_7, window_bounds = array<i64: 1, 32>}, {pipeline_mode = #tpu.pipeline_mode<synchronous>, transform_indices = @transform_8, window_bounds = array<i64: 32, 32>}, {pipeline_mode = #tpu.pipeline_mode<synchronous>, transform_indices = @transform_9, window_bounds = array<i64: 1, 32>}, {pipeline_mode = #tpu.pipeline_mode<synchronous>, transform_indices = @transform_10, window_bounds = array<i64: 1, 32>}, {pipeline_mode = #tpu.pipeline_mode<synchronous>, transform_indices = @transform_11, window_bounds = array<i64: 1, 32>}, {transform_indices = @transform_12, window_bounds = array<i64: 1, 8, 32>}]} {
    %c0 = arith.constant 0 : index
    %c0_0 = arith.constant 0 : index
    %c0_1 = arith.constant 0 : index
    %0 = vector.load %arg1[%c0, %c0_0, %c0_1] : memref<1x8x32xf32, #tpu.memory_space<vmem>>, vector<1x8x32xf32>
    %1 = vector.shape_cast %0 : vector<1x8x32xf32> to vector<8x32xf32>
    %c0_2 = arith.constant 0 : index
    %c0_3 = arith.constant 0 : index
    %c0_4 = arith.constant 0 : index
    %2 = vector.load %arg2[%c0_2, %c0_3, %c0_4] : memref<1x8x32xf32, #tpu.memory_space<vmem>>, vector<1x8x32xf32>
    %3 = vector.shape_cast %2 : vector<1x8x32xf32> to vector<8x32xf32>
    %4 = arith.truncf %1 : vector<8x32xf32> to vector<8x32xbf16>
    %c0_5 = arith.constant 0 : index
    %c0_6 = arith.constant 0 : index
    %5 = vector.load %arg3[%c0_5, %c0_6] : memref<32x32xbf16, #tpu.memory_space<vmem>>, vector<32x32xbf16>
    %cst = arith.constant dense<0.000000e+00> : vector<8x32xf32>
    %6 = tpu.matmul %4, %5, %cst {dimension_numbers = #tpu.dot_dimension_numbers<[1], [0], [0], [1], [0, 0, 1, 1], [], []>} : vector<8x32xbf16>, vector<32x32xbf16>, vector<8x32xf32> -> vector<8x32xf32>
    %c0_7 = arith.constant 0 : index
    %c0_8 = arith.constant 0 : index
    %7 = vector.load %arg4[%c0_7, %c0_8] : memref<1x32xf32, #tpu.memory_space<vmem>>, vector<1x32xf32>
    %8 = vector.broadcast %7 : vector<1x32xf32> to vector<8x32xf32>
    %9 = arith.addf %6, %8 : vector<8x32xf32>
    %10 = arith.truncf %3 : vector<8x32xf32> to vector<8x32xbf16>
    %c0_9 = arith.constant 0 : index
    %c0_10 = arith.constant 0 : index
    %11 = vector.load %arg5[%c0_9, %c0_10] : memref<32x32xbf16, #tpu.memory_space<vmem>>, vector<32x32xbf16>
    %cst_11 = arith.constant dense<0.000000e+00> : vector<8x32xf32>
    %12 = tpu.matmul %10, %11, %cst_11 {dimension_numbers = #tpu.dot_dimension_numbers<[1], [0], [0], [1], [0, 0, 1, 1], [], []>} : vector<8x32xbf16>, vector<32x32xbf16>, vector<8x32xf32> -> vector<8x32xf32>
    %c0_12 = arith.constant 0 : index
    %c0_13 = arith.constant 0 : index
    %13 = vector.load %arg6[%c0_12, %c0_13] : memref<1x32xf32, #tpu.memory_space<vmem>>, vector<1x32xf32>
    %14 = vector.broadcast %13 : vector<1x32xf32> to vector<8x32xf32>
    %15 = arith.addf %12, %14 : vector<8x32xf32>
    %16 = arith.truncf %3 : vector<8x32xf32> to vector<8x32xbf16>
    %c0_14 = arith.constant 0 : index
    %c0_15 = arith.constant 0 : index
    %17 = vector.load %arg7[%c0_14, %c0_15] : memref<32x32xbf16, #tpu.memory_space<vmem>>, vector<32x32xbf16>
    %cst_16 = arith.constant dense<0.000000e+00> : vector<8x32xf32>
    %18 = tpu.matmul %16, %17, %cst_16 {dimension_numbers = #tpu.dot_dimension_numbers<[1], [0], [0], [1], [0, 0, 1, 1], [], []>} : vector<8x32xbf16>, vector<32x32xbf16>, vector<8x32xf32> -> vector<8x32xf32>
    %c0_17 = arith.constant 0 : index
    %c0_18 = arith.constant 0 : index
    %19 = vector.load %arg8[%c0_17, %c0_18] : memref<1x32xf32, #tpu.memory_space<vmem>>, vector<1x32xf32>
    %20 = vector.broadcast %19 : vector<1x32xf32> to vector<8x32xf32>
    %21 = arith.addf %18, %20 : vector<8x32xf32>
    %cst_19 = arith.constant 0.353553385 : f32
    %22 = vector.broadcast %cst_19 : f32 to vector<8x32xf32>
    %23 = arith.mulf %9, %22 : vector<8x32xf32>
    %24 = arith.truncf %23 : vector<8x32xf32> to vector<8x32xbf16>
    %25 = arith.truncf %15 : vector<8x32xf32> to vector<8x32xbf16>
    %26 = arith.truncf %21 : vector<8x32xf32> to vector<8x32xbf16>
    %27 = tpu.iota {dimensions = array<i32: 1>} : vector<1x32xi32>
    %28 = tpu.iota {dimensions = array<i32: 0>} : vector<8x8xi32>
    %29 = tpu.iota {dimensions = array<i32: 1>} : vector<8x8xi32>
    %30 = arith.cmpi sle, %29, %28 : vector<8x8xi32>
    %cst_20 = arith.constant 0.000000e+00 : f32
    %cst_21 = arith.constant -1.000000e+30 : f32
    %31 = vector.broadcast %cst_20 : f32 to vector<8x8xf32>
    %32 = vector.broadcast %cst_21 : f32 to vector<8x8xf32>
    %33 = arith.select %30, %31, %32 : vector<8x8xi1>, vector<8x8xf32>
    %cst_22 = arith.constant 0.000000e+00 : f32
    %34 = vector.broadcast %cst_22 : f32 to vector<8x32xf32>
    %c0_i32 = arith.constant 0 : i32
    %35 = vector.broadcast %c0_i32 : i32 to vector<1x32xi32>
    %36 = arith.cmpi sge, %27, %35 : vector<1x32xi32>
    %c8_i32 = arith.constant 8 : i32
    %37 = vector.broadcast %c8_i32 : i32 to vector<1x32xi32>
    %38 = arith.cmpi slt, %27, %37 : vector<1x32xi32>
    %39 = arith.andi %36, %38 : vector<1x32xi1>
    %40 = arith.extui %39 : vector<1x32xi1> to vector<1x32xi32>
    %41 = arith.sitofp %40 : vector<1x32xi32> to vector<1x32xf32>
    %42 = arith.truncf %41 : vector<1x32xf32> to vector<1x32xbf16>
    %43 = vector.broadcast %42 : vector<1x32xbf16> to vector<8x32xbf16>
    %44 = arith.mulf %24, %43 : vector<8x32xbf16>
    %cst_23 = arith.constant dense<0.000000e+00> : vector<8x8xf32>
    %45 = tpu.matmul %44, %25, %cst_23 {dimension_numbers = #tpu.dot_dimension_numbers<[1], [1], [0], [0], [0, 0, 1, 0], [], []>} : vector<8x32xbf16>, vector<8x32xbf16>, vector<8x8xf32> -> vector<8x8xf32>
    %46 = arith.addf %45, %33 : vector<8x8xf32>
    %cst_24 = arith.constant dense<0xFF800000> : vector<8xf32>
    %47 = vector.multi_reduction <maximumf>, %46, %cst_24 [1] : vector<8x8xf32> to vector<8xf32>
    %48 = vector.shape_cast %47 : vector<8xf32> to vector<8x1xf32>
    %49 = vector.broadcast %48 : vector<8x1xf32> to vector<8x8xf32>
    %50 = arith.subf %46, %49 : vector<8x8xf32>
    %51 = math.exp %50 : vector<8x8xf32>
    %cst_25 = arith.constant dense<0.000000e+00> : vector<8xf32>
    %52 = vector.multi_reduction <add>, %51, %cst_25 [1] : vector<8x8xf32> to vector<8xf32>
    %53 = vector.shape_cast %52 : vector<8xf32> to vector<8x1xf32>
    %54 = tpu.reciprocal %53 {approx = true} : vector<8x1xf32> -> vector<8x1xf32>
    %55 = vector.broadcast %54 : vector<8x1xf32> to vector<8x8xf32>
    %56 = arith.mulf %51, %55 : vector<8x8xf32>
    %57 = arith.truncf %56 : vector<8x8xf32> to vector<8x8xbf16>
    %cst_26 = arith.constant dense<0.000000e+00> : vector<8x32xf32>
    %58 = tpu.matmul %57, %26, %cst_26 {dimension_numbers = #tpu.dot_dimension_numbers<[1], [0], [0], [1], [0, 0, 1, 1], [], []>} : vector<8x8xbf16>, vector<8x32xbf16>, vector<8x32xf32> -> vector<8x32xf32>
    %59 = vector.broadcast %41 : vector<1x32xf32> to vector<8x32xf32>
    %60 = arith.mulf %58, %59 : vector<8x32xf32>
    %61 = arith.addf %34, %60 : vector<8x32xf32>
    %c8_i32_27 = arith.constant 8 : i32
    %62 = vector.broadcast %c8_i32_27 : i32 to vector<1x32xi32>
    %63 = arith.cmpi sge, %27, %62 : vector<1x32xi32>
    %c16_i32 = arith.constant 16 : i32
    %64 = vector.broadcast %c16_i32 : i32 to vector<1x32xi32>
    %65 = arith.cmpi slt, %27, %64 : vector<1x32xi32>
    %66 = arith.andi %63, %65 : vector<1x32xi1>
    %67 = arith.extui %66 : vector<1x32xi1> to vector<1x32xi32>
    %68 = arith.sitofp %67 : vector<1x32xi32> to vector<1x32xf32>
    %69 = arith.truncf %68 : vector<1x32xf32> to vector<1x32xbf16>
    %70 = vector.broadcast %69 : vector<1x32xbf16> to vector<8x32xbf16>
    %71 = arith.mulf %24, %70 : vector<8x32xbf16>
    %cst_28 = arith.constant dense<0.000000e+00> : vector<8x8xf32>
    %72 = tpu.matmul %71, %25, %cst_28 {dimension_numbers = #tpu.dot_dimension_numbers<[1], [1], [0], [0], [0, 0, 1, 0], [], []>} : vector<8x32xbf16>, vector<8x32xbf16>, vector<8x8xf32> -> vector<8x8xf32>
    %73 = arith.addf %72, %33 : vector<8x8xf32>
    %cst_29 = arith.constant dense<0xFF800000> : vector<8xf32>
    %74 = vector.multi_reduction <maximumf>, %73, %cst_29 [1] : vector<8x8xf32> to vector<8xf32>
    %75 = vector.shape_cast %74 : vector<8xf32> to vector<8x1xf32>
    %76 = vector.broadcast %75 : vector<8x1xf32> to vector<8x8xf32>
    %77 = arith.subf %73, %76 : vector<8x8xf32>
    %78 = math.exp %77 : vector<8x8xf32>
    %cst_30 = arith.constant dense<0.000000e+00> : vector<8xf32>
    %79 = vector.multi_reduction <add>, %78, %cst_30 [1] : vector<8x8xf32> to vector<8xf32>
    %80 = vector.shape_cast %79 : vector<8xf32> to vector<8x1xf32>
    %81 = tpu.reciprocal %80 {approx = true} : vector<8x1xf32> -> vector<8x1xf32>
    %82 = vector.broadcast %81 : vector<8x1xf32> to vector<8x8xf32>
    %83 = arith.mulf %78, %82 : vector<8x8xf32>
    %84 = arith.truncf %83 : vector<8x8xf32> to vector<8x8xbf16>
    %cst_31 = arith.constant dense<0.000000e+00> : vector<8x32xf32>
    %85 = tpu.matmul %84, %26, %cst_31 {dimension_numbers = #tpu.dot_dimension_numbers<[1], [0], [0], [1], [0, 0, 1, 1], [], []>} : vector<8x8xbf16>, vector<8x32xbf16>, vector<8x32xf32> -> vector<8x32xf32>
    %86 = vector.broadcast %68 : vector<1x32xf32> to vector<8x32xf32>
    %87 = arith.mulf %85, %86 : vector<8x32xf32>
    %88 = arith.addf %61, %87 : vector<8x32xf32>
    %c16_i32_32 = arith.constant 16 : i32
    %89 = vector.broadcast %c16_i32_32 : i32 to vector<1x32xi32>
    %90 = arith.cmpi sge, %27, %89 : vector<1x32xi32>
    %c24_i32 = arith.constant 24 : i32
    %91 = vector.broadcast %c24_i32 : i32 to vector<1x32xi32>
    %92 = arith.cmpi slt, %27, %91 : vector<1x32xi32>
    %93 = arith.andi %90, %92 : vector<1x32xi1>
    %94 = arith.extui %93 : vector<1x32xi1> to vector<1x32xi32>
    %95 = arith.sitofp %94 : vector<1x32xi32> to vector<1x32xf32>
    %96 = arith.truncf %95 : vector<1x32xf32> to vector<1x32xbf16>
    %97 = vector.broadcast %96 : vector<1x32xbf16> to vector<8x32xbf16>
    %98 = arith.mulf %24, %97 : vector<8x32xbf16>
    %cst_33 = arith.constant dense<0.000000e+00> : vector<8x8xf32>
    %99 = tpu.matmul %98, %25, %cst_33 {dimension_numbers = #tpu.dot_dimension_numbers<[1], [1], [0], [0], [0, 0, 1, 0], [], []>} : vector<8x32xbf16>, vector<8x32xbf16>, vector<8x8xf32> -> vector<8x8xf32>
    %100 = arith.addf %99, %33 : vector<8x8xf32>
    %cst_34 = arith.constant dense<0xFF800000> : vector<8xf32>
    %101 = vector.multi_reduction <maximumf>, %100, %cst_34 [1] : vector<8x8xf32> to vector<8xf32>
    %102 = vector.shape_cast %101 : vector<8xf32> to vector<8x1xf32>
    %103 = vector.broadcast %102 : vector<8x1xf32> to vector<8x8xf32>
    %104 = arith.subf %100, %103 : vector<8x8xf32>
    %105 = math.exp %104 : vector<8x8xf32>
    %cst_35 = arith.constant dense<0.000000e+00> : vector<8xf32>
    %106 = vector.multi_reduction <add>, %105, %cst_35 [1] : vector<8x8xf32> to vector<8xf32>
    %107 = vector.shape_cast %106 : vector<8xf32> to vector<8x1xf32>
    %108 = tpu.reciprocal %107 {approx = true} : vector<8x1xf32> -> vector<8x1xf32>
    %109 = vector.broadcast %108 : vector<8x1xf32> to vector<8x8xf32>
    %110 = arith.mulf %105, %109 : vector<8x8xf32>
    %111 = arith.truncf %110 : vector<8x8xf32> to vector<8x8xbf16>
    %cst_36 = arith.constant dense<0.000000e+00> : vector<8x32xf32>
    %112 = tpu.matmul %111, %26, %cst_36 {dimension_numbers = #tpu.dot_dimension_numbers<[1], [0], [0], [1], [0, 0, 1, 1], [], []>} : vector<8x8xbf16>, vector<8x32xbf16>, vector<8x32xf32> -> vector<8x32xf32>
    %113 = vector.broadcast %95 : vector<1x32xf32> to vector<8x32xf32>
    %114 = arith.mulf %112, %113 : vector<8x32xf32>
    %115 = arith.addf %88, %114 : vector<8x32xf32>
    %c24_i32_37 = arith.constant 24 : i32
    %116 = vector.broadcast %c24_i32_37 : i32 to vector<1x32xi32>
    %117 = arith.cmpi sge, %27, %116 : vector<1x32xi32>
    %c32_i32 = arith.constant 32 : i32
    %118 = vector.broadcast %c32_i32 : i32 to vector<1x32xi32>
    %119 = arith.cmpi slt, %27, %118 : vector<1x32xi32>
    %120 = arith.andi %117, %119 : vector<1x32xi1>
    %121 = arith.extui %120 : vector<1x32xi1> to vector<1x32xi32>
    %122 = arith.sitofp %121 : vector<1x32xi32> to vector<1x32xf32>
    %123 = arith.truncf %122 : vector<1x32xf32> to vector<1x32xbf16>
    %124 = vector.broadcast %123 : vector<1x32xbf16> to vector<8x32xbf16>
    %125 = arith.mulf %24, %124 : vector<8x32xbf16>
    %cst_38 = arith.constant dense<0.000000e+00> : vector<8x8xf32>
    %126 = tpu.matmul %125, %25, %cst_38 {dimension_numbers = #tpu.dot_dimension_numbers<[1], [1], [0], [0], [0, 0, 1, 0], [], []>} : vector<8x32xbf16>, vector<8x32xbf16>, vector<8x8xf32> -> vector<8x8xf32>
    %127 = arith.addf %126, %33 : vector<8x8xf32>
    %cst_39 = arith.constant dense<0xFF800000> : vector<8xf32>
    %128 = vector.multi_reduction <maximumf>, %127, %cst_39 [1] : vector<8x8xf32> to vector<8xf32>
    %129 = vector.shape_cast %128 : vector<8xf32> to vector<8x1xf32>
    %130 = vector.broadcast %129 : vector<8x1xf32> to vector<8x8xf32>
    %131 = arith.subf %127, %130 : vector<8x8xf32>
    %132 = math.exp %131 : vector<8x8xf32>
    %cst_40 = arith.constant dense<0.000000e+00> : vector<8xf32>
    %133 = vector.multi_reduction <add>, %132, %cst_40 [1] : vector<8x8xf32> to vector<8xf32>
    %134 = vector.shape_cast %133 : vector<8xf32> to vector<8x1xf32>
    %135 = tpu.reciprocal %134 {approx = true} : vector<8x1xf32> -> vector<8x1xf32>
    %136 = vector.broadcast %135 : vector<8x1xf32> to vector<8x8xf32>
    %137 = arith.mulf %132, %136 : vector<8x8xf32>
    %138 = arith.truncf %137 : vector<8x8xf32> to vector<8x8xbf16>
    %cst_41 = arith.constant dense<0.000000e+00> : vector<8x32xf32>
    %139 = tpu.matmul %138, %26, %cst_41 {dimension_numbers = #tpu.dot_dimension_numbers<[1], [0], [0], [1], [0, 0, 1, 1], [], []>} : vector<8x8xbf16>, vector<8x32xbf16>, vector<8x32xf32> -> vector<8x32xf32>
    %140 = vector.broadcast %122 : vector<1x32xf32> to vector<8x32xf32>
    %141 = arith.mulf %139, %140 : vector<8x32xf32>
    %142 = arith.addf %115, %141 : vector<8x32xf32>
    %143 = arith.truncf %142 : vector<8x32xf32> to vector<8x32xbf16>
    %c0_42 = arith.constant 0 : index
    %c0_43 = arith.constant 0 : index
    %144 = vector.load %arg9[%c0_42, %c0_43] : memref<32x32xbf16, #tpu.memory_space<vmem>>, vector<32x32xbf16>
    %cst_44 = arith.constant dense<0.000000e+00> : vector<8x32xf32>
    %145 = tpu.matmul %143, %144, %cst_44 {dimension_numbers = #tpu.dot_dimension_numbers<[1], [0], [0], [1], [0, 0, 1, 1], [], []>} : vector<8x32xbf16>, vector<32x32xbf16>, vector<8x32xf32> -> vector<8x32xf32>
    %c0_45 = arith.constant 0 : index
    %c0_46 = arith.constant 0 : index
    %146 = vector.load %arg10[%c0_45, %c0_46] : memref<1x32xf32, #tpu.memory_space<vmem>>, vector<1x32xf32>
    %147 = vector.broadcast %146 : vector<1x32xf32> to vector<8x32xf32>
    %148 = arith.addf %145, %147 : vector<8x32xf32>
    %149 = arith.addf %1, %148 : vector<8x32xf32>
    %c0_47 = arith.constant 0 : index
    %c0_48 = arith.constant 0 : index
    %150 = vector.load %arg11[%c0_47, %c0_48] : memref<1x32xf32, #tpu.memory_space<vmem>>, vector<1x32xf32>
    %c0_49 = arith.constant 0 : index
    %c0_50 = arith.constant 0 : index
    %151 = vector.load %arg12[%c0_49, %c0_50] : memref<1x32xf32, #tpu.memory_space<vmem>>, vector<1x32xf32>
    %cst_51 = arith.constant dense<0.000000e+00> : vector<8xf32>
    %152 = vector.multi_reduction <add>, %149, %cst_51 [1] : vector<8x32xf32> to vector<8xf32>
    %153 = vector.shape_cast %152 : vector<8xf32> to vector<8x1xf32>
    %cst_52 = arith.constant 3.200000e+01 : f32
    %154 = vector.broadcast %cst_52 : f32 to vector<8x1xf32>
    %155 = arith.divf %153, %154 : vector<8x1xf32>
    %156 = vector.broadcast %155 : vector<8x1xf32> to vector<8x32xf32>
    %157 = arith.subf %149, %156 : vector<8x32xf32>
    %158 = arith.mulf %157, %157 : vector<8x32xf32>
    %cst_53 = arith.constant dense<0.000000e+00> : vector<8xf32>
    %159 = vector.multi_reduction <add>, %158, %cst_53 [1] : vector<8x32xf32> to vector<8xf32>
    %160 = vector.shape_cast %159 : vector<8xf32> to vector<8x1xf32>
    %cst_54 = arith.constant 3.200000e+01 : f32
    %161 = vector.broadcast %cst_54 : f32 to vector<8x1xf32>
    %162 = arith.divf %160, %161 : vector<8x1xf32>
    %cst_55 = arith.constant 9.99999974E-6 : f32
    %163 = vector.broadcast %cst_55 : f32 to vector<8x1xf32>
    %164 = arith.addf %162, %163 : vector<8x1xf32>
    %165 = math.rsqrt %164 : vector<8x1xf32>
    %166 = vector.broadcast %165 : vector<8x1xf32> to vector<8x32xf32>
    %167 = arith.mulf %157, %166 : vector<8x32xf32>
    %168 = vector.broadcast %150 : vector<1x32xf32> to vector<8x32xf32>
    %169 = arith.mulf %167, %168 : vector<8x32xf32>
    %170 = vector.broadcast %151 : vector<1x32xf32> to vector<8x32xf32>
    %171 = arith.addf %169, %170 : vector<8x32xf32>
    %c0_56 = arith.constant 0 : index
    %c0_57 = arith.constant 0 : index
    %c0_58 = arith.constant 0 : index
    %172 = vector.load %arg13[%c0_56, %c0_57, %c0_58] : memref<1x8x32xf32, #tpu.memory_space<vmem>>, vector<1x8x32xf32>
    %173 = vector.shape_cast %172 : vector<1x8x32xf32> to vector<8x32xf32>
    %174 = vector.shape_cast %171 : vector<8x32xf32> to vector<1x8x32xf32>
    tpu.vector_store %arg13[%c0_56, %c0_57, %c0_58], %174 {strides = array<i32>} : memref<1x8x32xf32, #tpu.memory_space<vmem>>, vector<1x8x32xf32>,
    return
  }
  func.func @transform_0(%arg0: i32) -> (i32, i32, i32) {
    %c0_i32 = arith.constant 0 : i32
    %c0_i32_0 = arith.constant 0 : i32
    %c0_i32_1 = arith.constant 0 : i32
    return %arg0, %c0_i32, %c0_i32_0 : i32, i32, i32
  }
  func.func @transform_1(%arg0: i32) -> (i32, i32, i32) {
    %c0_i32 = arith.constant 0 : i32
    %c0_i32_0 = arith.constant 0 : i32
    %c0_i32_1 = arith.constant 0 : i32
    return %arg0, %c0_i32, %c0_i32_0 : i32, i32, i32
  }
  func.func @transform_2(%arg0: i32) -> (i32, i32) {
    %c0_i32 = arith.constant 0 : i32
    %c0_i32_0 = arith.constant 0 : i32
    %c0_i32_1 = arith.constant 0 : i32
    return %c0_i32, %c0_i32_0 : i32, i32
  }
  func.func @transform_3(%arg0: i32) -> (i32, i32) {
    %c0_i32 = arith.constant 0 : i32
    %c0_i32_0 = arith.constant 0 : i32
    %c0_i32_1 = arith.constant 0 : i32
    return %c0_i32, %c0_i32_0 : i32, i32
  }
  func.func @transform_4(%arg0: i32) -> (i32, i32) {
    %c0_i32 = arith.constant 0 : i32
    %c0_i32_0 = arith.constant 0 : i32
    %c0_i32_1 = arith.constant 0 : i32
    return %c0_i32, %c0_i32_0 : i32, i32
  }
  func.func @transform_5(%arg0: i32) -> (i32, i32) {
    %c0_i32 = arith.constant 0 : i32
    %c0_i32_0 = arith.constant 0 : i32
    %c0_i32_1 = arith.constant 0 : i32
    return %c0_i32, %c0_i32_0 : i32, i32
  }
  func.func @transform_6(%arg0: i32) -> (i32, i32) {
    %c0_i32 = arith.constant 0 : i32
    %c0_i32_0 = arith.constant 0 : i32
    %c0_i32_1 = arith.constant 0 : i32
    return %c0_i32, %c0_i32_0 : i32, i32
  }
  func.func @transform_7(%arg0: i32) -> (i32, i32) {
    %c0_i32 = arith.constant 0 : i32
    %c0_i32_0 = arith.constant 0 : i32
    %c0_i32_1 = arith.constant 0 : i32
    return %c0_i32, %c0_i32_0 : i32, i32
  }
  func.func @transform_8(%arg0: i32) -> (i32, i32) {
    %c0_i32 = arith.constant 0 : i32
    %c0_i32_0 = arith.constant 0 : i32
    %c0_i32_1 = arith.constant 0 : i32
    return %c0_i32, %c0_i32_0 : i32, i32
  }
  func.func @transform_9(%arg0: i32) -> (i32, i32) {
    %c0_i32 = arith.constant 0 : i32
    %c0_i32_0 = arith.constant 0 : i32
    %c0_i32_1 = arith.constant 0 : i32
    return %c0_i32, %c0_i32_0 : i32, i32
  }
  func.func @transform_10(%arg0: i32) -> (i32, i32) {
    %c0_i32 = arith.constant 0 : i32
    %c0_i32_0 = arith.constant 0 : i32
    %c0_i32_1 = arith.constant 0 : i32
    return %c0_i32, %c0_i32_0 : i32, i32
  }
  func.func @transform_11(%arg0: i32) -> (i32, i32) {
    %c0_i32 = arith.constant 0 : i32
    %c0_i32_0 = arith.constant 0 : i32
    %c0_i32_1 = arith.constant 0 : i32
    return %c0_i32, %c0_i32_0 : i32, i32
  }
  func.func @transform_12(%arg0: i32) -> (i32, i32, i32) {
    %c0_i32 = arith.constant 0 : i32
    %c0_i32_0 = arith.constant 0 : i32
    %c0_i32_1 = arith.constant 0 : i32
    return %arg0, %c0_i32, %c0_i32_0 : i32, i32, i32
  }
}

module attributes {stable_mosaic.version = 11 : i64} {
  func.func @_attn_block_kernel(%arg0: i32, %arg1: memref<1x8x32xf32, #tpu.memory_space<vmem>>, %arg2: memref<1x4x32xf32, #tpu.memory_space<vmem>>, %arg3: memref<32x32xbf16, #tpu.memory_space<vmem>>, %arg4: memref<1x32xf32, #tpu.memory_space<vmem>>, %arg5: memref<32x32xbf16, #tpu.memory_space<vmem>>, %arg6: memref<1x32xf32, #tpu.memory_space<vmem>>, %arg7: memref<32x32xbf16, #tpu.memory_space<vmem>>, %arg8: memref<1x32xf32, #tpu.memory_space<vmem>>, %arg9: memref<32x32xbf16, #tpu.memory_space<vmem>>, %arg10: memref<1x32xf32, #tpu.memory_space<vmem>>, %arg11: memref<1x32xf32, #tpu.memory_space<vmem>>, %arg12: memref<1x32xf32, #tpu.memory_space<vmem>>, %arg13: memref<1x8x32xf32, #tpu.memory_space<vmem>>) attributes {dimension_semantics = [#tpu.dimension_semantics<parallel>], iteration_bounds = array<i64: 2>, scalar_prefetch = 0 : i64, scratch_operands = 0 : i64, tpu.core_type = #tpu.core_type<tc>, window_params = [{transform_indices = @transform_0, window_bounds = array<i64: 1, 8, 32>}, {transform_indices = @transform_1, window_bounds = array<i64: 1, 4, 32>}, {pipeline_mode = #tpu.pipeline_mode<synchronous>, transform_indices = @transform_2, window_bounds = array<i64: 32, 32>}, {pipeline_mode = #tpu.pipeline_mode<synchronous>, transform_indices = @transform_3, window_bounds = array<i64: 1, 32>}, {pipeline_mode = #tpu.pipeline_mode<synchronous>, transform_indices = @transform_4, window_bounds = array<i64: 32, 32>}, {pipeline_mode = #tpu.pipeline_mode<synchronous>, transform_indices = @transform_5, window_bounds = array<i64: 1, 32>}, {pipeline_mode = #tpu.pipeline_mode<synchronous>, transform_indices = @transform_6, window_bounds = array<i64: 32, 32>}, {pipeline_mode = #tpu.pipeline_mode<synchronous>, transform_indices = @transform_7, window_bounds = array<i64: 1, 32>}, {pipeline_mode = #tpu.pipeline_mode<synchronous>, transform_indices = @transform_8, window_bounds = array<i64: 32, 32>}, {pipeline_mode = #tpu.pipeline_mode<synchronous>, transform_indices = @transform_9, window_bounds = array<i64: 1, 32>}, {pipeline_mode = #tpu.pipeline_mode<synchronous>, transform_indices = @transform_10, window_bounds = array<i64: 1, 32>}, {pipeline_mode = #tpu.pipeline_mode<synchronous>, transform_indices = @transform_11, window_bounds = array<i64: 1, 32>}, {transform_indices = @transform_12, window_bounds = array<i64: 1, 8, 32>}]} {
    %c0 = arith.constant 0 : index
    %c0_0 = arith.constant 0 : index
    %c0_1 = arith.constant 0 : index
    %0 = vector.load %arg1[%c0, %c0_0, %c0_1] : memref<1x8x32xf32, #tpu.memory_space<vmem>>, vector<1x8x32xf32>
    %1 = vector.shape_cast %0 : vector<1x8x32xf32> to vector<8x32xf32>
    %c0_2 = arith.constant 0 : index
    %c0_3 = arith.constant 0 : index
    %c0_4 = arith.constant 0 : index
    %2 = vector.load %arg2[%c0_2, %c0_3, %c0_4] : memref<1x4x32xf32, #tpu.memory_space<vmem>>, vector<1x4x32xf32>
    %3 = vector.shape_cast %2 : vector<1x4x32xf32> to vector<4x32xf32>
    %4 = arith.truncf %1 : vector<8x32xf32> to vector<8x32xbf16>
    %c0_5 = arith.constant 0 : index
    %c0_6 = arith.constant 0 : index
    %5 = vector.load %arg3[%c0_5, %c0_6] : memref<32x32xbf16, #tpu.memory_space<vmem>>, vector<32x32xbf16>
    %cst = arith.constant dense<0.000000e+00> : vector<8x32xf32>
    %6 = tpu.matmul %4, %5, %cst {dimension_numbers = #tpu.dot_dimension_numbers<[1], [0], [0], [1], [0, 0, 1, 1], [], []>} : vector<8x32xbf16>, vector<32x32xbf16>, vector<8x32xf32> -> vector<8x32xf32>
    %c0_7 = arith.constant 0 : index
    %c0_8 = arith.constant 0 : index
    %7 = vector.load %arg4[%c0_7, %c0_8] : memref<1x32xf32, #tpu.memory_space<vmem>>, vector<1x32xf32>
    %8 = vector.broadcast %7 : vector<1x32xf32> to vector<8x32xf32>
    %9 = arith.addf %6, %8 : vector<8x32xf32>
    %10 = arith.truncf %3 : vector<4x32xf32> to vector<4x32xbf16>
    %c0_9 = arith.constant 0 : index
    %c0_10 = arith.constant 0 : index
    %11 = vector.load %arg5[%c0_9, %c0_10] : memref<32x32xbf16, #tpu.memory_space<vmem>>, vector<32x32xbf16>
    %cst_11 = arith.constant dense<0.000000e+00> : vector<4x32xf32>
    %12 = tpu.matmul %10, %11, %cst_11 {dimension_numbers = #tpu.dot_dimension_numbers<[1], [0], [0], [1], [0, 0, 1, 1], [], []>} : vector<4x32xbf16>, vector<32x32xbf16>, vector<4x32xf32> -> vector<4x32xf32>
    %c0_12 = arith.constant 0 : index
    %c0_13 = arith.constant 0 : index
    %13 = vector.load %arg6[%c0_12, %c0_13] : memref<1x32xf32, #tpu.memory_space<vmem>>, vector<1x32xf32>
    %14 = vector.broadcast %13 : vector<1x32xf32> to vector<4x32xf32>
    %15 = arith.addf %12, %14 : vector<4x32xf32>
    %16 = arith.truncf %3 : vector<4x32xf32> to vector<4x32xbf16>
    %c0_14 = arith.constant 0 : index
    %c0_15 = arith.constant 0 : index
    %17 = vector.load %arg7[%c0_14, %c0_15] : memref<32x32xbf16, #tpu.memory_space<vmem>>, vector<32x32xbf16>
    %cst_16 = arith.constant dense<0.000000e+00> : vector<4x32xf32>
    %18 = tpu.matmul %16, %17, %cst_16 {dimension_numbers = #tpu.dot_dimension_numbers<[1], [0], [0], [1], [0, 0, 1, 1], [], []>} : vector<4x32xbf16>, vector<32x32xbf16>, vector<4x32xf32> -> vector<4x32xf32>
    %c0_17 = arith.constant 0 : index
    %c0_18 = arith.constant 0 : index
    %19 = vector.load %arg8[%c0_17, %c0_18] : memref<1x32xf32, #tpu.memory_space<vmem>>, vector<1x32xf32>
    %20 = vector.broadcast %19 : vector<1x32xf32> to vector<4x32xf32>
    %21 = arith.addf %18, %20 : vector<4x32xf32>
    %cst_19 = arith.constant 0.353553385 : f32
    %22 = vector.broadcast %cst_19 : f32 to vector<8x32xf32>
    %23 = arith.mulf %9, %22 : vector<8x32xf32>
    %24 = arith.truncf %23 : vector<8x32xf32> to vector<8x32xbf16>
    %25 = arith.truncf %15 : vector<4x32xf32> to vector<4x32xbf16>
    %26 = arith.truncf %21 : vector<4x32xf32> to vector<4x32xbf16>
    %27 = tpu.iota {dimensions = array<i32: 1>} : vector<1x32xi32>
    %cst_20 = arith.constant 0.000000e+00 : f32
    %28 = vector.broadcast %cst_20 : f32 to vector<8x32xf32>
    %c0_i32 = arith.constant 0 : i32
    %29 = vector.broadcast %c0_i32 : i32 to vector<1x32xi32>
    %30 = arith.cmpi sge, %27, %29 : vector<1x32xi32>
    %c8_i32 = arith.constant 8 : i32
    %31 = vector.broadcast %c8_i32 : i32 to vector<1x32xi32>
    %32 = arith.cmpi slt, %27, %31 : vector<1x32xi32>
    %33 = arith.andi %30, %32 : vector<1x32xi1>
    %34 = arith.extui %33 : vector<1x32xi1> to vector<1x32xi32>
    %35 = arith.sitofp %34 : vector<1x32xi32> to vector<1x32xf32>
    %36 = arith.truncf %35 : vector<1x32xf32> to vector<1x32xbf16>
    %37 = vector.broadcast %36 : vector<1x32xbf16> to vector<8x32xbf16>
    %38 = arith.mulf %24, %37 : vector<8x32xbf16>
    %cst_21 = arith.constant dense<0.000000e+00> : vector<8x4xf32>
    %39 = tpu.matmul %38, %25, %cst_21 {dimension_numbers = #tpu.dot_dimension_numbers<[1], [1], [0], [0], [0, 0, 1, 0], [], []>} : vector<8x32xbf16>, vector<4x32xbf16>, vector<8x4xf32> -> vector<8x4xf32>
    %cst_22 = arith.constant dense<0xFF800000> : vector<8xf32>
    %40 = vector.multi_reduction <maximumf>, %39, %cst_22 [1] : vector<8x4xf32> to vector<8xf32>
    %41 = vector.shape_cast %40 : vector<8xf32> to vector<8x1xf32>
    %42 = vector.broadcast %41 : vector<8x1xf32> to vector<8x4xf32>
    %43 = arith.subf %39, %42 : vector<8x4xf32>
    %44 = math.exp %43 : vector<8x4xf32>
    %cst_23 = arith.constant dense<0.000000e+00> : vector<8xf32>
    %45 = vector.multi_reduction <add>, %44, %cst_23 [1] : vector<8x4xf32> to vector<8xf32>
    %46 = vector.shape_cast %45 : vector<8xf32> to vector<8x1xf32>
    %47 = tpu.reciprocal %46 {approx = true} : vector<8x1xf32> -> vector<8x1xf32>
    %48 = vector.broadcast %47 : vector<8x1xf32> to vector<8x4xf32>
    %49 = arith.mulf %44, %48 : vector<8x4xf32>
    %50 = arith.truncf %49 : vector<8x4xf32> to vector<8x4xbf16>
    %cst_24 = arith.constant dense<0.000000e+00> : vector<8x32xf32>
    %51 = tpu.matmul %50, %26, %cst_24 {dimension_numbers = #tpu.dot_dimension_numbers<[1], [0], [0], [1], [0, 0, 1, 1], [], []>} : vector<8x4xbf16>, vector<4x32xbf16>, vector<8x32xf32> -> vector<8x32xf32>
    %52 = vector.broadcast %35 : vector<1x32xf32> to vector<8x32xf32>
    %53 = arith.mulf %51, %52 : vector<8x32xf32>
    %54 = arith.addf %28, %53 : vector<8x32xf32>
    %c8_i32_25 = arith.constant 8 : i32
    %55 = vector.broadcast %c8_i32_25 : i32 to vector<1x32xi32>
    %56 = arith.cmpi sge, %27, %55 : vector<1x32xi32>
    %c16_i32 = arith.constant 16 : i32
    %57 = vector.broadcast %c16_i32 : i32 to vector<1x32xi32>
    %58 = arith.cmpi slt, %27, %57 : vector<1x32xi32>
    %59 = arith.andi %56, %58 : vector<1x32xi1>
    %60 = arith.extui %59 : vector<1x32xi1> to vector<1x32xi32>
    %61 = arith.sitofp %60 : vector<1x32xi32> to vector<1x32xf32>
    %62 = arith.truncf %61 : vector<1x32xf32> to vector<1x32xbf16>
    %63 = vector.broadcast %62 : vector<1x32xbf16> to vector<8x32xbf16>
    %64 = arith.mulf %24, %63 : vector<8x32xbf16>
    %cst_26 = arith.constant dense<0.000000e+00> : vector<8x4xf32>
    %65 = tpu.matmul %64, %25, %cst_26 {dimension_numbers = #tpu.dot_dimension_numbers<[1], [1], [0], [0], [0, 0, 1, 0], [], []>} : vector<8x32xbf16>, vector<4x32xbf16>, vector<8x4xf32> -> vector<8x4xf32>
    %cst_27 = arith.constant dense<0xFF800000> : vector<8xf32>
    %66 = vector.multi_reduction <maximumf>, %65, %cst_27 [1] : vector<8x4xf32> to vector<8xf32>
    %67 = vector.shape_cast %66 : vector<8xf32> to vector<8x1xf32>
    %68 = vector.broadcast %67 : vector<8x1xf32> to vector<8x4xf32>
    %69 = arith.subf %65, %68 : vector<8x4xf32>
    %70 = math.exp %69 : vector<8x4xf32>
    %cst_28 = arith.constant dense<0.000000e+00> : vector<8xf32>
    %71 = vector.multi_reduction <add>, %70, %cst_28 [1] : vector<8x4xf32> to vector<8xf32>
    %72 = vector.shape_cast %71 : vector<8xf32> to vector<8x1xf32>
    %73 = tpu.reciprocal %72 {approx = true} : vector<8x1xf32> -> vector<8x1xf32>
    %74 = vector.broadcast %73 : vector<8x1xf32> to vector<8x4xf32>
    %75 = arith.mulf %70, %74 : vector<8x4xf32>
    %76 = arith.truncf %75 : vector<8x4xf32> to vector<8x4xbf16>
    %cst_29 = arith.constant dense<0.000000e+00> : vector<8x32xf32>
    %77 = tpu.matmul %76, %26, %cst_29 {dimension_numbers = #tpu.dot_dimension_numbers<[1], [0], [0], [1], [0, 0, 1, 1], [], []>} : vector<8x4xbf16>, vector<4x32xbf16>, vector<8x32xf32> -> vector<8x32xf32>
    %78 = vector.broadcast %61 : vector<1x32xf32> to vector<8x32xf32>
    %79 = arith.mulf %77, %78 : vector<8x32xf32>
    %80 = arith.addf %54, %79 : vector<8x32xf32>
    %c16_i32_30 = arith.constant 16 : i32
    %81 = vector.broadcast %c16_i32_30 : i32 to vector<1x32xi32>
    %82 = arith.cmpi sge, %27, %81 : vector<1x32xi32>
    %c24_i32 = arith.constant 24 : i32
    %83 = vector.broadcast %c24_i32 : i32 to vector<1x32xi32>
    %84 = arith.cmpi slt, %27, %83 : vector<1x32xi32>
    %85 = arith.andi %82, %84 : vector<1x32xi1>
    %86 = arith.extui %85 : vector<1x32xi1> to vector<1x32xi32>
    %87 = arith.sitofp %86 : vector<1x32xi32> to vector<1x32xf32>
    %88 = arith.truncf %87 : vector<1x32xf32> to vector<1x32xbf16>
    %89 = vector.broadcast %88 : vector<1x32xbf16> to vector<8x32xbf16>
    %90 = arith.mulf %24, %89 : vector<8x32xbf16>
    %cst_31 = arith.constant dense<0.000000e+00> : vector<8x4xf32>
    %91 = tpu.matmul %90, %25, %cst_31 {dimension_numbers = #tpu.dot_dimension_numbers<[1], [1], [0], [0], [0, 0, 1, 0], [], []>} : vector<8x32xbf16>, vector<4x32xbf16>, vector<8x4xf32> -> vector<8x4xf32>
    %cst_32 = arith.constant dense<0xFF800000> : vector<8xf32>
    %92 = vector.multi_reduction <maximumf>, %91, %cst_32 [1] : vector<8x4xf32> to vector<8xf32>
    %93 = vector.shape_cast %92 : vector<8xf32> to vector<8x1xf32>
    %94 = vector.broadcast %93 : vector<8x1xf32> to vector<8x4xf32>
    %95 = arith.subf %91, %94 : vector<8x4xf32>
    %96 = math.exp %95 : vector<8x4xf32>
    %cst_33 = arith.constant dense<0.000000e+00> : vector<8xf32>
    %97 = vector.multi_reduction <add>, %96, %cst_33 [1] : vector<8x4xf32> to vector<8xf32>
    %98 = vector.shape_cast %97 : vector<8xf32> to vector<8x1xf32>
    %99 = tpu.reciprocal %98 {approx = true} : vector<8x1xf32> -> vector<8x1xf32>
    %100 = vector.broadcast %99 : vector<8x1xf32> to vector<8x4xf32>
    %101 = arith.mulf %96, %100 : vector<8x4xf32>
    %102 = arith.truncf %101 : vector<8x4xf32> to vector<8x4xbf16>
    %cst_34 = arith.constant dense<0.000000e+00> : vector<8x32xf32>
    %103 = tpu.matmul %102, %26, %cst_34 {dimension_numbers = #tpu.dot_dimension_numbers<[1], [0], [0], [1], [0, 0, 1, 1], [], []>} : vector<8x4xbf16>, vector<4x32xbf16>, vector<8x32xf32> -> vector<8x32xf32>
    %104 = vector.broadcast %87 : vector<1x32xf32> to vector<8x32xf32>
    %105 = arith.mulf %103, %104 : vector<8x32xf32>
    %106 = arith.addf %80, %105 : vector<8x32xf32>
    %c24_i32_35 = arith.constant 24 : i32
    %107 = vector.broadcast %c24_i32_35 : i32 to vector<1x32xi32>
    %108 = arith.cmpi sge, %27, %107 : vector<1x32xi32>
    %c32_i32 = arith.constant 32 : i32
    %109 = vector.broadcast %c32_i32 : i32 to vector<1x32xi32>
    %110 = arith.cmpi slt, %27, %109 : vector<1x32xi32>
    %111 = arith.andi %108, %110 : vector<1x32xi1>
    %112 = arith.extui %111 : vector<1x32xi1> to vector<1x32xi32>
    %113 = arith.sitofp %112 : vector<1x32xi32> to vector<1x32xf32>
    %114 = arith.truncf %113 : vector<1x32xf32> to vector<1x32xbf16>
    %115 = vector.broadcast %114 : vector<1x32xbf16> to vector<8x32xbf16>
    %116 = arith.mulf %24, %115 : vector<8x32xbf16>
    %cst_36 = arith.constant dense<0.000000e+00> : vector<8x4xf32>
    %117 = tpu.matmul %116, %25, %cst_36 {dimension_numbers = #tpu.dot_dimension_numbers<[1], [1], [0], [0], [0, 0, 1, 0], [], []>} : vector<8x32xbf16>, vector<4x32xbf16>, vector<8x4xf32> -> vector<8x4xf32>
    %cst_37 = arith.constant dense<0xFF800000> : vector<8xf32>
    %118 = vector.multi_reduction <maximumf>, %117, %cst_37 [1] : vector<8x4xf32> to vector<8xf32>
    %119 = vector.shape_cast %118 : vector<8xf32> to vector<8x1xf32>
    %120 = vector.broadcast %119 : vector<8x1xf32> to vector<8x4xf32>
    %121 = arith.subf %117, %120 : vector<8x4xf32>
    %122 = math.exp %121 : vector<8x4xf32>
    %cst_38 = arith.constant dense<0.000000e+00> : vector<8xf32>
    %123 = vector.multi_reduction <add>, %122, %cst_38 [1] : vector<8x4xf32> to vector<8xf32>
    %124 = vector.shape_cast %123 : vector<8xf32> to vector<8x1xf32>
    %125 = tpu.reciprocal %124 {approx = true} : vector<8x1xf32> -> vector<8x1xf32>
    %126 = vector.broadcast %125 : vector<8x1xf32> to vector<8x4xf32>
    %127 = arith.mulf %122, %126 : vector<8x4xf32>
    %128 = arith.truncf %127 : vector<8x4xf32> to vector<8x4xbf16>
    %cst_39 = arith.constant dense<0.000000e+00> : vector<8x32xf32>
    %129 = tpu.matmul %128, %26, %cst_39 {dimension_numbers = #tpu.dot_dimension_numbers<[1], [0], [0], [1], [0, 0, 1, 1], [], []>} : vector<8x4xbf16>, vector<4x32xbf16>, vector<8x32xf32> -> vector<8x32xf32>
    %130 = vector.broadcast %113 : vector<1x32xf32> to vector<8x32xf32>
    %131 = arith.mulf %129, %130 : vector<8x32xf32>
    %132 = arith.addf %106, %131 : vector<8x32xf32>
    %133 = arith.truncf %132 : vector<8x32xf32> to vector<8x32xbf16>
    %c0_40 = arith.constant 0 : index
    %c0_41 = arith.constant 0 : index
    %134 = vector.load %arg9[%c0_40, %c0_41] : memref<32x32xbf16, #tpu.memory_space<vmem>>, vector<32x32xbf16>
    %cst_42 = arith.constant dense<0.000000e+00> : vector<8x32xf32>
    %135 = tpu.matmul %133, %134, %cst_42 {dimension_numbers = #tpu.dot_dimension_numbers<[1], [0], [0], [1], [0, 0, 1, 1], [], []>} : vector<8x32xbf16>, vector<32x32xbf16>, vector<8x32xf32> -> vector<8x32xf32>
    %c0_43 = arith.constant 0 : index
    %c0_44 = arith.constant 0 : index
    %136 = vector.load %arg10[%c0_43, %c0_44] : memref<1x32xf32, #tpu.memory_space<vmem>>, vector<1x32xf32>
    %137 = vector.broadcast %136 : vector<1x32xf32> to vector<8x32xf32>
    %138 = arith.addf %135, %137 : vector<8x32xf32>
    %139 = arith.addf %1, %138 : vector<8x32xf32>
    %c0_45 = arith.constant 0 : index
    %c0_46 = arith.constant 0 : index
    %140 = vector.load %arg11[%c0_45, %c0_46] : memref<1x32xf32, #tpu.memory_space<vmem>>, vector<1x32xf32>
    %c0_47 = arith.constant 0 : index
    %c0_48 = arith.constant 0 : index
    %141 = vector.load %arg12[%c0_47, %c0_48] : memref<1x32xf32, #tpu.memory_space<vmem>>, vector<1x32xf32>
    %cst_49 = arith.constant dense<0.000000e+00> : vector<8xf32>
    %142 = vector.multi_reduction <add>, %139, %cst_49 [1] : vector<8x32xf32> to vector<8xf32>
    %143 = vector.shape_cast %142 : vector<8xf32> to vector<8x1xf32>
    %cst_50 = arith.constant 3.200000e+01 : f32
    %144 = vector.broadcast %cst_50 : f32 to vector<8x1xf32>
    %145 = arith.divf %143, %144 : vector<8x1xf32>
    %146 = vector.broadcast %145 : vector<8x1xf32> to vector<8x32xf32>
    %147 = arith.subf %139, %146 : vector<8x32xf32>
    %148 = arith.mulf %147, %147 : vector<8x32xf32>
    %cst_51 = arith.constant dense<0.000000e+00> : vector<8xf32>
    %149 = vector.multi_reduction <add>, %148, %cst_51 [1] : vector<8x32xf32> to vector<8xf32>
    %150 = vector.shape_cast %149 : vector<8xf32> to vector<8x1xf32>
    %cst_52 = arith.constant 3.200000e+01 : f32
    %151 = vector.broadcast %cst_52 : f32 to vector<8x1xf32>
    %152 = arith.divf %150, %151 : vector<8x1xf32>
    %cst_53 = arith.constant 9.99999974E-6 : f32
    %153 = vector.broadcast %cst_53 : f32 to vector<8x1xf32>
    %154 = arith.addf %152, %153 : vector<8x1xf32>
    %155 = math.rsqrt %154 : vector<8x1xf32>
    %156 = vector.broadcast %155 : vector<8x1xf32> to vector<8x32xf32>
    %157 = arith.mulf %147, %156 : vector<8x32xf32>
    %158 = vector.broadcast %140 : vector<1x32xf32> to vector<8x32xf32>
    %159 = arith.mulf %157, %158 : vector<8x32xf32>
    %160 = vector.broadcast %141 : vector<1x32xf32> to vector<8x32xf32>
    %161 = arith.addf %159, %160 : vector<8x32xf32>
    %c0_54 = arith.constant 0 : index
    %c0_55 = arith.constant 0 : index
    %c0_56 = arith.constant 0 : index
    %162 = vector.load %arg13[%c0_54, %c0_55, %c0_56] : memref<1x8x32xf32, #tpu.memory_space<vmem>>, vector<1x8x32xf32>
    %163 = vector.shape_cast %162 : vector<1x8x32xf32> to vector<8x32xf32>
    %164 = vector.shape_cast %161 : vector<8x32xf32> to vector<1x8x32xf32>
    tpu.vector_store %arg13[%c0_54, %c0_55, %c0_56], %164 {strides = array<i32>} : memref<1x8x32xf32, #tpu.memory_space<vmem>>, vector<1x8x32xf32>,
    return
  }
  func.func @transform_0(%arg0: i32) -> (i32, i32, i32) {
    %c0_i32 = arith.constant 0 : i32
    %c0_i32_0 = arith.constant 0 : i32
    %c0_i32_1 = arith.constant 0 : i32
    return %arg0, %c0_i32, %c0_i32_0 : i32, i32, i32
  }
  func.func @transform_1(%arg0: i32) -> (i32, i32, i32) {
    %c0_i32 = arith.constant 0 : i32
    %c0_i32_0 = arith.constant 0 : i32
    %c0_i32_1 = arith.constant 0 : i32
    return %arg0, %c0_i32, %c0_i32_0 : i32, i32, i32
  }
  func.func @transform_2(%arg0: i32) -> (i32, i32) {
    %c0_i32 = arith.constant 0 : i32
    %c0_i32_0 = arith.constant 0 : i32
    %c0_i32_1 = arith.constant 0 : i32
    return %c0_i32, %c0_i32_0 : i32, i32
  }
  func.func @transform_3(%arg0: i32) -> (i32, i32) {
    %c0_i32 = arith.constant 0 : i32
    %c0_i32_0 = arith.constant 0 : i32
    %c0_i32_1 = arith.constant 0 : i32
    return %c0_i32, %c0_i32_0 : i32, i32
  }
  func.func @transform_4(%arg0: i32) -> (i32, i32) {
    %c0_i32 = arith.constant 0 : i32
    %c0_i32_0 = arith.constant 0 : i32
    %c0_i32_1 = arith.constant 0 : i32
    return %c0_i32, %c0_i32_0 : i32, i32
  }
  func.func @transform_5(%arg0: i32) -> (i32, i32) {
    %c0_i32 = arith.constant 0 : i32
    %c0_i32_0 = arith.constant 0 : i32
    %c0_i32_1 = arith.constant 0 : i32
    return %c0_i32, %c0_i32_0 : i32, i32
  }
  func.func @transform_6(%arg0: i32) -> (i32, i32) {
    %c0_i32 = arith.constant 0 : i32
    %c0_i32_0 = arith.constant 0 : i32
    %c0_i32_1 = arith.constant 0 : i32
    return %c0_i32, %c0_i32_0 : i32, i32
  }
  func.func @transform_7(%arg0: i32) -> (i32, i32) {
    %c0_i32 = arith.constant 0 : i32
    %c0_i32_0 = arith.constant 0 : i32
    %c0_i32_1 = arith.constant 0 : i32
    return %c0_i32, %c0_i32_0 : i32, i32
  }
  func.func @transform_8(%arg0: i32) -> (i32, i32) {
    %c0_i32 = arith.constant 0 : i32
    %c0_i32_0 = arith.constant 0 : i32
    %c0_i32_1 = arith.constant 0 : i32
    return %c0_i32, %c0_i32_0 : i32, i32
  }
  func.func @transform_9(%arg0: i32) -> (i32, i32) {
    %c0_i32 = arith.constant 0 : i32
    %c0_i32_0 = arith.constant 0 : i32
    %c0_i32_1 = arith.constant 0 : i32
    return %c0_i32, %c0_i32_0 : i32, i32
  }
  func.func @transform_10(%arg0: i32) -> (i32, i32) {
    %c0_i32 = arith.constant 0 : i32
    %c0_i32_0 = arith.constant 0 : i32
    %c0_i32_1 = arith.constant 0 : i32
    return %c0_i32, %c0_i32_0 : i32, i32
  }
  func.func @transform_11(%arg0: i32) -> (i32, i32) {
    %c0_i32 = arith.constant 0 : i32
    %c0_i32_0 = arith.constant 0 : i32
    %c0_i32_1 = arith.constant 0 : i32
    return %c0_i32, %c0_i32_0 : i32, i32
  }
  func.func @transform_12(%arg0: i32) -> (i32, i32, i32) {
    %c0_i32 = arith.constant 0 : i32
    %c0_i32_0 = arith.constant 0 : i32
    %c0_i32_1 = arith.constant 0 : i32
    return %arg0, %c0_i32, %c0_i32_0 : i32, i32, i32
  }
}

module attributes {stable_mosaic.version = 11 : i64} {
  func.func @_ln_matmul_add_kernel(%arg0: memref<8x32xf32, #tpu.memory_space<vmem>>, %arg1: memref<1x32xf32, #tpu.memory_space<vmem>>, %arg2: memref<1x32xf32, #tpu.memory_space<vmem>>, %arg3: memref<32x4xbf16, #tpu.memory_space<vmem>>, %arg4: memref<1x4xf32, #tpu.memory_space<vmem>>, %arg5: memref<8x4xf32, #tpu.memory_space<vmem>>) attributes {dimension_semantics = [], scalar_prefetch = 0 : i64, scratch_operands = 0 : i64, tpu.core_type = #tpu.core_type<tc>} {
    %c0 = arith.constant 0 : index
    %c0_0 = arith.constant 0 : index
    %0 = vector.load %arg0[%c0, %c0_0] : memref<8x32xf32, #tpu.memory_space<vmem>>, vector<8x32xf32>
    %c0_1 = arith.constant 0 : index
    %c0_2 = arith.constant 0 : index
    %1 = vector.load %arg1[%c0_1, %c0_2] : memref<1x32xf32, #tpu.memory_space<vmem>>, vector<1x32xf32>
    %c0_3 = arith.constant 0 : index
    %c0_4 = arith.constant 0 : index
    %2 = vector.load %arg2[%c0_3, %c0_4] : memref<1x32xf32, #tpu.memory_space<vmem>>, vector<1x32xf32>
    %cst = arith.constant dense<0.000000e+00> : vector<8xf32>
    %3 = vector.multi_reduction <add>, %0, %cst [1] : vector<8x32xf32> to vector<8xf32>
    %4 = vector.shape_cast %3 : vector<8xf32> to vector<8x1xf32>
    %cst_5 = arith.constant 3.200000e+01 : f32
    %5 = vector.broadcast %cst_5 : f32 to vector<8x1xf32>
    %6 = arith.divf %4, %5 : vector<8x1xf32>
    %7 = vector.broadcast %6 : vector<8x1xf32> to vector<8x32xf32>
    %8 = arith.subf %0, %7 : vector<8x32xf32>
    %9 = arith.mulf %8, %8 : vector<8x32xf32>
    %cst_6 = arith.constant dense<0.000000e+00> : vector<8xf32>
    %10 = vector.multi_reduction <add>, %9, %cst_6 [1] : vector<8x32xf32> to vector<8xf32>
    %11 = vector.shape_cast %10 : vector<8xf32> to vector<8x1xf32>
    %cst_7 = arith.constant 3.200000e+01 : f32
    %12 = vector.broadcast %cst_7 : f32 to vector<8x1xf32>
    %13 = arith.divf %11, %12 : vector<8x1xf32>
    %cst_8 = arith.constant 9.99999974E-6 : f32
    %14 = vector.broadcast %cst_8 : f32 to vector<8x1xf32>
    %15 = arith.addf %13, %14 : vector<8x1xf32>
    %16 = math.rsqrt %15 : vector<8x1xf32>
    %17 = vector.broadcast %16 : vector<8x1xf32> to vector<8x32xf32>
    %18 = arith.mulf %8, %17 : vector<8x32xf32>
    %19 = vector.broadcast %1 : vector<1x32xf32> to vector<8x32xf32>
    %20 = arith.mulf %18, %19 : vector<8x32xf32>
    %21 = vector.broadcast %2 : vector<1x32xf32> to vector<8x32xf32>
    %22 = arith.addf %20, %21 : vector<8x32xf32>
    %23 = arith.truncf %22 : vector<8x32xf32> to vector<8x32xbf16>
    %c0_9 = arith.constant 0 : index
    %c0_10 = arith.constant 0 : index
    %24 = vector.load %arg3[%c0_9, %c0_10] : memref<32x4xbf16, #tpu.memory_space<vmem>>, vector<32x4xbf16>
    %cst_11 = arith.constant dense<0.000000e+00> : vector<8x4xf32>
    %25 = tpu.matmul %23, %24, %cst_11 {dimension_numbers = #tpu.dot_dimension_numbers<[1], [0], [0], [1], [0, 0, 1, 1], [], []>} : vector<8x32xbf16>, vector<32x4xbf16>, vector<8x4xf32> -> vector<8x4xf32>
    %c0_12 = arith.constant 0 : index
    %c0_13 = arith.constant 0 : index
    %26 = vector.load %arg4[%c0_12, %c0_13] : memref<1x4xf32, #tpu.memory_space<vmem>>, vector<1x4xf32>
    %27 = vector.broadcast %26 : vector<1x4xf32> to vector<8x4xf32>
    %28 = arith.addf %25, %27 : vector<8x4xf32>
    %c0_14 = arith.constant 0 : index
    %c0_15 = arith.constant 0 : index
    %29 = vector.load %arg5[%c0_14, %c0_15] : memref<8x4xf32, #tpu.memory_space<vmem>>, vector<8x4xf32>
    tpu.vector_store %arg5[%c0_14, %c0_15], %28 {strides = array<i32>} : memref<8x4xf32, #tpu.memory_space<vmem>>, vector<8x4xf32>,
    return
  }
}

</mosaic_0001>

<bundles_post_ra>
// kernel: _lambda_.11
= control target key start
LH: loop header
LB: loop body
LE: loop exit
PB: predicated region body
PF: predicated region fallthrough
CT: control target
= control target key end

     0   :  { %vm31_vm0 = vcmask 1045504   ;;  %vm27_vm1 = vcmask 97280   ;;  %vm49_vm2 = vcmask 261120   ;;  %s106_s1 = inlined_call_operand.vmem [shape: bf16[12,32], index: 1, kind: input, shape index: {}]   ;;  %s107_s0 = inlined_call_operand.vmem [shape: f32[16,12], index: 0, kind: input, shape index: {}]   ;;  %s108_s2 = inlined_call_operand.vmem [shape: f32[16,32], index: 2, kind: input, shape index: {}]   ;;  %s109_s3 = inlined_call_operand.vmem [shape: f32[16,32], index: 3, kind: output, shape index: {}]  }
   0x1   :  { %v58_v0 = vld [vmem:[%s106_s1] sm:$0xf]  ;;  %v61_v1 = vld [vmem:[%s106_s1] sm:$0x30]  ;;  %v16_v4 = vld [vmem:[%s107_s0 + $0x8] sm:$0xff] }
   0x2   :  { %v15_v2 = vld [vmem:[%s107_s0] sm:$0xff]  ;;  %v59_v3 = vor.u32 %v61_v1, %v58_v0  ;;  %v21_v10 = vld [vmem:[%s108_s2 + $0x8] sm:$0xff] }
   0x3   :  { %v17_v6 = vpack.c.bf16 %v16_v4, %v15_v2  ;;  %v20_v7 = vld [vmem:[%s108_s2] sm:$0xff] }
   0x4   :  { %v33_v5 = vsel %vm31_vm0, %v59_v3, 0 }
   0x5   :  { %42 = vmatpush.bf16.msra.mxu0 %v33_v5 }
   0x8   :  { %60 = vmatmul.msk.bf16.vlgmr.msra.gmra.mxu0 %vm27_vm1, %v17_v6 }
  0x85   :  { %v44_v8 = vpop.f32.mrf.mxu0 }
  0x86   :  { %v45_v9 = vadd.f32 %v44_v8, %v20_v7 }
  0x88   :  { %50 = vst.msk [vmem:[%s109_s3] sm:$0xff] %vm49_vm2, %v45_v9 }
  0x8d   :  { %v46_v11 = vpop.f32.mrf.mxu0 }
  0x8e   :  { %v47_v12 = vadd.f32 %v46_v11, %v21_v10 }
  0x90   :  { %51 = vst.msk [vmem:[%s109_s3 + $0x8] sm:$0xff] %vm49_vm2, %v47_v12 }

// kernel: _lambda_.13
= control target key start
LH: loop header
LB: loop body
LE: loop exit
PB: predicated region body
PF: predicated region fallthrough
CT: control target
= control target key end

     0   :  { %vm61_vm0 = vcmask 261120   ;;  %vm187_vm11 = vcmask 523264   ;;  %s441_s1 = inlined_call_operand.vmem [shape: bf16[32,64], index: 1, kind: input, shape index: {}]   ;;  %s442_s0 = inlined_call_operand.vmem [shape: f32[16,32], index: 0, kind: input, shape index: {}]   ;;  %s443_s2 = inlined_call_operand.vmem [shape: f32[1,64], index: 2, kind: input, shape index: {}]   ;;  %s444_s4 = inlined_call_operand.vmem [shape: f32[1,32], index: 4, kind: input, shape index: {}]   ;;  %s445_s3 = inlined_call_operand.vmem [shape: bf16[64,32], index: 3, kind: input, shape index: {}]   ;;  %s446_s5 = inlined_call_operand.vmem [shape: f32[1,32], index: 5, kind: input, shape index: {}]   ;;  %s447_s6 = inlined_call_operand.vmem [shape: f32[1,32], index: 6, kind: input, shape index: {}]   ;;  %s448_s7 = inlined_call_operand.vmem [shape: f32[16,32], index: 7, kind: output, shape index: {}]  }
   0x1   :  { %v301_v0 = vld [vmem:[%s441_s1 + $0x8] sm:$0xff]  ;;  %v300_v1 = vld [vmem:[%s441_s1] sm:$0xff]  ;;  %v305_v20 = vld [vmem:[%s445_s3 + $0x18] sm:$0xff] }
   0x2   :  { %71 = vmatpush.bf16.msra.mxu0 %v301_v0  ;;  %v377_v2 = vld [vmem:[%s442_s0] sm:$0xff]  ;;  %v382_v3 = vld [vmem:[%s442_s0 + $0x8] sm:$0xff]  ;;  %195 = vmatpush.bf16.msra.mxu1 %v305_v20  ;;  %v304_v25 = vld [vmem:[%s445_s3 + $0x10] sm:$0xff] }
   0x3   :  { %v45_v4 = vpack.c.bf16 %v382_v3, %v377_v2  ;;  %v308_v5 = vld [vmem:[%s443_s2] ss:$0 sm:$0xff]  ;;  %v303_v32 = vld [vmem:[%s445_s3 + $0x8] sm:$0xff] }
   0x4   :  { %v302_v40 = vld [vmem:[%s445_s3] sm:$0xff] }
   0x6   :  { %72 = vmatpush.bf16.msra.mxu0 %v300_v1  ;;  %196 = vmatpush.bf16.msra.mxu1 %v304_v25  ;;  %v309_v25 = vld [vmem:[%s444_s4] ss:$0 sm:$0xff] }
   0x9   :  { %282 = vmatmul.msk.bf16.vlgmr.msra.gmra.mxu0 %vm61_vm0, %v45_v4 }
   0xa   :  { %197 = vmatpush.bf16.msra.mxu1 %v303_v32 }
   0xe   :  { %198 = vmatpush.bf16.msra.mxu1 %v302_v40 }
  0x86   :  { %v74_v6 = vpop.f32.mrf.mxu0 }
  0x87   :  { %v390_v7 = vadd.f32 %v308_v5, %v74_v6 }
  0x89   :  { %v393_v8 = vmul.f32 0.70710677, %v390_v7  ;;  %v79_v20 = vmul.f32 0.5, %v390_v7 }
  0x8b   :  { %v87_v9 = vand.u32 2147483647, %v393_v8  ;;  %vm83_vm9 = vcmp.ge.f32.partialorder %v393_v8, 0.0 }
  0x8d   :  { %v89_v10 = vmul.f32 0.3275911, %v87_v9  ;;  %v141_v34 = vsub.f32 0.0, %v87_v9 }
  0x8e   :  { %v76_v11 = vpop.f32.mrf.mxu0 }
  0x8f   :  { %v91_v12 = vadd.f32 1.0, %v89_v10  ;;  %v396_v13 = vadd.f32 %v308_v5, %v76_v11  ;;  %v143_v42 = vmul.f32 %v141_v34, %v87_v9  ;;  %v326_v10 = vmov -1.0  }
  0x90   :  { %v85_v11 = vsel %vm83_vm9, 1.0, %v326_v10 }
  0x91   :  { %312 = vrcp.f32 %v91_v12  ;;  %v399_v14 = vmul.f32 0.70710677, %v396_v13  ;;  %v104_v22 = vand.u32 2147483648, %v91_v12  ;;  %v102_v24 = vand.u32 2147483647, %v91_v12 }
  0x92   :  { %vm98_vm2 = vweird.f32 %v91_v12  ;;  %v145_v48 = vmul.f32 1.442695, %v143_v42 }
  0x93   :  { %v88_v15 = vand.u32 2147483647, %v399_v14  ;;  %v105_v27 = vor.u32 1.1754944e-38, %v104_v22  ;;  %vm103_vm4 = vcmp.eq.f32.partialorder %v102_v24, 8.507059e+37  ;;  %vm84_vm10 = vcmp.ge.f32.partialorder %v399_v14, 0.0 }
  0x95   :  { %v90_v16 = vmul.f32 0.3275911, %v88_v15  ;;  %v142_v50 = vsub.f32 0.0, %v88_v15 }
  0x97   :  { %v313_v17 = vpop.eup %312  ;;  %v92_v19 = vadd.f32 1.0, %v90_v16  ;;  %v144_v55 = vmul.f32 %v142_v50, %v88_v15 }
  0x98   :  { %v94_v18 = vmul.f32 %v313_v17, %v91_v12  ;;  %vm99_vm1 = vweird.f32 %v313_v17 }
  0x99   :  { %314 = vrcp.f32 %v92_v19  ;;  %vm100_vm3 = vmor %vm98_vm2, %vm99_vm1  ;;  %v119_v37 = vand.u32 2147483648, %v92_v19  ;;  %v117_v39 = vand.u32 2147483647, %v92_v19  ;;  %vm113_vm6 = vweird.f32 %v92_v19 }
  0x9a   :  { %v95_v21 = vsub.f32 1.0, %v94_v18  ;;  %316 = vpow2.f32 %v145_v48  ;;  %v147_v60 = vmul.f32 1.442695, %v144_v55 }
  0x9b   :  { %v120_v45 = vor.u32 1.1754944e-38, %v119_v37  ;;  %vm118_vm8 = vcmp.eq.f32.partialorder %v117_v39, 8.507059e+37 }
  0x9c   :  { %v96_v23 = vmul.f32 %v313_v17, %v95_v21  ;;  %318 = vpow2.f32 %v147_v60  ;;  %v80_v21 = vmul.f32 0.5, %v396_v13  ;;  %v310_v60 = vld [vmem:[%s446_s5] ss:$0 sm:$0xff] }
  0x9e   :  { %v97_v26 = vadd.f32 %v313_v17, %v96_v23 }
  0x9f   :  { %v315_v28 = vpop.eup %314 }
  0xa0   :  { %v101_v29 = vsel %vm100_vm3, %v313_v17, %v97_v26  ;;  %v109_v31 = vmul.f32 %v315_v28, %v92_v19  ;;  %vm114_vm5 = vweird.f32 %v315_v28  ;;  %v317_v62 = vpop.eup %316  ;;  %v86_v17 = vsel %vm84_vm10, 1.0, %v326_v10 }
  0xa1   :  { %v106_v30 = vsel %vm103_vm4, %v105_v27, %v101_v29  ;;  %vm115_vm7 = vmor %vm113_vm6, %vm114_vm5 }
  0xa2   :  { %v123_v33 = vmul.f32 1.0614054, %v106_v30  ;;  %v110_v35 = vsub.f32 1.0, %v109_v31  ;;  %v319_v9 = vpop.eup %318  ;;  %v327_v31 = vmov 32.0  }
  0xa3   :  { %320 = vrcp.f32 %v327_v31 }
  0xa4   :  { %v125_v36 = vadd.f32 -1.4531521, %v123_v33  ;;  %v111_v38 = vmul.f32 %v315_v28, %v110_v35 }
  0xa6   :  { %v127_v41 = vmul.f32 %v125_v36, %v106_v30  ;;  %v112_v43 = vadd.f32 %v315_v28, %v111_v38 }
  0xa8   :  { %v129_v44 = vadd.f32 1.4214138, %v127_v41  ;;  %v116_v46 = vsel %vm115_vm7, %v315_v28, %v112_v43 }
  0xa9   :  { %v121_v49 = vsel %vm118_vm8, %v120_v45, %v116_v46  ;;  %v321_v32 = vpop.eup %320 }
  0xaa   :  { %v131_v47 = vmul.f32 %v129_v44, %v106_v30  ;;  %v124_v51 = vmul.f32 1.0614054, %v121_v49  ;;  %v214_v33 = vmul.f32 32.0, %v321_v32  ;;  %vm218_vm12 = vweird.f32 %v321_v32 }
  0xac   :  { %v133_v52 = vadd.f32 -0.28449672, %v131_v47  ;;  %v126_v53 = vadd.f32 -1.4531521, %v124_v51  ;;  %v215_v34 = vsub.f32 1.0, %v214_v33 }
  0xae   :  { %v135_v54 = vmul.f32 %v133_v52, %v106_v30  ;;  %v128_v56 = vmul.f32 %v126_v53, %v121_v49  ;;  %v216_v35 = vmul.f32 %v321_v32, %v215_v34 }
  0xb0   :  { %v137_v57 = vadd.f32 0.2548296, %v135_v54  ;;  %v130_v58 = vadd.f32 1.4214138, %v128_v56  ;;  %v217_v36 = vadd.f32 %v321_v32, %v216_v35 }
  0xb2   :  { %v139_v59 = vmul.f32 %v137_v57, %v106_v30  ;;  %v132_v61 = vmul.f32 %v130_v58, %v121_v49  ;;  %v219_v37 = vsel %vm218_vm12, %v321_v32, %v217_v36 }
  0xb4   :  { %v149_v63 = vmul.f32 %v317_v62, %v139_v59  ;;  %v134_v0 = vadd.f32 -0.28449672, %v132_v61 }
  0xb6   :  { %v136_v1 = vmul.f32 %v134_v0, %v121_v49  ;;  %v151_v4 = vsub.f32 1.0, %v149_v63  ;;  %v311_v63 = vld [vmem:[%s447_s6] ss:$0 sm:$0xff] }
  0xb8   :  { %v138_v5 = vadd.f32 0.2548296, %v136_v1  ;;  %v153_v12 = vmul.f32 %v151_v4, %v85_v11 }
  0xba   :  { %v140_v6 = vmul.f32 %v138_v5, %v121_v49  ;;  %v155_v18 = vadd.f32 1.0, %v153_v12 }
  0xbc   :  { %v150_v15 = vmul.f32 %v319_v9, %v140_v6  ;;  %v157_v8 = vmul.f32 %v155_v18, %v79_v20 }
  0xbe   :  { %v152_v16 = vsub.f32 1.0, %v150_v15 }
  0xc0   :  { %v154_v19 = vmul.f32 %v152_v16, %v86_v17 }
  0xc2   :  { %v156_v22 = vadd.f32 1.0, %v154_v19 }
  0xc4   :  { %v158_v23 = vmul.f32 %v156_v22, %v80_v21 }
  0xc6   :  { %v159_v24 = vpack.c.bf16 %v158_v23, %v157_v8 }
  0xc8   :  { %299 = vmatmul.msk.bf16.vlgmr.msra.gmra.mxu1 %vm187_vm11, %v159_v24 }
 0x145   :  { %v200_v14 = vpop.f32.mrf.mxu1 }
 0x146   :  { %v201_v26 = vadd.f32 %v309_v25, %v200_v14 }
 0x148   :  { %v205_v27 = vadd.f32 %v201_v26, %v377_v2 }
 0x14a   :  { %v207_v28 = vsel %vm61_vm0, %v205_v27, 0.0 }
 0x14b   :  { %208 = vadd.xlane.f32.xlu0 %v207_v28 }
 0x14d   :  { %v202_v7 = vpop.f32.mrf.mxu1 }
 0x14e   :  { %v203_v29 = vadd.f32 %v309_v25, %v202_v7 }
 0x150   :  { %v206_v13 = vadd.f32 %v203_v29, %v382_v3 }
 0x152   :  { %v210_v30 = vsel %vm61_vm0, %v206_v13, 0.0 }
 0x153   :  { %211 = vadd.xlane.f32.xlu0 %v210_v30 }
 0x1be   :  { %v209_v2 = vpop.xlane.xlu0 %208 }
 0x1bf   :  { %v220_v38 = vmul.f32 %v219_v37, %v209_v2 }
 0x1c1   :  { %v222_v39 = vsub.f32 %v205_v27, %v220_v38 }
 0x1c3   :  { %v224_v40 = vmul.f32 %v222_v39, %v222_v39 }
 0x1c5   :  { %v226_v41 = vsel %vm61_vm0, %v224_v40, 0.0 }
 0x1c6   :  { %227 = vadd.xlane.f32.xlu1 %v226_v41  ;;  %v212_v3 = vpop.xlane.xlu0 %211 }
 0x1c7   :  { %v221_v42 = vmul.f32 %v219_v37, %v212_v3 }
 0x1c9   :  { %v223_v43 = vsub.f32 %v206_v13, %v221_v42 }
 0x1cb   :  { %v225_v44 = vmul.f32 %v223_v43, %v223_v43 }
 0x1cd   :  { %v229_v45 = vsel %vm61_vm0, %v225_v44, 0.0 }
 0x1ce   :  { %230 = vadd.xlane.f32.xlu1 %v229_v45 }
 0x239   :  { %v228_v46 = vpop.xlane.xlu1 %227 }
 0x23a   :  { %v232_v47 = vmul.f32 %v228_v46, %v219_v37 }
 0x23c   :  { %v234_v48 = vadd.f32 1e-05, %v232_v47 }
 0x23e   :  { %322 = vrsqrt.f32 %v234_v48  ;;  %vm242_vm14 = vweird.f32 %v234_v48 }
 0x241   :  { %v231_v49 = vpop.xlane.xlu1 %230 }
 0x242   :  { %v233_v50 = vmul.f32 %v231_v49, %v219_v37 }
 0x244   :  { %v323_v51 = vpop.eup %322  ;;  %v235_v52 = vadd.f32 1e-05, %v233_v50 }
 0x245   :  { %v237_v53 = vmul.f32 %v323_v51, %v234_v48  ;;  %vm243_vm13 = vweird.f32 %v323_v51 }
 0x246   :  { %324 = vrsqrt.f32 %v235_v52  ;;  %vm244_vm15 = vmor %vm242_vm14, %vm243_vm13  ;;  %vm252_vm2 = vweird.f32 %v235_v52 }
 0x247   :  { %v238_v54 = vmul.f32 %v323_v51, %v237_v53 }
 0x249   :  { %v239_v55 = vmul.f32 0.5, %v238_v54 }
 0x24b   :  { %v240_v56 = vsub.f32 1.5, %v239_v55 }
 0x24c   :  { %v325_v57 = vpop.eup %324 }
 0x24d   :  { %v241_v58 = vmul.f32 %v323_v51, %v240_v56  ;;  %v247_v59 = vmul.f32 %v325_v57, %v235_v52  ;;  %vm253_vm1 = vweird.f32 %v325_v57 }
 0x24e   :  { %vm254_vm3 = vmor %vm252_vm2, %vm253_vm1 }
 0x24f   :  { %v245_v61 = vsel %vm244_vm15, %v323_v51, %v241_v58  ;;  %v248_v62 = vmul.f32 %v325_v57, %v247_v59 }
 0x250   :  { %v256_v0 = vmul.f32 %v245_v61, %v222_v39 }
 0x251   :  { %v249_v1 = vmul.f32 0.5, %v248_v62 }
 0x252   :  { %v261_v4 = vmul.f32 %v310_v60, %v256_v0 }
 0x253   :  { %v250_v5 = vsub.f32 1.5, %v249_v1 }
 0x254   :  { %v266_v6 = vadd.f32 %v311_v63, %v261_v4 }
 0x255   :  { %v251_v9 = vmul.f32 %v325_v57, %v250_v5 }
 0x256   :  { %268 = vst.msk [vmem:[%s448_s7] sm:$0xff] %vm61_vm0, %v266_v6 }
 0x257   :  { %v255_v10 = vsel %vm254_vm3, %v325_v57, %v251_v9 }
 0x258   :  { %v257_v11 = vmul.f32 %v255_v10, %v223_v43 }
 0x25a   :  { %v262_v12 = vmul.f32 %v310_v60, %v257_v11 }
 0x25c   :  { %v267_v15 = vadd.f32 %v311_v63, %v262_v12 }
 0x25e   :  { %269 = vst.msk [vmem:[%s448_s7 + $0x8] sm:$0xff] %vm61_vm0, %v267_v15 }

// kernel: _lambda_.12
= control target key start
LH: loop header
LB: loop body
LE: loop exit
PB: predicated region body
PF: predicated region fallthrough
CT: control target
= control target key end

     0   :  { %s1092_s21 = smov 0   ;;  %s1204_s0 = inlined_call_operand.vmem [shape: f32[2,8,32], index: 0, kind: input, shape index: {}, may-alias: {0,1}]   ;;  %s1205_s1 = inlined_call_operand.vmem [shape: f32[2,8,32], index: 1, kind: input, shape index: {}, may-alias: {0,1}]   ;;  %s1206_s2 = inlined_call_operand.vmem [shape: bf16[32,32], index: 2, kind: input, shape index: {}]   ;;  %s1207_s3 = inlined_call_operand.vmem [shape: f32[1,32], index: 3, kind: input, shape index: {}]   ;;  %s1208_s4 = inlined_call_operand.vmem [shape: bf16[32,32], index: 4, kind: input, shape index: {}]   ;;  %s1209_s5 = inlined_call_operand.vmem [shape: f32[1,32], index: 5, kind: input, shape index: {}]   ;;  %s1210_s6 = inlined_call_operand.vmem [shape: bf16[32,32], index: 6, kind: input, shape index: {}]   ;;  %s1211_s7 = inlined_call_operand.vmem [shape: f32[1,32], index: 7, kind: input, shape index: {}]   ;;  %s1212_s8 = inlined_call_operand.vmem [shape: bf16[32,32], index: 8, kind: input, shape index: {}]   ;;  %s1213_s9 = inlined_call_operand.vmem [shape: f32[1,32], index: 9, kind: input, shape index: {}]   ;;  %s1214_s10 = inlined_call_operand.vmem [shape: f32[1,32], index: 10, kind: input, shape index: {}]   ;;  %s1215_s11 = inlined_call_operand.vmem [shape: f32[1,32], index: 11, kind: input, shape index: {}]   ;;  %s1216_s12 = inlined_call_operand.vmem [shape: f32[2,8,32], index: 12, kind: output, shape index: {}]  }
   0x1 LB: > { %s915_s22 = sadd.s32 4294967295, %s1023_s21   ;;  %p919_p0 = scmp.ge.s32.totalorder %s1023_s21, 1  ;;  %s1023_s21 = sphi %s1092_s21, %s22_s21  }
   0x2   : > { %p370_p1 = scmp.lt.s32.totalorder %s1023_s21, 3 }
   0x4   : > { %p371_p2 = pnand %p919_p0, %p370_p1 }
   0x5   : > { %p414_p3 = scmp.lt.s32.totalorder (!%p371_p2), %s915_s22, 1 }
   0x6   : > { %374 = sbr.rel (%p371_p2) target bundleno = 1103 (0x44f), region = 68 }
   0xb   : > { %v974_v0 = vld [vmem:[%s1206_s2 + $0x8] sm:$0xff]  ;;  %v973_v2 = vld [vmem:[%s1206_s2] sm:$0xff]  ;;  %s1218_s22 = smov (!%p414_p3, %s915_s22), 1  ;;  %vm450_vm0 = vcmask 261120   ;;  %v541_v8 = vlaneseq  ;;  %v1025_v20 = vmov 0.0   ;;  %vm572_vm11 = vcmask 64512  }
   0xc   : > { %v976_v1 = vld [vmem:[%s1208_s4 + $0x8] sm:$0xff]  ;;  %460 = vmatpush.bf16.msra.mxu0 %v974_v0  ;;  %v975_v3 = vld [vmem:[%s1208_s4] sm:$0xff]  ;;  %s1112_s13 = sshll.u32 %s1218_s22, 3  ;;  %vm588_vm12 = vcmask 1043456  }
   0xd   : > { %497 = vmatpush.bf16.msra.mxu1 %v976_v1  ;;  %s417_s16 = scalar_lea.vmem %s1204_s0, %s1112_s13  ;;  %s421_s19 = scalar_lea.vmem %s1205_s1, %s1112_s13  ;;  %v542_v9 = vand.u32 127, %v541_v8  ;;  %v991_v10 = vld [vmem:[%s1207_s3] ss:$0 sm:$0xff]  ;;  %v978_v36 = vld [vmem:[%s1210_s6 + $0x8] sm:$0xff] }
   0xe   : > { %v1118_v4 = vld [vmem:[%s417_s16] sm:$0xff]  ;;  %530 = vmatpush.bf16.msra.mxu2 %v978_v36  ;;  %s425_s27 = scalar_lea.vmem %s1216_s12, %s1112_s13 }
   0xf   : > { %v429_v5 = vpack.c.bf16 %v1118_v4, %v1118_v4  ;;  %v428_v6 = vld [vmem:[%s421_s19] sm:$0xff]  ;;  %vm607_vm1 = vcmp.ge.s32.totalorder %v542_v9, 8  ;;  %vm608_vm2 = vcmp.lt.s32.totalorder %v542_v9, 16  ;;  %vm544_vm3 = vcmp.lt.s32.totalorder %v542_v9, 8 }
  0x10   : > { %461 = vmatpush.bf16.msra.mxu0 %v973_v2  ;;  %v467_v7 = vpack.c.bf16 %v428_v6, %v428_v6  ;;  %v992_v11 = vld [vmem:[%s1209_s5] ss:$0 sm:$0xff]  ;;  %vm609_vm4 = vmand %vm607_vm1, %vm608_vm2  ;;  %v1135_v21 = vsel %vm544_vm3, 1.0, %v1025_v20  ;;  %vm662_vm5 = vcmp.ge.s32.totalorder %v542_v9, 16  ;;  %vm663_vm6 = vcmp.lt.s32.totalorder %v542_v9, 24 }
  0x11   : > { %498 = vmatpush.bf16.msra.mxu1 %v975_v3  ;;  %v1137_v22 = vsel %vm609_vm4, 1.0, %v1025_v20  ;;  %vm717_vm7 = vcmp.ge.s32.totalorder %v542_v9, 24  ;;  %vm718_vm8 = vcmp.lt.s32.totalorder %v542_v9, 32  ;;  %vm664_vm9 = vmand %vm662_vm5, %vm663_vm6  ;;  %v977_v38 = vld [vmem:[%s1210_s6] sm:$0xff] }
  0x12   : > { %vm719_vm10 = vmand %vm717_vm7, %vm718_vm8  ;;  %v1143_v30 = vsel %vm664_vm9, 1.0, %v1025_v20  ;;  %531 = vmatpush.bf16.msra.mxu2 %v977_v38  ;;  %v993_v60 = vld [vmem:[%s1211_s7] ss:$0 sm:$0xff] }
  0x13   : > { %931 = vmatmul.msk.bf16.vlgmr.msra.gmra.mxu0 %vm450_vm0, %v429_v5  ;;  %v1145_v31 = vsel %vm719_vm10, 1.0, %v1025_v20 }
  0x14   : > { %940 = vmatmul.msk.bf16.vlgmr.msra.gmra.mxu1 %vm450_vm0, %v467_v7 }
  0x15   : > { %949 = vmatmul.msk.bf16.vlgmr.msra.gmra.mxu2 %vm450_vm0, %v467_v7 }
  0x90   : > { %v463_v12 = vpop.f32.mrf.mxu0 }
  0x91   : > { %v464_v13 = vadd.f32 %v991_v10, %v463_v12  ;;  %v500_v14 = vpop.f32.mrf.mxu1 }
  0x92   : > { %v501_v15 = vadd.f32 %v992_v11, %v500_v14 }
  0x93   : > { %v537_v16 = vmul.f32 0.35355338, %v464_v13 }
  0x94   : > { %v539_v17 = vpack.c.bf16 %v501_v15, %v501_v15 }
  0x95   : > { %v538_v18 = vpack.c.bf16 %v537_v16, %v537_v16 }
  0x96   : > { %v557_v19 = vsel %vm450_vm0, %v539_v17, 0 }
  0x97   : > { %v549_v23 = vunpack.c.l.bf16 %v538_v18  ;;  %566 = vmatpush.bf16.xpose.msra.mxu3 %v557_v19  ;;  %626 = vmatpush.bf16.xpose.msrb.mxu1 %v557_v19 }
  0x98   : > { %v465_v24 = vpop.f32.mrf.mxu0  ;;  %v533_v0 = vpop.f32.mrf.mxu2 }
  0x99   : > { %v502_v25 = vpop.f32.mrf.mxu1  ;;  %v551_v26 = vmul.f32 %v1135_v21, %v549_v23  ;;  %v614_v27 = vmul.f32 %v1137_v22, %v549_v23  ;;  %v669_v32 = vmul.f32 %v1143_v30, %v549_v23  ;;  %v724_v33 = vmul.f32 %v1145_v31, %v549_v23 }
  0x9a   : > { %v534_v1 = vadd.f32 %v993_v60, %v533_v0 }
  0x9b   : > { %v552_v28 = vpack.c.bf16 %v551_v26, %v551_v26  ;;  %v615_v29 = vpack.c.bf16 %v614_v27, %v614_v27  ;;  %v670_v34 = vpack.c.bf16 %v669_v32, %v669_v32  ;;  %v725_v35 = vpack.c.bf16 %v724_v33, %v724_v33  ;;  %v980_v33 = vld [vmem:[%s1212_s8 + $0x8] sm:$0xff] }
  0x9c   : > { %v540_v3 = vpack.c.bf16 %v534_v1, %v534_v1 }
  0x9e   : > { %951 = vmatmul.msk.bf16.vlgmr.msra.gmra.mxu3 %vm450_vm0, %v552_v28  ;;  %954 = vmatmul.msk.bf16.vlgmr.msrb.gmra.mxu1 %vm450_vm0, %v615_v29  ;;  %v590_v6 = vsel %vm588_vm12, %v540_v3, 0 }
  0x9f   : > { %681 = vmatpush.bf16.xpose.msrb.mxu3 %v557_v19  ;;  %736 = vmatpush.bf16.xpose.msra.mxu1 %v557_v19 }
  0xa0   : > { %599 = vmatpush.bf16.msrb.mxu0 %v590_v6  ;;  %654 = vmatpush.bf16.msrb.mxu2 %v590_v6  ;;  %v535_v10 = vpop.f32.mrf.mxu2 }
  0xa1   : > { %v995_v10 = vld [vmem:[%s1214_s10] ss:$0 sm:$0xff] }
  0xa4   : > { %709 = vmatpush.bf16.msra.mxu0 %v590_v6  ;;  %764 = vmatpush.bf16.msra.mxu2 %v590_v6 }
  0xa7   : > { %802 = vmatpush.bf16.msra.mxu3 %v980_v33 }
  0xae   : > { %957 = vmatmul.msk.bf16.vlgmr.msrb.gmra.mxu3 %vm450_vm0, %v670_v34  ;;  %960 = vmatmul.msk.bf16.vlgmr.msra.gmra.mxu1 %vm450_vm0, %v725_v35  ;;  %v979_v34 = vld [vmem:[%s1212_s8] sm:$0xff] }
  0xaf   : > { %803 = vmatpush.bf16.msra.mxu3 %v979_v34 }
 0x11b   : > { %v628_v37 = vpop.f32.mrf.mxu1 }
 0x11c   : > { %v632_v39 = vsel %vm572_vm11, %v628_v37, -inf }
 0x11d   : > { %633 = vmax.xlane.f32.xlu0 %v632_v39 }
 0x121   : > { %v568_v40 = vpop.f32.mrf.mxu3 }
 0x122   : > { %v573_v42 = vsel %vm572_vm11, %v568_v40, -inf }
 0x123   : > { %v630_v41 = vpop.f32.mrf.mxu1 }
 0x125   : > { %574 = vmax.xlane.f32.xlu0 %v573_v42 }
 0x129   : > { %v570_v43 = vpop.f32.mrf.mxu3 }
 0x12b   : > { %v738_v44 = vpop.f32.mrf.mxu1 }
 0x12c   : > { %v742_v45 = vsel %vm572_vm11, %v738_v44, -inf }
 0x12d   : > { %743 = vmax.xlane.f32.xlu1 %v742_v45 }
 0x131   : > { %v683_v46 = vpop.f32.mrf.mxu3 }
 0x132   : > { %v687_v48 = vsel %vm572_vm11, %v683_v46, -inf }
 0x133   : > { %v740_v47 = vpop.f32.mrf.mxu1 }
 0x135   : > { %688 = vmax.xlane.f32.xlu1 %v687_v48 }
 0x139   : > { %v685_v49 = vpop.f32.mrf.mxu3 }
 0x190   : > { %v634_v50 = vpop.xlane.xlu0 %633 }
 0x191   : > { %v635_v51 = vsub.f32 %v628_v37, %v634_v50 }
 0x193   : > { %v636_v52 = vmul.f32 1.442695, %v635_v51 }
 0x195   : > { %997 = vpow2.f32 %v636_v52 }
 0x198   : > { %v575_v53 = vpop.xlane.xlu0 %574 }
 0x199   : > { %v576_v54 = vsub.f32 %v568_v40, %v575_v53 }
 0x19b   : > { %v998_v55 = vpop.eup %997  ;;  %v577_v56 = vmul.f32 1.442695, %v576_v54 }
 0x19c   : > { %v638_v57 = vsel %vm572_vm11, %v998_v55, 0.0 }
 0x19d   : > { %999 = vpow2.f32 %v577_v56  ;;  %639 = vadd.xlane.f32.xlu2 %v638_v57 }
 0x1a0   : > { %v744_v58 = vpop.xlane.xlu1 %743 }
 0x1a1   : > { %v745_v59 = vsub.f32 %v738_v44, %v744_v58 }
 0x1a3   : > { %v1000_v61 = vpop.eup %999  ;;  %v746_v62 = vmul.f32 1.442695, %v745_v59 }
 0x1a4   : > { %v579_v63 = vsel %vm572_vm11, %v1000_v61, 0.0 }
 0x1a5   : > { %1001 = vpow2.f32 %v746_v62  ;;  %580 = vadd.xlane.f32.xlu2 %v579_v63 }
 0x1a8   : > { %v689_v2 = vpop.xlane.xlu1 %688 }
 0x1a9   : > { %v690_v5 = vsub.f32 %v683_v46, %v689_v2 }
 0x1ab   : > { %v1002_v7 = vpop.eup %1001  ;;  %v691_v8 = vmul.f32 1.442695, %v690_v5 }
 0x1ac   : > { %v748_v9 = vsel %vm572_vm11, %v1002_v7, 0.0 }
 0x1ad   : > { %1003 = vpow2.f32 %v691_v8  ;;  %749 = vadd.xlane.f32.xlu0 %v748_v9 }
 0x1b3   : > { %v1004_v11 = vpop.eup %1003 }
 0x1b4   : > { %v693_v12 = vsel %vm572_vm11, %v1004_v11, 0.0 }
 0x1b5   : > { %694 = vadd.xlane.f32.xlu1 %v693_v12  ;;  %v996_v12 = vld [vmem:[%s1215_s11] ss:$0 sm:$0xff] }
 0x210   : > { %v640_v13 = vpop.xlane.xlu2 %639 }
 0x211   : > { %1005 = vrcp.f32 %v640_v13 }
 0x217   : > { %v1006_v14 = vpop.eup %1005 }
 0x218   : > { %v642_v15 = vmul.f32 %v1006_v14, %v998_v55  ;;  %v581_v16 = vpop.xlane.xlu2 %580 }
 0x219   : > { %1007 = vrcp.f32 %v581_v16 }
 0x21a   : > { %v643_v17 = vpack.c.bf16 %v642_v15, %v642_v15 }
 0x21c   : > { %955 = vmatmul.msk.bf16.vlgmr.msrb.gmra.mxu2 %vm572_vm11, %v643_v17 }
 0x21f   : > { %v1008_v18 = vpop.eup %1007 }
 0x220   : > { %v583_v19 = vmul.f32 %v1008_v18, %v1000_v61  ;;  %v750_v20 = vpop.xlane.xlu0 %749 }
 0x221   : > { %1009 = vrcp.f32 %v750_v20 }
 0x222   : > { %v584_v23 = vpack.c.bf16 %v583_v19, %v583_v19 }
 0x224   : > { %952 = vmatmul.msk.bf16.vlgmr.msrb.gmra.mxu0 %vm572_vm11, %v584_v23 }
 0x227   : > { %v1010_v24 = vpop.eup %1009 }
 0x228   : > { %v752_v25 = vmul.f32 %v1010_v24, %v1002_v7  ;;  %v695_v26 = vpop.xlane.xlu1 %694 }
 0x229   : > { %1011 = vrcp.f32 %v695_v26 }
 0x22a   : > { %v753_v27 = vpack.c.bf16 %v752_v25, %v752_v25 }
 0x22c   : > { %961 = vmatmul.msk.bf16.vlgmr.msra.gmra.mxu2 %vm572_vm11, %v753_v27 }
 0x22f   : > { %v1012_v28 = vpop.eup %1011 }
 0x230   : > { %v697_v29 = vmul.f32 %v1012_v28, %v1004_v11 }
 0x232   : > { %v698_v32 = vpack.c.bf16 %v697_v29, %v697_v29 }
 0x234   : > { %958 = vmatmul.msk.bf16.vlgmr.msra.gmra.mxu0 %vm572_vm11, %v698_v32 }
 0x29f   : > { %v656_v35 = vpop.f32.mrf.mxu2 }
 0x2a0   : > { %v660_v41 = vmul.f32 %v1137_v22, %v656_v35 }
 0x2a1   : > { %v601_v36 = vpop.f32.mrf.mxu0 }
 0x2a2   : > { %v605_v39 = vmul.f32 %v1135_v21, %v601_v36  ;;  %v994_v21 = vld [vmem:[%s1213_s9] ss:$0 sm:$0xff] }
 0x2a4   : > { %v661_v43 = vadd.f32 %v660_v41, %v605_v39 }
 0x2a7   : > { %v658_v37 = vpop.f32.mrf.mxu2 }
 0x2a9   : > { %v603_v38 = vpop.f32.mrf.mxu0 }
 0x2af   : > { %v766_v40 = vpop.f32.mrf.mxu2 }
 0x2b0   : > { %v770_v45 = vmul.f32 %v1145_v31, %v766_v40  ;;  %v1026_v31 = vmov 32.0  }
 0x2b1   : > { %v711_v42 = vpop.f32.mrf.mxu0  ;;  %1013 = vrcp.f32 %v1026_v31 }
 0x2b2   : > { %v715_v44 = vmul.f32 %v1143_v30, %v711_v42 }
 0x2b4   : > { %v716_v46 = vadd.f32 %v715_v44, %v661_v43 }
 0x2b6   : > { %v771_v47 = vadd.f32 %v770_v45, %v716_v46 }
 0x2b7   : > { %v768_v48 = vpop.f32.mrf.mxu2  ;;  %v1014_v54 = vpop.eup %1013 }
 0x2b8   : > { %v772_v49 = vpack.c.bf16 %v771_v47, %v771_v47  ;;  %v816_v55 = vmul.f32 32.0, %v1014_v54  ;;  %vm820_vm13 = vweird.f32 %v1014_v54 }
 0x2b9   : > { %v713_v50 = vpop.f32.mrf.mxu0 }
 0x2ba   : > { %970 = vmatmul.msk.bf16.vlgmr.msra.gmra.mxu3 %vm450_vm0, %v772_v49  ;;  %v817_v56 = vsub.f32 1.0, %v816_v55 }
 0x2bc   : > { %v818_v57 = vmul.f32 %v1014_v54, %v817_v56 }
 0x2be   : > { %v819_v58 = vadd.f32 %v1014_v54, %v818_v57 }
 0x2c0   : > { %v821_v59 = vsel %vm820_vm13, %v1014_v54, %v819_v58 }
 0x33d   : > { %v805_v51 = vpop.f32.mrf.mxu3 }
 0x33e   : > { %v806_v52 = vadd.f32 %v994_v21, %v805_v51 }
 0x340   : > { %v809_v22 = vadd.f32 %v806_v52, %v1118_v4 }
 0x342   : > { %v812_v53 = vsel %vm450_vm0, %v809_v22, 0.0 }
 0x343   : > { %813 = vadd.xlane.f32.xlu2 %v812_v53 }
 0x345   : > { %v807_v30 = vpop.f32.mrf.mxu3 }
 0x3b6   : > { %v814_v60 = vpop.xlane.xlu2 %813 }
 0x3b7   : > { %v822_v61 = vmul.f32 %v821_v59, %v814_v60 }
 0x3b9   : > { %v823_v62 = vsub.f32 %v809_v22, %v822_v61 }
 0x3bb   : > { %v824_v63 = vmul.f32 %v823_v62, %v823_v62 }
 0x3bd   : > { %v825_v0 = vsel %vm450_vm0, %v824_v63, 0.0 }
 0x3be   : > { %826 = vadd.xlane.f32.xlu0 %v825_v0 }
 0x431   : > { %v827_v4 = vpop.xlane.xlu0 %826 }
 0x432   : > { %v828_v1 = vmul.f32 %v827_v4, %v821_v59 }
 0x434   : > { %v829_v2 = vadd.f32 1e-05, %v828_v1 }
 0x436   : > { %1015 = vrsqrt.f32 %v829_v2  ;;  %vm836_vm15 = vweird.f32 %v829_v2 }
 0x43c   : > { %v1016_v3 = vpop.eup %1015 }
 0x43d   : > { %v831_v5 = vmul.f32 %v1016_v3, %v829_v2  ;;  %vm837_vm14 = vweird.f32 %v1016_v3 }
 0x43e   : > { %vm838_vm1 = vmor %vm836_vm15, %vm837_vm14 }
 0x43f   : > { %v832_v6 = vmul.f32 %v1016_v3, %v831_v5 }
 0x441   : > { %v833_v7 = vmul.f32 0.5, %v832_v6 }
 0x443   : > { %v834_v8 = vsub.f32 1.5, %v833_v7 }
 0x445   : > { %v835_v9 = vmul.f32 %v1016_v3, %v834_v8 }
 0x447   : > { %v839_v11 = vsel %vm838_vm1, %v1016_v3, %v835_v9 }
 0x448   : > { %v840_v13 = vmul.f32 %v839_v11, %v823_v62 }
 0x44a   : > { %v844_v14 = vmul.f32 %v995_v10, %v840_v13 }
 0x44c   : > { %v848_v15 = vadd.f32 %v996_v12, %v844_v14 }
 0x44e   : > { %849 = vst.msk [vmem:[%s425_s27] sm:$0xff] %vm450_vm0, %v848_v15 }
 0x44f PF: > { %s22_s21 = sadd.s32 1, %s1023_s21  }
 0x450   : > { %p19_p4 = scmp.ge.s32.totalorder %s22_s21, 4  }
 0x452   :  { %21 = sbr.rel (!%p19_p4) target bundleno = 1 (0x1), region = 101 }

// kernel: _lambda_.14
= control target key start
LH: loop header
LB: loop body
LE: loop exit
PB: predicated region body
PF: predicated region fallthrough
CT: control target
= control target key end

     0   :  { %vm76_vm0 = vcmask 785408   ;;  %v214_v9 = vmov 16.0   ;;  %vm94_vm1 = vcmask 261120   ;;  %s290_s1 = inlined_call_operand.vmem [shape: bf16[96,32], index: 1, kind: input, shape index: {}]   ;;  %s291_s2 = inlined_call_operand.vmem [shape: f32[1,32], index: 2, kind: input, shape index: {}]   ;;  %s292_s0 = inlined_call_operand.vmem [shape: f32[16,96], index: 0, kind: input, shape index: {}]   ;;  %s293_s3 = inlined_call_operand.vmem [shape: f32[1,32], index: 3, kind: input, shape index: {}]   ;;  %s294_s4 = inlined_call_operand.vmem [shape: f32[1,32], index: 4, kind: input, shape index: {}]   ;;  %s295_s5 = inlined_call_operand.vmem [shape: f32[16,32], index: 5, kind: output, shape index: {}]  }
   0x1   :  { %v201_v0 = vld [vmem:[%s290_s1 + $0x28] sm:$0xff]  ;;  %v200_v1 = vld [vmem:[%s290_s1 + $0x20] sm:$0xff]  ;;  %v199_v2 = vld [vmem:[%s290_s1 + $0x18] sm:$0xff]  ;;  %206 = vrcp.f32 %v214_v9 }
   0x2   :  { %82 = vmatpush.bf16.msra.mxu0 %v201_v0  ;;  %v198_v3 = vld [vmem:[%s290_s1 + $0x10] sm:$0xff]  ;;  %v197_v4 = vld [vmem:[%s290_s1 + $0x8] sm:$0xff]  ;;  %v196_v5 = vld [vmem:[%s290_s1] sm:$0xff] }
   0x3   :  { %v21_v6 = vld [vmem:[%s292_s0] sm:$0xff]  ;;  %v22_v7 = vld [vmem:[%s292_s0 + $0x8] sm:$0xff] }
   0x4   :  { %v23_v8 = vpack.c.bf16 %v22_v7, %v21_v6  ;;  %v203_v11 = vld [vmem:[%s291_s2] ss:$0 sm:$0xff] }
   0x5   :  { %v204_v52 = vld [vmem:[%s293_s3] ss:$0 sm:$0xff] }
   0x6   :  { %83 = vmatpush.bf16.msra.mxu0 %v200_v1  ;;  %v205_v56 = vld [vmem:[%s294_s4] ss:$0 sm:$0xff] }
   0x7   :  { %v207_v12 = vpop.eup %206 }
   0x8   :  { %v105_v14 = vmul.f32 16.0, %v207_v12  ;;  %vm109_vm2 = vweird.f32 %v207_v12 }
   0xa   :  { %84 = vmatpush.bf16.msra.mxu0 %v199_v2  ;;  %v106_v19 = vsub.f32 1.0, %v105_v14 }
   0xc   :  { %v107_v22 = vmul.f32 %v207_v12, %v106_v19 }
   0xe   :  { %85 = vmatpush.bf16.msra.mxu0 %v198_v3  ;;  %v108_v25 = vadd.f32 %v207_v12, %v107_v22 }
  0x10   :  { %v110_v28 = vsel %vm109_vm2, %v207_v12, %v108_v25 }
  0x12   :  { %86 = vmatpush.bf16.msra.mxu0 %v197_v4 }
  0x16   :  { %87 = vmatpush.bf16.msra.mxu0 %v196_v5 }
  0x19   :  { %193 = vmatmul.msk.bf16.vlgmr.msra.gmra.mxu0 %vm76_vm0, %v23_v8 }
  0x96   :  { %v89_v10 = vpop.f32.mrf.mxu0 }
  0x97   :  { %v90_v13 = vadd.f32 %v203_v11, %v89_v10 }
  0x99   :  { %v95_v17 = vsel %vm94_vm1, %v90_v13, 0.0 }
  0x9e   :  { %v91_v15 = vpop.f32.mrf.mxu0 }
  0x9f   :  { %v92_v16 = vadd.f32 %v203_v11, %v91_v15 }
  0xa1   :  { %v96_v18 = vsel %vm94_vm1, %v92_v16, 0.0 }
  0xa2   :  { %v97_v20 = vadd.f32 %v96_v18, %v95_v17 }
  0xa4   :  { %v98_v21 = vrot.slane %v97_v20, 4 }
  0xa6   :  { %v99_v23 = vadd.f32 %v98_v21, %v97_v20 }
  0xa8   :  { %v100_v24 = vrot.slane %v99_v23, 2 }
  0xaa   :  { %v101_v26 = vadd.f32 %v100_v24, %v99_v23 }
  0xac   :  { %v102_v27 = vrot.slane %v101_v26, 1 }
  0xae   :  { %v103_v29 = vadd.f32 %v102_v27, %v101_v26 }
  0xb0   :  { %v111_v30 = vmul.f32 %v110_v28, %v103_v29 }
  0xb2   :  { %v112_v31 = vsub.f32 %v90_v13, %v111_v30  ;;  %v113_v32 = vsub.f32 %v92_v16, %v111_v30 }
  0xb4   :  { %v114_v33 = vmul.f32 %v112_v31, %v112_v31  ;;  %v115_v34 = vmul.f32 %v113_v32, %v113_v32 }
  0xb6   :  { %v116_v35 = vsel %vm94_vm1, %v114_v33, 0.0  ;;  %v117_v36 = vsel %vm94_vm1, %v115_v34, 0.0 }
  0xb7   :  { %v118_v37 = vadd.f32 %v117_v36, %v116_v35 }
  0xb9   :  { %v119_v38 = vrot.slane %v118_v37, 4 }
  0xbb   :  { %v120_v39 = vadd.f32 %v119_v38, %v118_v37 }
  0xbd   :  { %v121_v40 = vrot.slane %v120_v39, 2 }
  0xbf   :  { %v122_v41 = vadd.f32 %v121_v40, %v120_v39 }
  0xc1   :  { %v123_v42 = vrot.slane %v122_v41, 1 }
  0xc3   :  { %v124_v43 = vadd.f32 %v123_v42, %v122_v41 }
  0xc5   :  { %v125_v44 = vmul.f32 %v124_v43, %v110_v28 }
  0xc7   :  { %v126_v45 = vadd.f32 1e-05, %v125_v44 }
  0xc9   :  { %208 = vrsqrt.f32 %v126_v45  ;;  %vm133_vm4 = vweird.f32 %v126_v45 }
  0xcf   :  { %v209_v46 = vpop.eup %208 }
  0xd0   :  { %v128_v47 = vmul.f32 %v209_v46, %v126_v45  ;;  %vm134_vm3 = vweird.f32 %v209_v46 }
  0xd1   :  { %vm135_vm5 = vmor %vm133_vm4, %vm134_vm3 }
  0xd2   :  { %v129_v48 = vmul.f32 %v209_v46, %v128_v47 }
  0xd4   :  { %v130_v49 = vmul.f32 0.5, %v129_v48 }
  0xd6   :  { %v131_v50 = vsub.f32 1.5, %v130_v49 }
  0xd8   :  { %v132_v51 = vmul.f32 %v209_v46, %v131_v50 }
  0xda   :  { %v136_v53 = vsel %vm135_vm5, %v209_v46, %v132_v51 }
  0xdb   :  { %v137_v54 = vmul.f32 %v136_v53, %v112_v31  ;;  %v138_v55 = vmul.f32 %v136_v53, %v113_v32 }
  0xdd   :  { %v143_v57 = vmul.f32 %v204_v52, %v137_v54  ;;  %v144_v58 = vmul.f32 %v204_v52, %v138_v55 }
  0xdf   :  { %v149_v59 = vadd.f32 %v205_v56, %v143_v57  ;;  %v150_v60 = vadd.f32 %v205_v56, %v144_v58 }
  0xe1   :  { %v153_v61 = vmin.f32 %v149_v59, 0.0  ;;  %v154_v62 = vmin.f32 %v150_v60, 0.0  ;;  %vm151_vm6 = vcmp.gt.f32.partialorder %v149_v59, 0.0  ;;  %vm152_vm7 = vcmp.gt.f32.partialorder %v150_v60, 0.0 }
  0xe3   :  { %v155_v63 = vmul.f32 1.442695, %v153_v61  ;;  %v157_v0 = vmul.f32 1.442695, %v154_v62 }
  0xe5   :  { %210 = vpow2.f32 %v155_v63 }
  0xe6   :  { %212 = vpow2.f32 %v157_v0 }
  0xeb   :  { %v211_v1 = vpop.eup %210 }
  0xec   :  { %v213_v2 = vpop.eup %212  ;;  %v194_v3 = vadd.f32 -1.0, %v211_v1 }
  0xed   :  { %v195_v4 = vadd.f32 -1.0, %v213_v2 }
  0xee   :  { %v161_v5 = vsel %vm151_vm6, %v149_v59, %v194_v3 }
  0xef   :  { %v162_v6 = vsel %vm152_vm7, %v150_v60, %v195_v4  ;;  %163 = vst.msk [vmem:[%s295_s5] sm:$0xff] %vm94_vm1, %v161_v5 }
  0xf0   :  { %164 = vst.msk [vmem:[%s295_s5 + $0x8] sm:$0xff] %vm94_vm1, %v162_v6 }

// kernel: _lambda_.16
= control target key start
LH: loop header
LB: loop body
LE: loop exit
PB: predicated region body
PF: predicated region fallthrough
CT: control target
= control target key end

     0   :  { %vm66_vm0 = vcmask 261120   ;;  %v293_v41 = vmov -1.0   ;;  %vm151_vm6 = vcmask 523264   ;;  %v294_v54 = vmov 32.0   ;;  %s398_s1 = inlined_call_operand.vmem [shape: bf16[32,64], index: 1, kind: input, shape index: {}]   ;;  %s399_s0 = inlined_call_operand.vmem [shape: f32[8,32], index: 0, kind: input, shape index: {}]   ;;  %s400_s2 = inlined_call_operand.vmem [shape: f32[1,64], index: 2, kind: input, shape index: {}]   ;;  %s401_s4 = inlined_call_operand.vmem [shape: f32[1,32], index: 4, kind: input, shape index: {}]   ;;  %s402_s3 = inlined_call_operand.vmem [shape: bf16[64,32], index: 3, kind: input, shape index: {}]   ;;  %s403_s5 = inlined_call_operand.vmem [shape: f32[1,32], index: 5, kind: input, shape index: {}]   ;;  %s404_s6 = inlined_call_operand.vmem [shape: f32[1,32], index: 6, kind: input, shape index: {}]   ;;  %s405_s7 = inlined_call_operand.vmem [shape: f32[1,32], index: 7, kind: input, shape index: {}]   ;;  %s406_s8 = inlined_call_operand.vmem [shape: f32[1,32], index: 8, kind: input, shape index: {}]   ;;  %s407_s9 = inlined_call_operand.vmem [shape: f32[8,32], index: 9, kind: output, shape index: {}]  }
   0x1   :  { %v270_v0 = vld [vmem:[%s398_s1 + $0x8] sm:$0xff]  ;;  %v269_v1 = vld [vmem:[%s398_s1] sm:$0xff]  ;;  %v274_v12 = vld [vmem:[%s402_s3 + $0x18] sm:$0xff] }
   0x2   :  { %76 = vmatpush.bf16.msra.mxu0 %v270_v0  ;;  %v354_v2 = vld [vmem:[%s399_s0] sm:$0xff]  ;;  %159 = vmatpush.bf16.msra.mxu1 %v274_v12  ;;  %v273_v13 = vld [vmem:[%s402_s3 + $0x10] sm:$0xff]  ;;  %v272_v16 = vld [vmem:[%s402_s3 + $0x8] sm:$0xff] }
   0x3   :  { %v50_v3 = vpack.c.bf16 %v354_v2, %v354_v2  ;;  %v277_v4 = vld [vmem:[%s400_s2] ss:$0 sm:$0xff] }
   0x4   :  { %v271_v18 = vld [vmem:[%s402_s3] sm:$0xff] }
   0x5   :  { %v278_v48 = vld [vmem:[%s401_s4] ss:$0 sm:$0xff] }
   0x6   :  { %77 = vmatpush.bf16.msra.mxu0 %v269_v1  ;;  %160 = vmatpush.bf16.msra.mxu1 %v273_v13 }
   0x9   :  { %251 = vmatmul.msk.bf16.vlgmr.msra.gmra.mxu0 %vm66_vm0, %v50_v3 }
   0xa   :  { %161 = vmatpush.bf16.msra.mxu1 %v272_v16 }
   0xe   :  { %162 = vmatpush.bf16.msra.mxu1 %v271_v18 }
  0x86   :  { %v79_v5 = vpop.f32.mrf.mxu0 }
  0x87   :  { %v80_v6 = vadd.f32 %v277_v4, %v79_v5 }
  0x89   :  { %v84_v7 = vmul.f32 0.70710677, %v80_v6  ;;  %v83_v44 = vmul.f32 0.5, %v80_v6 }
  0x8b   :  { %v87_v8 = vand.u32 2147483647, %v84_v7  ;;  %vm85_vm5 = vcmp.ge.f32.partialorder %v84_v7, 0.0 }
  0x8c   :  { %v86_v42 = vsel %vm85_vm5, 1.0, %v293_v41 }
  0x8d   :  { %v88_v9 = vmul.f32 0.3275911, %v87_v8  ;;  %v114_v26 = vsub.f32 0.0, %v87_v8 }
  0x8e   :  { %v81_v10 = vpop.f32.mrf.mxu0 }
  0x8f   :  { %v89_v11 = vadd.f32 1.0, %v88_v9  ;;  %v115_v29 = vmul.f32 %v114_v26, %v87_v8 }
  0x91   :  { %283 = vrcp.f32 %v89_v11  ;;  %v101_v19 = vand.u32 2147483648, %v89_v11  ;;  %v99_v21 = vand.u32 2147483647, %v89_v11  ;;  %vm95_vm2 = vweird.f32 %v89_v11 }
  0x92   :  { %v116_v32 = vmul.f32 1.442695, %v115_v29 }
  0x93   :  { %v102_v23 = vor.u32 1.1754944e-38, %v101_v19  ;;  %vm100_vm4 = vcmp.eq.f32.partialorder %v99_v21, 8.507059e+37 }
  0x94   :  { %285 = vpow2.f32 %v116_v32  ;;  %v281_v32 = vld [vmem:[%s405_s7] ss:$0 sm:$0xff] }
  0x95   :  { %287 = vrcp.f32 %v294_v54 }
  0x97   :  { %v284_v14 = vpop.eup %283 }
  0x98   :  { %v91_v15 = vmul.f32 %v284_v14, %v89_v11  ;;  %vm96_vm1 = vweird.f32 %v284_v14  ;;  %v279_v11 = vld [vmem:[%s403_s5] ss:$0 sm:$0xff] }
  0x99   :  { %vm97_vm3 = vmor %vm95_vm2, %vm96_vm1 }
  0x9a   :  { %v92_v17 = vsub.f32 1.0, %v91_v15  ;;  %v286_v38 = vpop.eup %285 }
  0x9b   :  { %v288_v55 = vpop.eup %287 }
  0x9c   :  { %v93_v20 = vmul.f32 %v284_v14, %v92_v17  ;;  %v173_v56 = vmul.f32 32.0, %v288_v55  ;;  %vm177_vm7 = vweird.f32 %v288_v55 }
  0x9e   :  { %v94_v22 = vadd.f32 %v284_v14, %v93_v20  ;;  %v174_v57 = vsub.f32 1.0, %v173_v56 }
  0xa0   :  { %v98_v24 = vsel %vm97_vm3, %v284_v14, %v94_v22  ;;  %v175_v58 = vmul.f32 %v288_v55, %v174_v57  ;;  %v280_v14 = vld [vmem:[%s404_s6] ss:$0 sm:$0xff] }
  0xa1   :  { %v103_v25 = vsel %vm100_vm4, %v102_v23, %v98_v24 }
  0xa2   :  { %v105_v27 = vmul.f32 1.0614054, %v103_v25  ;;  %v176_v59 = vadd.f32 %v288_v55, %v175_v58 }
  0xa4   :  { %v106_v28 = vadd.f32 -1.4531521, %v105_v27  ;;  %v178_v60 = vsel %vm177_vm7, %v288_v55, %v176_v59 }
  0xa6   :  { %v107_v30 = vmul.f32 %v106_v28, %v103_v25 }
  0xa8   :  { %v108_v31 = vadd.f32 1.4214138, %v107_v30 }
  0xaa   :  { %v109_v33 = vmul.f32 %v108_v31, %v103_v25 }
  0xac   :  { %v110_v34 = vadd.f32 -0.28449672, %v109_v33 }
  0xae   :  { %v111_v35 = vmul.f32 %v110_v34, %v103_v25  ;;  %v282_v34 = vld [vmem:[%s406_s8] ss:$0 sm:$0xff] }
  0xb0   :  { %v112_v36 = vadd.f32 0.2548296, %v111_v35 }
  0xb2   :  { %v113_v37 = vmul.f32 %v112_v36, %v103_v25 }
  0xb4   :  { %v118_v39 = vmul.f32 %v286_v38, %v113_v37 }
  0xb6   :  { %v119_v40 = vsub.f32 1.0, %v118_v39 }
  0xb8   :  { %v120_v43 = vmul.f32 %v119_v40, %v86_v42 }
  0xba   :  { %v121_v45 = vadd.f32 1.0, %v120_v43 }
  0xbc   :  { %v122_v46 = vmul.f32 %v121_v45, %v83_v44 }
  0xbe   :  { %v123_v47 = vpack.c.bf16 %v122_v46, %v122_v46 }
  0xc0   :  { %268 = vmatmul.msk.bf16.vlgmr.msra.gmra.mxu1 %vm151_vm6, %v123_v47 }
 0x13d   :  { %v164_v49 = vpop.f32.mrf.mxu1 }
 0x13e   :  { %v165_v50 = vadd.f32 %v278_v48, %v164_v49 }
 0x140   :  { %v168_v51 = vadd.f32 %v165_v50, %v354_v2 }
 0x142   :  { %v169_v52 = vsel %vm66_vm0, %v168_v51, 0.0 }
 0x143   :  { %170 = vadd.xlane.f32.xlu0 %v169_v52 }
 0x145   :  { %v166_v53 = vpop.f32.mrf.mxu1 }
 0x1b6   :  { %v171_v61 = vpop.xlane.xlu0 %170 }
 0x1b7   :  { %v179_v62 = vmul.f32 %v178_v60, %v171_v61 }
 0x1b9   :  { %v180_v63 = vsub.f32 %v168_v51, %v179_v62 }
 0x1bb   :  { %v181_v0 = vmul.f32 %v180_v63, %v180_v63 }
 0x1bd   :  { %v182_v1 = vsel %vm66_vm0, %v181_v0, 0.0 }
 0x1be   :  { %183 = vadd.xlane.f32.xlu0 %v182_v1 }
 0x231   :  { %v184_v2 = vpop.xlane.xlu0 %183 }
 0x232   :  { %v185_v3 = vmul.f32 %v184_v2, %v178_v60 }
 0x234   :  { %v186_v4 = vadd.f32 1e-05, %v185_v3 }
 0x236   :  { %289 = vrsqrt.f32 %v186_v4  ;;  %vm193_vm9 = vweird.f32 %v186_v4 }
 0x23c   :  { %v290_v5 = vpop.eup %289 }
 0x23d   :  { %v188_v6 = vmul.f32 %v290_v5, %v186_v4  ;;  %vm194_vm8 = vweird.f32 %v290_v5 }
 0x23e   :  { %vm195_vm10 = vmor %vm193_vm9, %vm194_vm8 }
 0x23f   :  { %v189_v7 = vmul.f32 %v290_v5, %v188_v6 }
 0x241   :  { %v190_v8 = vmul.f32 0.5, %v189_v7 }
 0x243   :  { %v191_v9 = vsub.f32 1.5, %v190_v8 }
 0x245   :  { %v192_v10 = vmul.f32 %v290_v5, %v191_v9 }
 0x247   :  { %v196_v12 = vsel %vm195_vm10, %v290_v5, %v192_v10 }
 0x248   :  { %v197_v13 = vmul.f32 %v196_v12, %v180_v63 }
 0x24a   :  { %v201_v15 = vmul.f32 %v279_v11, %v197_v13 }
 0x24c   :  { %v205_v16 = vadd.f32 %v280_v14, %v201_v15 }
 0x24e   :  { %v208_v17 = vsel %vm66_vm0, %v205_v16, 0.0 }
 0x24f   :  { %209 = vadd.xlane.f32.xlu1 %v208_v17 }
 0x2c2   :  { %v210_v18 = vpop.xlane.xlu1 %209 }
 0x2c3   :  { %v211_v19 = vmul.f32 %v210_v18, %v178_v60 }
 0x2c5   :  { %v212_v20 = vsub.f32 %v205_v16, %v211_v19 }
 0x2c7   :  { %v213_v21 = vmul.f32 %v212_v20, %v212_v20 }
 0x2c9   :  { %v214_v22 = vsel %vm66_vm0, %v213_v21, 0.0 }
 0x2ca   :  { %215 = vadd.xlane.f32.xlu1 %v214_v22 }
 0x33d   :  { %v216_v23 = vpop.xlane.xlu1 %215 }
 0x33e   :  { %v217_v24 = vmul.f32 %v216_v23, %v178_v60 }
 0x340   :  { %v218_v25 = vadd.f32 1e-05, %v217_v24 }
 0x342   :  { %291 = vrsqrt.f32 %v218_v25  ;;  %vm225_vm12 = vweird.f32 %v218_v25 }
 0x348   :  { %v292_v26 = vpop.eup %291 }
 0x349   :  { %v220_v27 = vmul.f32 %v292_v26, %v218_v25  ;;  %vm226_vm11 = vweird.f32 %v292_v26 }
 0x34a   :  { %vm227_vm13 = vmor %vm225_vm12, %vm226_vm11 }
 0x34b   :  { %v221_v28 = vmul.f32 %v292_v26, %v220_v27 }
 0x34d   :  { %v222_v29 = vmul.f32 0.5, %v221_v28 }
 0x34f   :  { %v223_v30 = vsub.f32 1.5, %v222_v29 }
 0x351   :  { %v224_v31 = vmul.f32 %v292_v26, %v223_v30 }
 0x353   :  { %v228_v33 = vsel %vm227_vm13, %v292_v26, %v224_v31 }
 0x354   :  { %v229_v35 = vmul.f32 %v228_v33, %v212_v20 }
 0x356   :  { %v233_v36 = vmul.f32 %v281_v32, %v229_v35 }
 0x358   :  { %v237_v37 = vadd.f32 %v282_v34, %v233_v36 }
 0x35a   :  { %238 = vst.msk [vmem:[%s407_s9] sm:$0xff] %vm66_vm0, %v237_v37 }

// kernel: _lambda_.15
= control target key start
LH: loop header
LB: loop body
LE: loop exit
PB: predicated region body
PF: predicated region fallthrough
CT: control target
= control target key end

     0   :  { %s1094_s21 = smov 0   ;;  %s1206_s0 = inlined_call_operand.vmem [shape: f32[2,4,32], index: 0, kind: input, shape index: {}, may-alias: {0,1}]   ;;  %s1207_s1 = inlined_call_operand.vmem [shape: f32[2,4,32], index: 1, kind: input, shape index: {}, may-alias: {0,1}]   ;;  %s1208_s2 = inlined_call_operand.vmem [shape: bf16[32,32], index: 2, kind: input, shape index: {}]   ;;  %s1209_s3 = inlined_call_operand.vmem [shape: f32[1,32], index: 3, kind: input, shape index: {}]   ;;  %s1210_s4 = inlined_call_operand.vmem [shape: bf16[32,32], index: 4, kind: input, shape index: {}]   ;;  %s1211_s5 = inlined_call_operand.vmem [shape: f32[1,32], index: 5, kind: input, shape index: {}]   ;;  %s1212_s6 = inlined_call_operand.vmem [shape: bf16[32,32], index: 6, kind: input, shape index: {}]   ;;  %s1213_s7 = inlined_call_operand.vmem [shape: f32[1,32], index: 7, kind: input, shape index: {}]   ;;  %s1214_s8 = inlined_call_operand.vmem [shape: bf16[32,32], index: 8, kind: input, shape index: {}]   ;;  %s1215_s9 = inlined_call_operand.vmem [shape: f32[1,32], index: 9, kind: input, shape index: {}]   ;;  %s1216_s10 = inlined_call_operand.vmem [shape: f32[1,32], index: 10, kind: input, shape index: {}]   ;;  %s1217_s11 = inlined_call_operand.vmem [shape: f32[1,32], index: 11, kind: input, shape index: {}]   ;;  %s1218_s12 = inlined_call_operand.vmem [shape: f32[2,4,32], index: 12, kind: output, shape index: {}]  }
   0x1 LB: > { %s917_s22 = sadd.s32 4294967295, %s1025_s21   ;;  %p921_p0 = scmp.ge.s32.totalorder %s1025_s21, 1  ;;  %s1025_s21 = sphi %s1094_s21, %s22_s21  }
   0x2   : > { %p370_p1 = scmp.lt.s32.totalorder %s1025_s21, 3 }
   0x4   : > { %p371_p2 = pnand %p921_p0, %p370_p1 }
   0x5   : > { %p414_p3 = scmp.lt.s32.totalorder (!%p371_p2), %s917_s22, 1 }
   0x6   : > { %374 = sbr.rel (%p371_p2) target bundleno = 1103 (0x44f), region = 68 }
   0xb   : > { %v976_v0 = vld [vmem:[%s1208_s2 + $0x8] sm:$0xff]  ;;  %v975_v2 = vld [vmem:[%s1208_s2] sm:$0xff]  ;;  %s1220_s22 = smov (!%p414_p3, %s917_s22), 1  ;;  %vm450_vm0 = vcmask 261120   ;;  %v541_v8 = vlaneseq  ;;  %v1027_v20 = vmov 0.0   ;;  %vm572_vm11 = vcmask 27648  }
   0xc   : > { %v978_v1 = vld [vmem:[%s1210_s4 + $0x8] sm:$0xff]  ;;  %460 = vmatpush.bf16.msra.mxu0 %v976_v0  ;;  %v977_v3 = vld [vmem:[%s1210_s4] sm:$0xff]  ;;  %s1114_s13 = sshll.u32 %s1220_s22, 2  ;;  %vm589_vm12 = vcmask 1041408   ;;  %vm585_vm13 = vcmask 31744   ;;  %vm813_vm14 = vcmask 257024  }
   0xd   : > { %497 = vmatpush.bf16.msra.mxu1 %v978_v1  ;;  %s417_s16 = scalar_lea.vmem %s1206_s0, %s1114_s13  ;;  %s421_s19 = scalar_lea.vmem %s1207_s1, %s1114_s13  ;;  %v542_v9 = vand.u32 127, %v541_v8  ;;  %v993_v10 = vld [vmem:[%s1209_s3] ss:$0 sm:$0xff]  ;;  %v980_v36 = vld [vmem:[%s1212_s6 + $0x8] sm:$0xff] }
   0xe   : > { %v1120_v4 = vld [vmem:[%s417_s16] sm:$0xf]  ;;  %530 = vmatpush.bf16.msra.mxu2 %v980_v36  ;;  %s425_s27 = scalar_lea.vmem %s1218_s12, %s1114_s13 }
   0xf   : > { %v429_v5 = vpack.c.bf16 %v1120_v4, %v1120_v4  ;;  %v428_v6 = vld [vmem:[%s421_s19] sm:$0xf]  ;;  %vm608_vm1 = vcmp.ge.s32.totalorder %v542_v9, 8  ;;  %vm609_vm2 = vcmp.lt.s32.totalorder %v542_v9, 16  ;;  %vm544_vm3 = vcmp.lt.s32.totalorder %v542_v9, 8 }
  0x10   : > { %461 = vmatpush.bf16.msra.mxu0 %v975_v2  ;;  %v467_v7 = vpack.c.bf16 %v428_v6, %v428_v6  ;;  %v994_v11 = vld [vmem:[%s1211_s5] ss:$0 sm:$0xff]  ;;  %vm610_vm4 = vmand %vm608_vm1, %vm609_vm2  ;;  %v1137_v21 = vsel %vm544_vm3, 1.0, %v1027_v20  ;;  %vm663_vm5 = vcmp.ge.s32.totalorder %v542_v9, 16  ;;  %vm664_vm6 = vcmp.lt.s32.totalorder %v542_v9, 24 }
  0x11   : > { %498 = vmatpush.bf16.msra.mxu1 %v977_v3  ;;  %v1139_v22 = vsel %vm610_vm4, 1.0, %v1027_v20  ;;  %vm718_vm7 = vcmp.ge.s32.totalorder %v542_v9, 24  ;;  %vm719_vm8 = vcmp.lt.s32.totalorder %v542_v9, 32  ;;  %vm665_vm9 = vmand %vm663_vm5, %vm664_vm6  ;;  %v979_v38 = vld [vmem:[%s1212_s6] sm:$0xff] }
  0x12   : > { %vm720_vm10 = vmand %vm718_vm7, %vm719_vm8  ;;  %v1145_v30 = vsel %vm665_vm9, 1.0, %v1027_v20  ;;  %531 = vmatpush.bf16.msra.mxu2 %v979_v38  ;;  %v995_v60 = vld [vmem:[%s1213_s7] ss:$0 sm:$0xff] }
  0x13   : > { %933 = vmatmul.msk.bf16.vlgmr.msra.gmra.mxu0 %vm450_vm0, %v429_v5  ;;  %v1147_v31 = vsel %vm720_vm10, 1.0, %v1027_v20 }
  0x14   : > { %942 = vmatmul.msk.bf16.vlgmr.msra.gmra.mxu1 %vm450_vm0, %v467_v7 }
  0x15   : > { %951 = vmatmul.msk.bf16.vlgmr.msra.gmra.mxu2 %vm450_vm0, %v467_v7 }
  0x90   : > { %v463_v12 = vpop.f32.mrf.mxu0 }
  0x91   : > { %v464_v13 = vadd.f32 %v993_v10, %v463_v12  ;;  %v500_v14 = vpop.f32.mrf.mxu1 }
  0x92   : > { %v501_v15 = vadd.f32 %v994_v11, %v500_v14 }
  0x93   : > { %v537_v16 = vmul.f32 0.35355338, %v464_v13 }
  0x94   : > { %v539_v17 = vpack.c.bf16 %v501_v15, %v501_v15 }
  0x95   : > { %v538_v18 = vpack.c.bf16 %v537_v16, %v537_v16 }
  0x96   : > { %v557_v19 = vsel %vm450_vm0, %v539_v17, 0 }
  0x97   : > { %v549_v23 = vunpack.c.l.bf16 %v538_v18  ;;  %566 = vmatpush.bf16.xpose.msra.mxu3 %v557_v19  ;;  %627 = vmatpush.bf16.xpose.msrb.mxu1 %v557_v19 }
  0x98   : > { %v465_v24 = vpop.f32.mrf.mxu0  ;;  %v533_v0 = vpop.f32.mrf.mxu2 }
  0x99   : > { %v502_v25 = vpop.f32.mrf.mxu1  ;;  %v551_v26 = vmul.f32 %v1137_v21, %v549_v23  ;;  %v615_v27 = vmul.f32 %v1139_v22, %v549_v23  ;;  %v670_v32 = vmul.f32 %v1145_v30, %v549_v23  ;;  %v725_v33 = vmul.f32 %v1147_v31, %v549_v23 }
  0x9a   : > { %v534_v1 = vadd.f32 %v995_v60, %v533_v0 }
  0x9b   : > { %v552_v28 = vpack.c.bf16 %v551_v26, %v551_v26  ;;  %v616_v29 = vpack.c.bf16 %v615_v27, %v615_v27  ;;  %v671_v34 = vpack.c.bf16 %v670_v32, %v670_v32  ;;  %v726_v35 = vpack.c.bf16 %v725_v33, %v725_v33  ;;  %v982_v33 = vld [vmem:[%s1214_s8 + $0x8] sm:$0xff] }
  0x9c   : > { %v540_v3 = vpack.c.bf16 %v534_v1, %v534_v1 }
  0x9e   : > { %953 = vmatmul.msk.bf16.vlgmr.msra.gmra.mxu3 %vm450_vm0, %v552_v28  ;;  %956 = vmatmul.msk.bf16.vlgmr.msrb.gmra.mxu1 %vm450_vm0, %v616_v29  ;;  %v591_v6 = vsel %vm589_vm12, %v540_v3, 0 }
  0x9f   : > { %682 = vmatpush.bf16.xpose.msrb.mxu3 %v557_v19  ;;  %737 = vmatpush.bf16.xpose.msra.mxu1 %v557_v19 }
  0xa0   : > { %600 = vmatpush.bf16.msrb.mxu0 %v591_v6  ;;  %655 = vmatpush.bf16.msrb.mxu2 %v591_v6  ;;  %v535_v10 = vpop.f32.mrf.mxu2 }
  0xa1   : > { %v997_v10 = vld [vmem:[%s1216_s10] ss:$0 sm:$0xff] }
  0xa4   : > { %710 = vmatpush.bf16.msra.mxu0 %v591_v6  ;;  %765 = vmatpush.bf16.msra.mxu2 %v591_v6 }
  0xa7   : > { %803 = vmatpush.bf16.msra.mxu3 %v982_v33 }
  0xae   : > { %959 = vmatmul.msk.bf16.vlgmr.msrb.gmra.mxu3 %vm450_vm0, %v671_v34  ;;  %962 = vmatmul.msk.bf16.vlgmr.msra.gmra.mxu1 %vm450_vm0, %v726_v35  ;;  %v981_v34 = vld [vmem:[%s1214_s8] sm:$0xff] }
  0xaf   : > { %804 = vmatpush.bf16.msra.mxu3 %v981_v34 }
 0x11b   : > { %v629_v37 = vpop.f32.mrf.mxu1 }
 0x11c   : > { %v633_v39 = vsel %vm572_vm11, %v629_v37, -inf }
 0x11d   : > { %634 = vmax.xlane.f32.xlu0 %v633_v39 }
 0x121   : > { %v568_v40 = vpop.f32.mrf.mxu3 }
 0x122   : > { %v573_v42 = vsel %vm572_vm11, %v568_v40, -inf }
 0x123   : > { %v631_v41 = vpop.f32.mrf.mxu1 }
 0x125   : > { %574 = vmax.xlane.f32.xlu0 %v573_v42 }
 0x129   : > { %v570_v43 = vpop.f32.mrf.mxu3 }
 0x12b   : > { %v739_v44 = vpop.f32.mrf.mxu1 }
 0x12c   : > { %v743_v45 = vsel %vm572_vm11, %v739_v44, -inf }
 0x12d   : > { %744 = vmax.xlane.f32.xlu1 %v743_v45 }
 0x131   : > { %v684_v46 = vpop.f32.mrf.mxu3 }
 0x132   : > { %v688_v48 = vsel %vm572_vm11, %v684_v46, -inf }
 0x133   : > { %v741_v47 = vpop.f32.mrf.mxu1 }
 0x135   : > { %689 = vmax.xlane.f32.xlu1 %v688_v48 }
 0x139   : > { %v686_v49 = vpop.f32.mrf.mxu3 }
 0x190   : > { %v635_v50 = vpop.xlane.xlu0 %634 }
 0x191   : > { %v636_v51 = vsub.f32 %v629_v37, %v635_v50 }
 0x193   : > { %v637_v52 = vmul.f32 1.442695, %v636_v51 }
 0x195   : > { %999 = vpow2.f32 %v637_v52 }
 0x198   : > { %v575_v53 = vpop.xlane.xlu0 %574 }
 0x199   : > { %v576_v54 = vsub.f32 %v568_v40, %v575_v53  ;;  %v1028_v53 = vmov 32.0  }
 0x19b   : > { %v1000_v55 = vpop.eup %999  ;;  %v577_v56 = vmul.f32 1.442695, %v576_v54 }
 0x19c   : > { %v639_v57 = vsel %vm572_vm11, %v1000_v55, 0.0 }
 0x19d   : > { %1001 = vpow2.f32 %v577_v56  ;;  %640 = vadd.xlane.f32.xlu2 %v639_v57 }
 0x1a0   : > { %v745_v58 = vpop.xlane.xlu1 %744 }
 0x1a1   : > { %v746_v59 = vsub.f32 %v739_v44, %v745_v58 }
 0x1a3   : > { %v1002_v61 = vpop.eup %1001  ;;  %v747_v62 = vmul.f32 1.442695, %v746_v59 }
 0x1a4   : > { %v579_v63 = vsel %vm572_vm11, %v1002_v61, 0.0 }
 0x1a5   : > { %1003 = vpow2.f32 %v747_v62  ;;  %580 = vadd.xlane.f32.xlu2 %v579_v63 }
 0x1a8   : > { %v690_v2 = vpop.xlane.xlu1 %689 }
 0x1a9   : > { %v691_v5 = vsub.f32 %v684_v46, %v690_v2 }
 0x1ab   : > { %v1004_v7 = vpop.eup %1003  ;;  %v692_v8 = vmul.f32 1.442695, %v691_v5 }
 0x1ac   : > { %v749_v9 = vsel %vm572_vm11, %v1004_v7, 0.0 }
 0x1ad   : > { %1005 = vpow2.f32 %v692_v8  ;;  %750 = vadd.xlane.f32.xlu0 %v749_v9 }
 0x1b3   : > { %v1006_v11 = vpop.eup %1005 }
 0x1b4   : > { %v694_v12 = vsel %vm572_vm11, %v1006_v11, 0.0 }
 0x1b5   : > { %695 = vadd.xlane.f32.xlu1 %v694_v12  ;;  %v998_v12 = vld [vmem:[%s1217_s11] ss:$0 sm:$0xff] }
 0x210   : > { %v641_v13 = vpop.xlane.xlu2 %640 }
 0x211   : > { %1007 = vrcp.f32 %v641_v13 }
 0x217   : > { %v1008_v14 = vpop.eup %1007 }
 0x218   : > { %v643_v15 = vmul.f32 %v1008_v14, %v1000_v55  ;;  %v581_v16 = vpop.xlane.xlu2 %580 }
 0x219   : > { %1009 = vrcp.f32 %v581_v16 }
 0x21a   : > { %v644_v17 = vpack.c.bf16 %v643_v15, %v643_v15 }
 0x21c   : > { %957 = vmatmul.msk.bf16.vlgmr.msrb.gmra.mxu2 %vm585_vm13, %v644_v17 }
 0x21f   : > { %v1010_v18 = vpop.eup %1009 }
 0x220   : > { %v583_v19 = vmul.f32 %v1010_v18, %v1002_v61  ;;  %v751_v20 = vpop.xlane.xlu0 %750 }
 0x221   : > { %1011 = vrcp.f32 %v751_v20 }
 0x222   : > { %v584_v23 = vpack.c.bf16 %v583_v19, %v583_v19 }
 0x224   : > { %954 = vmatmul.msk.bf16.vlgmr.msrb.gmra.mxu0 %vm585_vm13, %v584_v23 }
 0x227   : > { %v1012_v24 = vpop.eup %1011 }
 0x228   : > { %v753_v25 = vmul.f32 %v1012_v24, %v1004_v7  ;;  %v696_v26 = vpop.xlane.xlu1 %695 }
 0x229   : > { %1013 = vrcp.f32 %v696_v26 }
 0x22a   : > { %v754_v27 = vpack.c.bf16 %v753_v25, %v753_v25  ;;  %1015 = vrcp.f32 %v1028_v53 }
 0x22c   : > { %963 = vmatmul.msk.bf16.vlgmr.msra.gmra.mxu2 %vm585_vm13, %v754_v27 }
 0x22f   : > { %v1014_v28 = vpop.eup %1013 }
 0x230   : > { %v698_v29 = vmul.f32 %v1014_v28, %v1006_v11  ;;  %v1016_v54 = vpop.eup %1015 }
 0x231   : > { %v818_v55 = vmul.f32 32.0, %v1016_v54  ;;  %vm822_vm15 = vweird.f32 %v1016_v54 }
 0x232   : > { %v699_v32 = vpack.c.bf16 %v698_v29, %v698_v29 }
 0x233   : > { %v819_v56 = vsub.f32 1.0, %v818_v55 }
 0x234   : > { %960 = vmatmul.msk.bf16.vlgmr.msra.gmra.mxu0 %vm585_vm13, %v699_v32 }
 0x235   : > { %v820_v57 = vmul.f32 %v1016_v54, %v819_v56 }
 0x237   : > { %v821_v58 = vadd.f32 %v1016_v54, %v820_v57 }
 0x239   : > { %v823_v59 = vsel %vm822_vm15, %v1016_v54, %v821_v58 }
 0x29f   : > { %v657_v35 = vpop.f32.mrf.mxu2 }
 0x2a0   : > { %v661_v41 = vmul.f32 %v1139_v22, %v657_v35 }
 0x2a1   : > { %v602_v36 = vpop.f32.mrf.mxu0 }
 0x2a2   : > { %v606_v39 = vmul.f32 %v1137_v21, %v602_v36  ;;  %v996_v21 = vld [vmem:[%s1215_s9] ss:$0 sm:$0xff] }
 0x2a4   : > { %v662_v43 = vadd.f32 %v661_v41, %v606_v39 }
 0x2a7   : > { %v659_v37 = vpop.f32.mrf.mxu2 }
 0x2a9   : > { %v604_v38 = vpop.f32.mrf.mxu0 }
 0x2af   : > { %v767_v40 = vpop.f32.mrf.mxu2 }
 0x2b0   : > { %v771_v45 = vmul.f32 %v1147_v31, %v767_v40 }
 0x2b1   : > { %v712_v42 = vpop.f32.mrf.mxu0 }
 0x2b2   : > { %v716_v44 = vmul.f32 %v1145_v30, %v712_v42 }
 0x2b4   : > { %v717_v46 = vadd.f32 %v716_v44, %v662_v43 }
 0x2b6   : > { %v772_v47 = vadd.f32 %v771_v45, %v717_v46 }
 0x2b7   : > { %v769_v48 = vpop.f32.mrf.mxu2 }
 0x2b8   : > { %v773_v49 = vpack.c.bf16 %v772_v47, %v772_v47 }
 0x2b9   : > { %v714_v50 = vpop.f32.mrf.mxu0 }
 0x2ba   : > { %972 = vmatmul.msk.bf16.vlgmr.msra.gmra.mxu3 %vm450_vm0, %v773_v49 }
 0x33d   : > { %v806_v51 = vpop.f32.mrf.mxu3 }
 0x33e   : > { %v807_v52 = vadd.f32 %v996_v21, %v806_v51 }
 0x340   : > { %v810_v22 = vadd.f32 %v807_v52, %v1120_v4 }
 0x342   : > { %v814_v30 = vsel %vm813_vm14, %v810_v22, 0.0 }
 0x343   : > { %815 = vadd.xlane.f32.xlu2 %v814_v30 }
 0x345   : > { %v808_v31 = vpop.f32.mrf.mxu3 }
 0x3b6   : > { %v816_v60 = vpop.xlane.xlu2 %815 }
 0x3b7   : > { %v824_v61 = vmul.f32 %v823_v59, %v816_v60 }
 0x3b9   : > { %v825_v62 = vsub.f32 %v810_v22, %v824_v61 }
 0x3bb   : > { %v826_v63 = vmul.f32 %v825_v62, %v825_v62 }
 0x3bd   : > { %v827_v0 = vsel %vm813_vm14, %v826_v63, 0.0 }
 0x3be   : > { %828 = vadd.xlane.f32.xlu0 %v827_v0 }
 0x431   : > { %v829_v4 = vpop.xlane.xlu0 %828 }
 0x432   : > { %v830_v1 = vmul.f32 %v829_v4, %v823_v59 }
 0x434   : > { %v831_v2 = vadd.f32 1e-05, %v830_v1 }
 0x436   : > { %1017 = vrsqrt.f32 %v831_v2  ;;  %vm838_vm1 = vweird.f32 %v831_v2 }
 0x43c   : > { %v1018_v3 = vpop.eup %1017 }
 0x43d   : > { %v833_v5 = vmul.f32 %v1018_v3, %v831_v2  ;;  %vm839_vm0 = vweird.f32 %v1018_v3 }
 0x43e   : > { %vm840_vm2 = vmor %vm838_vm1, %vm839_vm0 }
 0x43f   : > { %v834_v6 = vmul.f32 %v1018_v3, %v833_v5 }
 0x441   : > { %v835_v7 = vmul.f32 0.5, %v834_v6 }
 0x443   : > { %v836_v8 = vsub.f32 1.5, %v835_v7 }
 0x445   : > { %v837_v9 = vmul.f32 %v1018_v3, %v836_v8 }
 0x447   : > { %v841_v11 = vsel %vm840_vm2, %v1018_v3, %v837_v9 }
 0x448   : > { %v842_v13 = vmul.f32 %v841_v11, %v825_v62 }
 0x44a   : > { %v846_v14 = vmul.f32 %v997_v10, %v842_v13 }
 0x44c   : > { %v850_v15 = vadd.f32 %v998_v12, %v846_v14 }
 0x44e   : > { %851 = vst.msk [vmem:[%s425_s27] sm:$0xf] %vm813_vm14, %v850_v15 }
 0x44f PF: > { %s22_s21 = sadd.s32 1, %s1025_s21  }
 0x450   : > { %p19_p4 = scmp.ge.s32.totalorder %s22_s21, 4  }
 0x452   :  { %21 = sbr.rel (!%p19_p4) target bundleno = 1 (0x1), region = 101 }

// kernel: _lambda_.18
= control target key start
LH: loop header
LB: loop body
LE: loop exit
PB: predicated region body
PF: predicated region fallthrough
CT: control target
= control target key end

     0   :  { %s1098_s21 = smov 0   ;;  %s1215_s0 = inlined_call_operand.vmem [shape: f32[2,8,32], index: 0, kind: input, shape index: {}, may-alias: {0,1}]   ;;  %s1216_s1 = inlined_call_operand.vmem [shape: f32[2,8,32], index: 1, kind: input, shape index: {}, may-alias: {0,1}]   ;;  %s1217_s2 = inlined_call_operand.vmem [shape: bf16[32,32], index: 2, kind: input, shape index: {}]   ;;  %s1218_s3 = inlined_call_operand.vmem [shape: f32[1,32], index: 3, kind: input, shape index: {}]   ;;  %s1219_s4 = inlined_call_operand.vmem [shape: bf16[32,32], index: 4, kind: input, shape index: {}]   ;;  %s1220_s5 = inlined_call_operand.vmem [shape: f32[1,32], index: 5, kind: input, shape index: {}]   ;;  %s1221_s6 = inlined_call_operand.vmem [shape: bf16[32,32], index: 6, kind: input, shape index: {}]   ;;  %s1222_s7 = inlined_call_operand.vmem [shape: f32[1,32], index: 7, kind: input, shape index: {}]   ;;  %s1223_s8 = inlined_call_operand.vmem [shape: bf16[32,32], index: 8, kind: input, shape index: {}]   ;;  %s1224_s9 = inlined_call_operand.vmem [shape: f32[1,32], index: 9, kind: input, shape index: {}]   ;;  %s1225_s10 = inlined_call_operand.vmem [shape: f32[1,32], index: 10, kind: input, shape index: {}]   ;;  %s1226_s11 = inlined_call_operand.vmem [shape: f32[1,32], index: 11, kind: input, shape index: {}]   ;;  %s1227_s12 = inlined_call_operand.vmem [shape: f32[2,8,32], index: 12, kind: output, shape index: {}]  }
   0x1 LB: > { %s919_s22 = sadd.s32 4294967295, %s1028_s21   ;;  %p923_p0 = scmp.ge.s32.totalorder %s1028_s21, 1  ;;  %s1028_s21 = sphi %s1098_s21, %s22_s21  }
   0x2   : > { %p370_p1 = scmp.lt.s32.totalorder %s1028_s21, 3 }
   0x4   : > { %p371_p2 = pnand %p923_p0, %p370_p1 }
   0x5   : > { %p414_p3 = scmp.lt.s32.totalorder (!%p371_p2), %s919_s22, 1 }
   0x6   : > { %374 = sbr.rel (%p371_p2) target bundleno = 1105 (0x451), region = 68 }
   0xb   : > { %v978_v0 = vld [vmem:[%s1217_s2 + $0x8] sm:$0xff]  ;;  %v977_v2 = vld [vmem:[%s1217_s2] sm:$0xff]  ;;  %s1229_s22 = smov (!%p414_p3, %s919_s22), 1  ;;  %vm450_vm0 = vcmask 261120   ;;  %v541_v8 = vlaneseq  ;;  %v1030_v21 = vmov 0.0   ;;  %vm576_vm12 = vcmask 64512  }
   0xc   : > { %v980_v1 = vld [vmem:[%s1219_s4 + $0x8] sm:$0xff]  ;;  %460 = vmatpush.bf16.msra.mxu0 %v978_v0  ;;  %v979_v3 = vld [vmem:[%s1219_s4] sm:$0xff]  ;;  %s1118_s13 = sshll.u32 %s1229_s22, 3  ;;  %v1031_v37 = vmov -1e+30   ;;  %vm592_vm13 = vcmask 1043456  }
   0xd   : > { %497 = vmatpush.bf16.msra.mxu1 %v980_v1  ;;  %s417_s16 = scalar_lea.vmem %s1215_s0, %s1118_s13  ;;  %s421_s19 = scalar_lea.vmem %s1216_s1, %s1118_s13  ;;  %v542_v9 = vand.u32 127, %v541_v8  ;;  %v996_v10 = vld [vmem:[%s1218_s3] ss:$0 sm:$0xff]  ;;  %v544_v12 = vshrl.u32 %v541_v8, 7  ;;  %v982_v39 = vld [vmem:[%s1221_s6 + $0x8] sm:$0xff] }
   0xe   : > { %v1124_v4 = vld [vmem:[%s417_s16] sm:$0xff]  ;;  %530 = vmatpush.bf16.msra.mxu2 %v982_v39  ;;  %s425_s27 = scalar_lea.vmem %s1227_s12, %s1118_s13 }
   0xf   : > { %v429_v5 = vpack.c.bf16 %v1124_v4, %v1124_v4  ;;  %v428_v6 = vld [vmem:[%s421_s19] sm:$0xff]  ;;  %vm611_vm1 = vcmp.ge.s32.totalorder %v542_v9, 8  ;;  %vm612_vm2 = vcmp.lt.s32.totalorder %v542_v9, 16  ;;  %vm545_vm3 = vcmp.le.s32.totalorder %v542_v9, %v544_v12 }
  0x10   : > { %461 = vmatpush.bf16.msra.mxu0 %v977_v2  ;;  %v1132_v7 = vpack.c.bf16 %v428_v6, %v428_v6  ;;  %v997_v11 = vld [vmem:[%s1220_s5] ss:$0 sm:$0xff]  ;;  %vm548_vm4 = vcmp.lt.s32.totalorder %v542_v9, 8  ;;  %vm613_vm5 = vmand %vm611_vm1, %vm612_vm2  ;;  %vm666_vm6 = vcmp.ge.s32.totalorder %v542_v9, 16  ;;  %vm667_vm7 = vcmp.lt.s32.totalorder %v542_v9, 24 }
  0x11   : > { %498 = vmatpush.bf16.msra.mxu1 %v979_v3  ;;  %v1144_v22 = vsel %vm548_vm4, 1.0, %v1030_v21  ;;  %v1146_v23 = vsel %vm613_vm5, 1.0, %v1030_v21  ;;  %vm721_vm8 = vcmp.ge.s32.totalorder %v542_v9, 24  ;;  %vm722_vm9 = vcmp.lt.s32.totalorder %v542_v9, 32  ;;  %vm668_vm10 = vmand %vm666_vm6, %vm667_vm7  ;;  %v981_v41 = vld [vmem:[%s1221_s6] sm:$0xff] }
  0x12   : > { %vm723_vm11 = vmand %vm721_vm8, %vm722_vm9  ;;  %v1152_v31 = vsel %vm668_vm10, 1.0, %v1030_v21  ;;  %v546_v38 = vsel %vm545_vm3, 0.0, %v1031_v37  ;;  %531 = vmatpush.bf16.msra.mxu2 %v981_v41  ;;  %v998_v2 = vld [vmem:[%s1222_s7] ss:$0 sm:$0xff] }
  0x13   : > { %935 = vmatmul.msk.bf16.vlgmr.msra.gmra.mxu0 %vm450_vm0, %v429_v5  ;;  %v1154_v32 = vsel %vm723_vm11, 1.0, %v1030_v21  ;;  %v983_v41 = vld [vmem:[%s1223_s8] sm:$0xff] }
  0x14   : > { %944 = vmatmul.msk.bf16.vlgmr.msra.gmra.mxu1 %vm450_vm0, %v1132_v7 }
  0x15   : > { %953 = vmatmul.msk.bf16.vlgmr.msra.gmra.mxu2 %vm450_vm0, %v1132_v7 }
  0x90   : > { %v463_v13 = vpop.f32.mrf.mxu0 }
  0x91   : > { %v464_v14 = vadd.f32 %v996_v10, %v463_v13  ;;  %v500_v15 = vpop.f32.mrf.mxu1 }
  0x92   : > { %v501_v16 = vadd.f32 %v997_v11, %v500_v15 }
  0x93   : > { %v537_v17 = vmul.f32 0.35355338, %v464_v14 }
  0x94   : > { %v539_v18 = vpack.c.bf16 %v501_v16, %v501_v16 }
  0x95   : > { %v538_v19 = vpack.c.bf16 %v537_v17, %v537_v17 }
  0x96   : > { %v561_v20 = vsel %vm450_vm0, %v539_v18, 0 }
  0x97   : > { %v553_v24 = vunpack.c.l.bf16 %v538_v19  ;;  %570 = vmatpush.bf16.xpose.msra.mxu3 %v561_v20  ;;  %630 = vmatpush.bf16.xpose.msrb.mxu1 %v561_v20 }
  0x98   : > { %v465_v25 = vpop.f32.mrf.mxu0  ;;  %v533_v7 = vpop.f32.mrf.mxu2 }
  0x99   : > { %v502_v26 = vpop.f32.mrf.mxu1  ;;  %v555_v27 = vmul.f32 %v1144_v22, %v553_v24  ;;  %v618_v28 = vmul.f32 %v1146_v23, %v553_v24  ;;  %v673_v33 = vmul.f32 %v1152_v31, %v553_v24  ;;  %v728_v34 = vmul.f32 %v1154_v32, %v553_v24 }
  0x9a   : > { %v534_v9 = vadd.f32 %v998_v2, %v533_v7 }
  0x9b   : > { %v556_v29 = vpack.c.bf16 %v555_v27, %v555_v27  ;;  %v619_v30 = vpack.c.bf16 %v618_v28, %v618_v28  ;;  %v674_v35 = vpack.c.bf16 %v673_v33, %v673_v33  ;;  %v729_v36 = vpack.c.bf16 %v728_v34, %v728_v34 }
  0x9c   : > { %v540_v10 = vpack.c.bf16 %v534_v9, %v534_v9 }
  0x9e   : > { %955 = vmatmul.msk.bf16.vlgmr.msra.gmra.mxu3 %vm450_vm0, %v556_v29  ;;  %958 = vmatmul.msk.bf16.vlgmr.msrb.gmra.mxu1 %vm450_vm0, %v619_v30  ;;  %v594_v12 = vsel %vm592_vm13, %v540_v10, 0 }
  0x9f   : > { %685 = vmatpush.bf16.xpose.msrb.mxu3 %v561_v20  ;;  %740 = vmatpush.bf16.xpose.msra.mxu1 %v561_v20 }
  0xa0   : > { %603 = vmatpush.bf16.msrb.mxu0 %v594_v12  ;;  %658 = vmatpush.bf16.msrb.mxu2 %v594_v12  ;;  %v535_v16 = vpop.f32.mrf.mxu2 }
  0xa4   : > { %713 = vmatpush.bf16.msra.mxu0 %v594_v12  ;;  %768 = vmatpush.bf16.msra.mxu2 %v594_v12 }
  0xae   : > { %961 = vmatmul.msk.bf16.vlgmr.msrb.gmra.mxu3 %vm450_vm0, %v674_v35  ;;  %964 = vmatmul.msk.bf16.vlgmr.msra.gmra.mxu1 %vm450_vm0, %v729_v36 }
 0x11b   : > { %v632_v40 = vpop.f32.mrf.mxu1 }
 0x11c   : > { %v633_v42 = vadd.f32 %v632_v40, %v546_v38  ;;  %v984_v40 = vld [vmem:[%s1223_s8 + $0x8] sm:$0xff] }
 0x11d   : > { %806 = vmatpush.bf16.msra.mxu3 %v984_v40 }
 0x11e   : > { %v636_v43 = vsel %vm576_vm12, %v633_v42, -inf }
 0x11f   : > { %637 = vmax.xlane.f32.xlu0 %v636_v43 }
 0x121   : > { %v572_v44 = vpop.f32.mrf.mxu3  ;;  %807 = vmatpush.bf16.msra.mxu3 %v983_v41 }
 0x122   : > { %v573_v45 = vadd.f32 %v572_v44, %v546_v38 }
 0x123   : > { %v634_v46 = vpop.f32.mrf.mxu1 }
 0x124   : > { %v577_v47 = vsel %vm576_vm12, %v573_v45, -inf }
 0x127   : > { %578 = vmax.xlane.f32.xlu0 %v577_v47 }
 0x129   : > { %v574_v48 = vpop.f32.mrf.mxu3 }
 0x12b   : > { %v742_v49 = vpop.f32.mrf.mxu1 }
 0x12c   : > { %v743_v50 = vadd.f32 %v742_v49, %v546_v38 }
 0x12e   : > { %v746_v51 = vsel %vm576_vm12, %v743_v50, -inf }
 0x12f   : > { %747 = vmax.xlane.f32.xlu1 %v746_v51 }
 0x131   : > { %v687_v52 = vpop.f32.mrf.mxu3 }
 0x132   : > { %v688_v53 = vadd.f32 %v687_v52, %v546_v38 }
 0x133   : > { %v744_v54 = vpop.f32.mrf.mxu1 }
 0x134   : > { %v691_v55 = vsel %vm576_vm12, %v688_v53, -inf }
 0x137   : > { %692 = vmax.xlane.f32.xlu1 %v691_v55 }
 0x139   : > { %v689_v56 = vpop.f32.mrf.mxu3 }
 0x192   : > { %v638_v57 = vpop.xlane.xlu0 %637 }
 0x193   : > { %v639_v58 = vsub.f32 %v633_v42, %v638_v57 }
 0x195   : > { %v640_v59 = vmul.f32 1.442695, %v639_v58 }
 0x197   : > { %1002 = vpow2.f32 %v640_v59 }
 0x19a   : > { %v579_v60 = vpop.xlane.xlu0 %578 }
 0x19b   : > { %v580_v61 = vsub.f32 %v573_v45, %v579_v60 }
 0x19d   : > { %v1003_v62 = vpop.eup %1002  ;;  %v581_v63 = vmul.f32 1.442695, %v580_v61 }
 0x19e   : > { %v642_v0 = vsel %vm576_vm12, %v1003_v62, 0.0 }
 0x19f   : > { %1004 = vpow2.f32 %v581_v63  ;;  %643 = vadd.xlane.f32.xlu2 %v642_v0 }
 0x1a2   : > { %v748_v1 = vpop.xlane.xlu1 %747 }
 0x1a3   : > { %v749_v3 = vsub.f32 %v743_v50, %v748_v1 }
 0x1a5   : > { %v1005_v5 = vpop.eup %1004  ;;  %v750_v6 = vmul.f32 1.442695, %v749_v3 }
 0x1a6   : > { %v583_v8 = vsel %vm576_vm12, %v1005_v5, 0.0 }
 0x1a7   : > { %1006 = vpow2.f32 %v750_v6  ;;  %584 = vadd.xlane.f32.xlu2 %v583_v8 }
 0x1aa   : > { %v693_v11 = vpop.xlane.xlu1 %692 }
 0x1ab   : > { %v694_v13 = vsub.f32 %v688_v53, %v693_v11 }
 0x1ad   : > { %v1007_v14 = vpop.eup %1006  ;;  %v695_v15 = vmul.f32 1.442695, %v694_v13 }
 0x1ae   : > { %v752_v17 = vsel %vm576_vm12, %v1007_v14, 0.0 }
 0x1af   : > { %1008 = vpow2.f32 %v695_v15  ;;  %753 = vadd.xlane.f32.xlu0 %v752_v17  ;;  %v1000_v17 = vld [vmem:[%s1225_s10] ss:$0 sm:$0xff] }
 0x1b5   : > { %v1009_v18 = vpop.eup %1008 }
 0x1b6   : > { %v697_v19 = vsel %vm576_vm12, %v1009_v18, 0.0 }
 0x1b7   : > { %698 = vadd.xlane.f32.xlu1 %v697_v19  ;;  %v1001_v19 = vld [vmem:[%s1226_s11] ss:$0 sm:$0xff] }
 0x212   : > { %v644_v20 = vpop.xlane.xlu2 %643 }
 0x213   : > { %1010 = vrcp.f32 %v644_v20 }
 0x219   : > { %v1011_v21 = vpop.eup %1010 }
 0x21a   : > { %v646_v24 = vmul.f32 %v1011_v21, %v1003_v62  ;;  %v585_v25 = vpop.xlane.xlu2 %584 }
 0x21b   : > { %1012 = vrcp.f32 %v585_v25 }
 0x21c   : > { %v647_v26 = vpack.c.bf16 %v646_v24, %v646_v24 }
 0x21e   : > { %959 = vmatmul.msk.bf16.vlgmr.msrb.gmra.mxu2 %vm576_vm12, %v647_v26 }
 0x221   : > { %v1013_v27 = vpop.eup %1012 }
 0x222   : > { %v587_v28 = vmul.f32 %v1013_v27, %v1005_v5  ;;  %v754_v29 = vpop.xlane.xlu0 %753 }
 0x223   : > { %1014 = vrcp.f32 %v754_v29 }
 0x224   : > { %v588_v30 = vpack.c.bf16 %v587_v28, %v587_v28 }
 0x226   : > { %956 = vmatmul.msk.bf16.vlgmr.msrb.gmra.mxu0 %vm576_vm12, %v588_v30 }
 0x229   : > { %v1015_v33 = vpop.eup %1014 }
 0x22a   : > { %v756_v34 = vmul.f32 %v1015_v33, %v1007_v14  ;;  %v699_v35 = vpop.xlane.xlu1 %698 }
 0x22b   : > { %1016 = vrcp.f32 %v699_v35 }
 0x22c   : > { %v757_v36 = vpack.c.bf16 %v756_v34, %v756_v34 }
 0x22e   : > { %965 = vmatmul.msk.bf16.vlgmr.msra.gmra.mxu2 %vm576_vm12, %v757_v36 }
 0x231   : > { %v1017_v37 = vpop.eup %1016 }
 0x232   : > { %v701_v38 = vmul.f32 %v1017_v37, %v1009_v18 }
 0x234   : > { %v702_v39 = vpack.c.bf16 %v701_v38, %v701_v38 }
 0x236   : > { %962 = vmatmul.msk.bf16.vlgmr.msra.gmra.mxu0 %vm576_vm12, %v702_v39 }
 0x2a1   : > { %v660_v42 = vpop.f32.mrf.mxu2 }
 0x2a2   : > { %v664_v48 = vmul.f32 %v1146_v23, %v660_v42 }
 0x2a3   : > { %v605_v43 = vpop.f32.mrf.mxu0 }
 0x2a4   : > { %v609_v46 = vmul.f32 %v1144_v22, %v605_v43  ;;  %v999_v22 = vld [vmem:[%s1224_s9] ss:$0 sm:$0xff] }
 0x2a6   : > { %v665_v50 = vadd.f32 %v664_v48, %v609_v46 }
 0x2a9   : > { %v662_v44 = vpop.f32.mrf.mxu2 }
 0x2ab   : > { %v607_v45 = vpop.f32.mrf.mxu0 }
 0x2b1   : > { %v770_v47 = vpop.f32.mrf.mxu2 }
 0x2b2   : > { %v774_v52 = vmul.f32 %v1154_v32, %v770_v47  ;;  %v1032_v32 = vmov 32.0  }
 0x2b3   : > { %v715_v49 = vpop.f32.mrf.mxu0  ;;  %1018 = vrcp.f32 %v1032_v32 }
 0x2b4   : > { %v719_v51 = vmul.f32 %v1152_v31, %v715_v49 }
 0x2b6   : > { %v720_v53 = vadd.f32 %v719_v51, %v665_v50 }
 0x2b8   : > { %v775_v54 = vadd.f32 %v774_v52, %v720_v53 }
 0x2b9   : > { %v772_v55 = vpop.f32.mrf.mxu2  ;;  %v1019_v61 = vpop.eup %1018 }
 0x2ba   : > { %v776_v56 = vpack.c.bf16 %v775_v54, %v775_v54  ;;  %v820_v62 = vmul.f32 32.0, %v1019_v61  ;;  %vm824_vm14 = vweird.f32 %v1019_v61 }
 0x2bb   : > { %v717_v57 = vpop.f32.mrf.mxu0 }
 0x2bc   : > { %974 = vmatmul.msk.bf16.vlgmr.msra.gmra.mxu3 %vm450_vm0, %v776_v56  ;;  %v821_v63 = vsub.f32 1.0, %v820_v62 }
 0x2be   : > { %v822_v0 = vmul.f32 %v1019_v61, %v821_v63 }
 0x2c0   : > { %v823_v1 = vadd.f32 %v1019_v61, %v822_v0 }
 0x2c2   : > { %v825_v2 = vsel %vm824_vm14, %v1019_v61, %v823_v1 }
 0x33f   : > { %v809_v58 = vpop.f32.mrf.mxu3 }
 0x340   : > { %v810_v59 = vadd.f32 %v999_v22, %v809_v58 }
 0x342   : > { %v813_v23 = vadd.f32 %v810_v59, %v1124_v4 }
 0x344   : > { %v816_v60 = vsel %vm450_vm0, %v813_v23, 0.0 }
 0x345   : > { %817 = vadd.xlane.f32.xlu2 %v816_v60 }
 0x347   : > { %v811_v31 = vpop.f32.mrf.mxu3 }
 0x3b8   : > { %v818_v3 = vpop.xlane.xlu2 %817 }
 0x3b9   : > { %v826_v5 = vmul.f32 %v825_v2, %v818_v3 }
 0x3bb   : > { %v827_v6 = vsub.f32 %v813_v23, %v826_v5 }
 0x3bd   : > { %v828_v7 = vmul.f32 %v827_v6, %v827_v6 }
 0x3bf   : > { %v829_v8 = vsel %vm450_vm0, %v828_v7, 0.0 }
 0x3c0   : > { %830 = vadd.xlane.f32.xlu0 %v829_v8 }
 0x433   : > { %v831_v4 = vpop.xlane.xlu0 %830 }
 0x434   : > { %v832_v9 = vmul.f32 %v831_v4, %v825_v2 }
 0x436   : > { %v833_v10 = vadd.f32 1e-05, %v832_v9 }
 0x438   : > { %1020 = vrsqrt.f32 %v833_v10  ;;  %vm840_vm1 = vweird.f32 %v833_v10 }
 0x43e   : > { %v1021_v11 = vpop.eup %1020 }
 0x43f   : > { %v835_v12 = vmul.f32 %v1021_v11, %v833_v10  ;;  %vm841_vm15 = vweird.f32 %v1021_v11 }
 0x440   : > { %vm842_vm2 = vmor %vm840_vm1, %vm841_vm15 }
 0x441   : > { %v836_v13 = vmul.f32 %v1021_v11, %v835_v12 }
 0x443   : > { %v837_v14 = vmul.f32 0.5, %v836_v13 }
 0x445   : > { %v838_v15 = vsub.f32 1.5, %v837_v14 }
 0x447   : > { %v839_v16 = vmul.f32 %v1021_v11, %v838_v15 }
 0x449   : > { %v843_v18 = vsel %vm842_vm2, %v1021_v11, %v839_v16 }
 0x44a   : > { %v844_v20 = vmul.f32 %v843_v18, %v827_v6 }
 0x44c   : > { %v848_v21 = vmul.f32 %v1000_v17, %v844_v20 }
 0x44e   : > { %v852_v24 = vadd.f32 %v1001_v19, %v848_v21 }
 0x450   : > { %853 = vst.msk [vmem:[%s425_s27] sm:$0xff] %vm450_vm0, %v852_v24 }
 0x451 PF: > { %s22_s21 = sadd.s32 1, %s1028_s21  }
 0x452   : > { %p19_p4 = scmp.ge.s32.totalorder %s22_s21, 4  }
 0x454   :  { %21 = sbr.rel (!%p19_p4) target bundleno = 1 (0x1), region = 101 }

// kernel: _lambda_.19
= control target key start
LH: loop header
LB: loop body
LE: loop exit
PB: predicated region body
PF: predicated region fallthrough
CT: control target
= control target key end

     0   :  { %s1092_s21 = smov 0   ;;  %s1207_s0 = inlined_call_operand.vmem [shape: f32[2,8,32], index: 0, kind: input, shape index: {}]   ;;  %s1208_s1 = inlined_call_operand.vmem [shape: f32[2,4,32], index: 1, kind: input, shape index: {}]   ;;  %s1209_s2 = inlined_call_operand.vmem [shape: bf16[32,32], index: 2, kind: input, shape index: {}]   ;;  %s1210_s3 = inlined_call_operand.vmem [shape: f32[1,32], index: 3, kind: input, shape index: {}]   ;;  %s1211_s4 = inlined_call_operand.vmem [shape: bf16[32,32], index: 4, kind: input, shape index: {}]   ;;  %s1212_s5 = inlined_call_operand.vmem [shape: f32[1,32], index: 5, kind: input, shape index: {}]   ;;  %s1213_s6 = inlined_call_operand.vmem [shape: bf16[32,32], index: 6, kind: input, shape index: {}]   ;;  %s1214_s7 = inlined_call_operand.vmem [shape: f32[1,32], index: 7, kind: input, shape index: {}]   ;;  %s1215_s8 = inlined_call_operand.vmem [shape: bf16[32,32], index: 8, kind: input, shape index: {}]   ;;  %s1216_s9 = inlined_call_operand.vmem [shape: f32[1,32], index: 9, kind: input, shape index: {}]   ;;  %s1217_s10 = inlined_call_operand.vmem [shape: f32[1,32], index: 10, kind: input, shape index: {}]   ;;  %s1218_s11 = inlined_call_operand.vmem [shape: f32[1,32], index: 11, kind: input, shape index: {}]   ;;  %s1219_s12 = inlined_call_operand.vmem [shape: f32[2,8,32], index: 12, kind: output, shape index: {}]  }
   0x1 LB: > { %s915_s22 = sadd.s32 4294967295, %s1023_s21   ;;  %p919_p0 = scmp.ge.s32.totalorder %s1023_s21, 1  ;;  %s1023_s21 = sphi %s1092_s21, %s22_s21  }
   0x2   : > { %p370_p1 = scmp.lt.s32.totalorder %s1023_s21, 3 }
   0x4   : > { %p371_p2 = pnand %p919_p0, %p370_p1 }
   0x5   : > { %p414_p3 = scmp.lt.s32.totalorder (!%p371_p2), %s915_s22, 1 }
   0x6   : > { %374 = sbr.rel (%p371_p2) target bundleno = 1103 (0x44f), region = 68 }
   0xb   : > { %v974_v0 = vld [vmem:[%s1209_s2 + $0x8] sm:$0xff]  ;;  %v973_v2 = vld [vmem:[%s1209_s2] sm:$0xff]  ;;  %s1221_s22 = smov (!%p414_p3, %s915_s22), 1  ;;  %vm450_vm0 = vcmask 261120   ;;  %v541_v8 = vlaneseq  ;;  %v1025_v20 = vmov 0.0   ;;  %vm572_vm11 = vcmask 31744  }
   0xc   : > { %v976_v1 = vld [vmem:[%s1211_s4 + $0x8] sm:$0xff]  ;;  %460 = vmatpush.bf16.msra.mxu0 %v974_v0  ;;  %v975_v3 = vld [vmem:[%s1211_s4] sm:$0xff]  ;;  %s920_s13 = sshll.u32 %s1221_s22, 3  ;;  %s921_s14 = sshll.u32 %s1221_s22, 2  ;;  %vm588_vm12 = vcmask 1041408  }
   0xd   : > { %497 = vmatpush.bf16.msra.mxu1 %v976_v1  ;;  %s417_s17 = scalar_lea.vmem %s1207_s0, %s920_s13  ;;  %s421_s20 = scalar_lea.vmem %s1208_s1, %s921_s14  ;;  %v542_v9 = vand.u32 127, %v541_v8  ;;  %v991_v10 = vld [vmem:[%s1210_s3] ss:$0 sm:$0xff]  ;;  %v978_v36 = vld [vmem:[%s1213_s6 + $0x8] sm:$0xff] }
   0xe   : > { %v1121_v4 = vld [vmem:[%s417_s17] sm:$0xff]  ;;  %530 = vmatpush.bf16.msra.mxu2 %v978_v36  ;;  %s425_s30 = scalar_lea.vmem %s1219_s12, %s920_s13 }
   0xf   : > { %v429_v5 = vpack.c.bf16 %v1121_v4, %v1121_v4  ;;  %v428_v6 = vld [vmem:[%s421_s20] sm:$0xf]  ;;  %vm607_vm1 = vcmp.ge.s32.totalorder %v542_v9, 8  ;;  %vm608_vm2 = vcmp.lt.s32.totalorder %v542_v9, 16  ;;  %vm544_vm3 = vcmp.lt.s32.totalorder %v542_v9, 8 }
  0x10   : > { %461 = vmatpush.bf16.msra.mxu0 %v973_v2  ;;  %v467_v7 = vpack.c.bf16 %v428_v6, %v428_v6  ;;  %v992_v11 = vld [vmem:[%s1212_s5] ss:$0 sm:$0xff]  ;;  %vm609_vm4 = vmand %vm607_vm1, %vm608_vm2  ;;  %v1137_v21 = vsel %vm544_vm3, 1.0, %v1025_v20  ;;  %vm662_vm5 = vcmp.ge.s32.totalorder %v542_v9, 16  ;;  %vm663_vm6 = vcmp.lt.s32.totalorder %v542_v9, 24 }
  0x11   : > { %498 = vmatpush.bf16.msra.mxu1 %v975_v3  ;;  %v1139_v22 = vsel %vm609_vm4, 1.0, %v1025_v20  ;;  %vm717_vm7 = vcmp.ge.s32.totalorder %v542_v9, 24  ;;  %vm718_vm8 = vcmp.lt.s32.totalorder %v542_v9, 32  ;;  %vm664_vm9 = vmand %vm662_vm5, %vm663_vm6  ;;  %v977_v38 = vld [vmem:[%s1213_s6] sm:$0xff] }
  0x12   : > { %vm719_vm10 = vmand %vm717_vm7, %vm718_vm8  ;;  %v1145_v30 = vsel %vm664_vm9, 1.0, %v1025_v20  ;;  %531 = vmatpush.bf16.msra.mxu2 %v977_v38  ;;  %v993_v60 = vld [vmem:[%s1214_s7] ss:$0 sm:$0xff] }
  0x13   : > { %931 = vmatmul.msk.bf16.vlgmr.msra.gmra.mxu0 %vm450_vm0, %v429_v5  ;;  %v1147_v31 = vsel %vm719_vm10, 1.0, %v1025_v20 }
  0x14   : > { %940 = vmatmul.msk.bf16.vlgmr.msra.gmra.mxu1 %vm450_vm0, %v467_v7 }
  0x15   : > { %949 = vmatmul.msk.bf16.vlgmr.msra.gmra.mxu2 %vm450_vm0, %v467_v7 }
  0x90   : > { %v463_v12 = vpop.f32.mrf.mxu0 }
  0x91   : > { %v464_v13 = vadd.f32 %v991_v10, %v463_v12  ;;  %v500_v14 = vpop.f32.mrf.mxu1 }
  0x92   : > { %v501_v15 = vadd.f32 %v992_v11, %v500_v14 }
  0x93   : > { %v537_v16 = vmul.f32 0.35355338, %v464_v13 }
  0x94   : > { %v539_v17 = vpack.c.bf16 %v501_v15, %v501_v15 }
  0x95   : > { %v538_v18 = vpack.c.bf16 %v537_v16, %v537_v16 }
  0x96   : > { %v557_v19 = vsel %vm450_vm0, %v539_v17, 0 }
  0x97   : > { %v549_v23 = vunpack.c.l.bf16 %v538_v18  ;;  %566 = vmatpush.bf16.xpose.msra.mxu3 %v557_v19  ;;  %626 = vmatpush.bf16.xpose.msrb.mxu1 %v557_v19 }
  0x98   : > { %v465_v24 = vpop.f32.mrf.mxu0  ;;  %v533_v0 = vpop.f32.mrf.mxu2 }
  0x99   : > { %v502_v25 = vpop.f32.mrf.mxu1  ;;  %v551_v26 = vmul.f32 %v1137_v21, %v549_v23  ;;  %v614_v27 = vmul.f32 %v1139_v22, %v549_v23  ;;  %v669_v32 = vmul.f32 %v1145_v30, %v549_v23  ;;  %v724_v33 = vmul.f32 %v1147_v31, %v549_v23 }
  0x9a   : > { %v534_v1 = vadd.f32 %v993_v60, %v533_v0 }
  0x9b   : > { %v552_v28 = vpack.c.bf16 %v551_v26, %v551_v26  ;;  %v615_v29 = vpack.c.bf16 %v614_v27, %v614_v27  ;;  %v670_v34 = vpack.c.bf16 %v669_v32, %v669_v32  ;;  %v725_v35 = vpack.c.bf16 %v724_v33, %v724_v33  ;;  %v980_v33 = vld [vmem:[%s1215_s8 + $0x8] sm:$0xff] }
  0x9c   : > { %v540_v3 = vpack.c.bf16 %v534_v1, %v534_v1 }
  0x9e   : > { %951 = vmatmul.msk.bf16.vlgmr.msra.gmra.mxu3 %vm450_vm0, %v552_v28  ;;  %954 = vmatmul.msk.bf16.vlgmr.msrb.gmra.mxu1 %vm450_vm0, %v615_v29  ;;  %v590_v6 = vsel %vm588_vm12, %v540_v3, 0 }
  0x9f   : > { %681 = vmatpush.bf16.xpose.msrb.mxu3 %v557_v19  ;;  %736 = vmatpush.bf16.xpose.msra.mxu1 %v557_v19 }
  0xa0   : > { %599 = vmatpush.bf16.msrb.mxu0 %v590_v6  ;;  %654 = vmatpush.bf16.msrb.mxu2 %v590_v6  ;;  %v535_v10 = vpop.f32.mrf.mxu2 }
  0xa1   : > { %v995_v10 = vld [vmem:[%s1217_s10] ss:$0 sm:$0xff] }
  0xa4   : > { %709 = vmatpush.bf16.msra.mxu0 %v590_v6  ;;  %764 = vmatpush.bf16.msra.mxu2 %v590_v6 }
  0xa7   : > { %802 = vmatpush.bf16.msra.mxu3 %v980_v33 }
  0xae   : > { %957 = vmatmul.msk.bf16.vlgmr.msrb.gmra.mxu3 %vm450_vm0, %v670_v34  ;;  %960 = vmatmul.msk.bf16.vlgmr.msra.gmra.mxu1 %vm450_vm0, %v725_v35  ;;  %v979_v34 = vld [vmem:[%s1215_s8] sm:$0xff] }
  0xaf   : > { %803 = vmatpush.bf16.msra.mxu3 %v979_v34 }
 0x11b   : > { %v628_v37 = vpop.f32.mrf.mxu1 }
 0x11c   : > { %v632_v39 = vsel %vm572_vm11, %v628_v37, -inf }
 0x11d   : > { %633 = vmax.xlane.f32.xlu0 %v632_v39 }
 0x121   : > { %v568_v40 = vpop.f32.mrf.mxu3 }
 0x122   : > { %v573_v42 = vsel %vm572_vm11, %v568_v40, -inf }
 0x123   : > { %v630_v41 = vpop.f32.mrf.mxu1 }
 0x125   : > { %574 = vmax.xlane.f32.xlu0 %v573_v42 }
 0x129   : > { %v570_v43 = vpop.f32.mrf.mxu3 }
 0x12b   : > { %v738_v44 = vpop.f32.mrf.mxu1 }
 0x12c   : > { %v742_v45 = vsel %vm572_vm11, %v738_v44, -inf }
 0x12d   : > { %743 = vmax.xlane.f32.xlu1 %v742_v45 }
 0x131   : > { %v683_v46 = vpop.f32.mrf.mxu3 }
 0x132   : > { %v687_v48 = vsel %vm572_vm11, %v683_v46, -inf }
 0x133   : > { %v740_v47 = vpop.f32.mrf.mxu1 }
 0x135   : > { %688 = vmax.xlane.f32.xlu1 %v687_v48 }
 0x139   : > { %v685_v49 = vpop.f32.mrf.mxu3 }
 0x190   : > { %v634_v50 = vpop.xlane.xlu0 %633 }
 0x191   : > { %v635_v51 = vsub.f32 %v628_v37, %v634_v50 }
 0x193   : > { %v636_v52 = vmul.f32 1.442695, %v635_v51 }
 0x195   : > { %997 = vpow2.f32 %v636_v52 }
 0x198   : > { %v575_v53 = vpop.xlane.xlu0 %574 }
 0x199   : > { %v576_v54 = vsub.f32 %v568_v40, %v575_v53 }
 0x19b   : > { %v998_v55 = vpop.eup %997  ;;  %v577_v56 = vmul.f32 1.442695, %v576_v54 }
 0x19c   : > { %v638_v57 = vsel %vm572_vm11, %v998_v55, 0.0 }
 0x19d   : > { %999 = vpow2.f32 %v577_v56  ;;  %639 = vadd.xlane.f32.xlu2 %v638_v57 }
 0x1a0   : > { %v744_v58 = vpop.xlane.xlu1 %743 }
 0x1a1   : > { %v745_v59 = vsub.f32 %v738_v44, %v744_v58 }
 0x1a3   : > { %v1000_v61 = vpop.eup %999  ;;  %v746_v62 = vmul.f32 1.442695, %v745_v59 }
 0x1a4   : > { %v579_v63 = vsel %vm572_vm11, %v1000_v61, 0.0 }
 0x1a5   : > { %1001 = vpow2.f32 %v746_v62  ;;  %580 = vadd.xlane.f32.xlu2 %v579_v63 }
 0x1a8   : > { %v689_v2 = vpop.xlane.xlu1 %688 }
 0x1a9   : > { %v690_v5 = vsub.f32 %v683_v46, %v689_v2 }
 0x1ab   : > { %v1002_v7 = vpop.eup %1001  ;;  %v691_v8 = vmul.f32 1.442695, %v690_v5 }
 0x1ac   : > { %v748_v9 = vsel %vm572_vm11, %v1002_v7, 0.0 }
 0x1ad   : > { %1003 = vpow2.f32 %v691_v8  ;;  %749 = vadd.xlane.f32.xlu0 %v748_v9 }
 0x1b3   : > { %v1004_v11 = vpop.eup %1003 }
 0x1b4   : > { %v693_v12 = vsel %vm572_vm11, %v1004_v11, 0.0 }
 0x1b5   : > { %694 = vadd.xlane.f32.xlu1 %v693_v12  ;;  %v996_v12 = vld [vmem:[%s1218_s11] ss:$0 sm:$0xff] }
 0x210   : > { %v640_v13 = vpop.xlane.xlu2 %639 }
 0x211   : > { %1005 = vrcp.f32 %v640_v13 }
 0x217   : > { %v1006_v14 = vpop.eup %1005 }
 0x218   : > { %v642_v15 = vmul.f32 %v1006_v14, %v998_v55  ;;  %v581_v16 = vpop.xlane.xlu2 %580 }
 0x219   : > { %1007 = vrcp.f32 %v581_v16 }
 0x21a   : > { %v643_v17 = vpack.c.bf16 %v642_v15, %v642_v15 }
 0x21c   : > { %955 = vmatmul.msk.bf16.vlgmr.msrb.gmra.mxu2 %vm572_vm11, %v643_v17 }
 0x21f   : > { %v1008_v18 = vpop.eup %1007 }
 0x220   : > { %v583_v19 = vmul.f32 %v1008_v18, %v1000_v61  ;;  %v750_v20 = vpop.xlane.xlu0 %749 }
 0x221   : > { %1009 = vrcp.f32 %v750_v20 }
 0x222   : > { %v584_v23 = vpack.c.bf16 %v583_v19, %v583_v19 }
 0x224   : > { %952 = vmatmul.msk.bf16.vlgmr.msrb.gmra.mxu0 %vm572_vm11, %v584_v23 }
 0x227   : > { %v1010_v24 = vpop.eup %1009 }
 0x228   : > { %v752_v25 = vmul.f32 %v1010_v24, %v1002_v7  ;;  %v695_v26 = vpop.xlane.xlu1 %694 }
 0x229   : > { %1011 = vrcp.f32 %v695_v26 }
 0x22a   : > { %v753_v27 = vpack.c.bf16 %v752_v25, %v752_v25 }
 0x22c   : > { %961 = vmatmul.msk.bf16.vlgmr.msra.gmra.mxu2 %vm572_vm11, %v753_v27 }
 0x22f   : > { %v1012_v28 = vpop.eup %1011 }
 0x230   : > { %v697_v29 = vmul.f32 %v1012_v28, %v1004_v11 }
 0x232   : > { %v698_v32 = vpack.c.bf16 %v697_v29, %v697_v29 }
 0x234   : > { %958 = vmatmul.msk.bf16.vlgmr.msra.gmra.mxu0 %vm572_vm11, %v698_v32 }
 0x29f   : > { %v656_v35 = vpop.f32.mrf.mxu2 }
 0x2a0   : > { %v660_v41 = vmul.f32 %v1139_v22, %v656_v35 }
 0x2a1   : > { %v601_v36 = vpop.f32.mrf.mxu0 }
 0x2a2   : > { %v605_v39 = vmul.f32 %v1137_v21, %v601_v36  ;;  %v994_v21 = vld [vmem:[%s1216_s9] ss:$0 sm:$0xff] }
 0x2a4   : > { %v661_v43 = vadd.f32 %v660_v41, %v605_v39 }
 0x2a7   : > { %v658_v37 = vpop.f32.mrf.mxu2 }
 0x2a9   : > { %v603_v38 = vpop.f32.mrf.mxu0 }
 0x2af   : > { %v766_v40 = vpop.f32.mrf.mxu2 }
 0x2b0   : > { %v770_v45 = vmul.f32 %v1147_v31, %v766_v40  ;;  %v1026_v31 = vmov 32.0  }
 0x2b1   : > { %v711_v42 = vpop.f32.mrf.mxu0  ;;  %1013 = vrcp.f32 %v1026_v31 }
 0x2b2   : > { %v715_v44 = vmul.f32 %v1145_v30, %v711_v42 }
 0x2b4   : > { %v716_v46 = vadd.f32 %v715_v44, %v661_v43 }
 0x2b6   : > { %v771_v47 = vadd.f32 %v770_v45, %v716_v46 }
 0x2b7   : > { %v768_v48 = vpop.f32.mrf.mxu2  ;;  %v1014_v54 = vpop.eup %1013 }
 0x2b8   : > { %v772_v49 = vpack.c.bf16 %v771_v47, %v771_v47  ;;  %v816_v55 = vmul.f32 32.0, %v1014_v54  ;;  %vm820_vm13 = vweird.f32 %v1014_v54 }
 0x2b9   : > { %v713_v50 = vpop.f32.mrf.mxu0 }
 0x2ba   : > { %970 = vmatmul.msk.bf16.vlgmr.msra.gmra.mxu3 %vm450_vm0, %v772_v49  ;;  %v817_v56 = vsub.f32 1.0, %v816_v55 }
 0x2bc   : > { %v818_v57 = vmul.f32 %v1014_v54, %v817_v56 }
 0x2be   : > { %v819_v58 = vadd.f32 %v1014_v54, %v818_v57 }
 0x2c0   : > { %v821_v59 = vsel %vm820_vm13, %v1014_v54, %v819_v58 }
 0x33d   : > { %v805_v51 = vpop.f32.mrf.mxu3 }
 0x33e   : > { %v806_v52 = vadd.f32 %v994_v21, %v805_v51 }
 0x340   : > { %v809_v22 = vadd.f32 %v806_v52, %v1121_v4 }
 0x342   : > { %v812_v53 = vsel %vm450_vm0, %v809_v22, 0.0 }
 0x343   : > { %813 = vadd.xlane.f32.xlu2 %v812_v53 }
 0x345   : > { %v807_v30 = vpop.f32.mrf.mxu3 }
 0x3b6   : > { %v814_v60 = vpop.xlane.xlu2 %813 }
 0x3b7   : > { %v822_v61 = vmul.f32 %v821_v59, %v814_v60 }
 0x3b9   : > { %v823_v62 = vsub.f32 %v809_v22, %v822_v61 }
 0x3bb   : > { %v824_v63 = vmul.f32 %v823_v62, %v823_v62 }
 0x3bd   : > { %v825_v0 = vsel %vm450_vm0, %v824_v63, 0.0 }
 0x3be   : > { %826 = vadd.xlane.f32.xlu0 %v825_v0 }
 0x431   : > { %v827_v4 = vpop.xlane.xlu0 %826 }
 0x432   : > { %v828_v1 = vmul.f32 %v827_v4, %v821_v59 }
 0x434   : > { %v829_v2 = vadd.f32 1e-05, %v828_v1 }
 0x436   : > { %1015 = vrsqrt.f32 %v829_v2  ;;  %vm836_vm15 = vweird.f32 %v829_v2 }
 0x43c   : > { %v1016_v3 = vpop.eup %1015 }
 0x43d   : > { %v831_v5 = vmul.f32 %v1016_v3, %v829_v2  ;;  %vm837_vm14 = vweird.f32 %v1016_v3 }
 0x43e   : > { %vm838_vm1 = vmor %vm836_vm15, %vm837_vm14 }
 0x43f   : > { %v832_v6 = vmul.f32 %v1016_v3, %v831_v5 }
 0x441   : > { %v833_v7 = vmul.f32 0.5, %v832_v6 }
 0x443   : > { %v834_v8 = vsub.f32 1.5, %v833_v7 }
 0x445   : > { %v835_v9 = vmul.f32 %v1016_v3, %v834_v8 }
 0x447   : > { %v839_v11 = vsel %vm838_vm1, %v1016_v3, %v835_v9 }
 0x448   : > { %v840_v13 = vmul.f32 %v839_v11, %v823_v62 }
 0x44a   : > { %v844_v14 = vmul.f32 %v995_v10, %v840_v13 }
 0x44c   : > { %v848_v15 = vadd.f32 %v996_v12, %v844_v14 }
 0x44e   : > { %849 = vst.msk [vmem:[%s425_s30] sm:$0xff] %vm450_vm0, %v848_v15 }
 0x44f PF: > { %s22_s21 = sadd.s32 1, %s1023_s21  }
 0x450   : > { %p19_p4 = scmp.ge.s32.totalorder %s22_s21, 4  }
 0x452   :  { %21 = sbr.rel (!%p19_p4) target bundleno = 1 (0x1), region = 101 }

// kernel: _lambda_.21
= control target key start
LH: loop header
LB: loop body
LE: loop exit
PB: predicated region body
PF: predicated region fallthrough
CT: control target
= control target key end

     0   :  { %vm25_vm0 = vcmask 261120   ;;  %s220_s0 = inlined_call_operand.vmem [shape: f32[8,32], index: 0, kind: input, shape index: {}]   ;;  %s221_s1 = inlined_call_operand.vmem [shape: f32[1,32], index: 1, kind: input, shape index: {}]   ;;  %s222_s2 = inlined_call_operand.vmem [shape: f32[1,32], index: 2, kind: input, shape index: {}]   ;;  %s223_s3 = inlined_call_operand.vmem [shape: bf16[32,4], index: 3, kind: input, shape index: {}]   ;;  %s224_s4 = inlined_call_operand.vmem [shape: f32[1,4], index: 4, kind: input, shape index: {}]   ;;  %s225_s5 = inlined_call_operand.hbm [shape: f32[8,4], index: 5, kind: output, shape index: {}]  }
   0x1   :  { %v22_v0 = vld [vmem:[%s220_s0] sm:$0xff] }
   0x2   :  { %v26_v1 = vsel %vm25_vm0, %v22_v0, 0.0 }
   0x3   :  { %27 = vadd.xlane.f32.xlu0 %v26_v1 }
   0x4   :  { %10 = vsyncpa [#allocation3], 0  ;;  %v164_v2 = vmov 32.0   ;;  %v128_v14 = vld [vmem:[%s223_s3 + $0x8] sm:$0xff]  ;;  %v127_v15 = vld [vmem:[%s223_s3] sm:$0xff]  ;;  %s165_s28 = smov [#allocation2]  }
   0x5   :  { %134 = vrcp.f32 %v164_v2  ;;  %93 = vmatpush.bf16.msra.mxu0 %v128_v14  ;;  %v131_v25 = vld [vmem:[%s221_s1] ss:$0 sm:$0xff]  ;;  %s107_s29 = sshll.u32 %s165_s28, 4  ;;  %s109_s1 = sshll.u32 %s225_s5, 4  ;;  %vm100_vm5 = vcmask 31744   ;;  %s108_s29 = int_to_ptr.vmem [resolvable:$true] %s107_s29  ;;  %s110_s1 = int_to_ptr.hbm [resolvable:$true] %s109_s1 }
   0x6   :  { %v132_v28 = vld [vmem:[%s222_s2] ss:$0 sm:$0xff] }
   0x7   :  { %v133_v32 = vld [vmem:[%s224_s4] ss:$0 sm:$0xff] }
   0x9   :  { %94 = vmatpush.bf16.msra.mxu0 %v127_v15 }
   0xb   :  { %v135_v3 = vpop.eup %134 }
   0xc   :  { %v30_v4 = vmul.f32 32.0, %v135_v3  ;;  %vm34_vm1 = vweird.f32 %v135_v3 }
   0xe   :  { %v31_v5 = vsub.f32 1.0, %v30_v4 }
  0x10   :  { %v32_v6 = vmul.f32 %v135_v3, %v31_v5 }
  0x12   :  { %v33_v7 = vadd.f32 %v135_v3, %v32_v6 }
  0x14   :  { %v35_v8 = vsel %vm34_vm1, %v135_v3, %v33_v7 }
  0x76   :  { %v28_v9 = vpop.xlane.xlu0 %27 }
  0x77   :  { %v36_v10 = vmul.f32 %v35_v8, %v28_v9 }
  0x79   :  { %v37_v11 = vsub.f32 %v22_v0, %v36_v10 }
  0x7b   :  { %v38_v12 = vmul.f32 %v37_v11, %v37_v11 }
  0x7d   :  { %v39_v13 = vsel %vm25_vm0, %v38_v12, 0.0 }
  0x7e   :  { %40 = vadd.xlane.f32.xlu0 %v39_v13 }
  0xf1   :  { %v41_v16 = vpop.xlane.xlu0 %40 }
  0xf2   :  { %v42_v17 = vmul.f32 %v41_v16, %v35_v8 }
  0xf4   :  { %v43_v18 = vadd.f32 1e-05, %v42_v17 }
  0xf6   :  { %136 = vrsqrt.f32 %v43_v18  ;;  %vm50_vm3 = vweird.f32 %v43_v18 }
  0xfc   :  { %v137_v19 = vpop.eup %136 }
  0xfd   :  { %v45_v20 = vmul.f32 %v137_v19, %v43_v18  ;;  %vm51_vm2 = vweird.f32 %v137_v19 }
  0xfe   :  { %vm52_vm4 = vmor %vm50_vm3, %vm51_vm2 }
  0xff   :  { %v46_v21 = vmul.f32 %v137_v19, %v45_v20 }
 0x101   :  { %v47_v22 = vmul.f32 0.5, %v46_v21 }
 0x103   :  { %v48_v23 = vsub.f32 1.5, %v47_v22 }
 0x105   :  { %v49_v24 = vmul.f32 %v137_v19, %v48_v23 }
 0x107   :  { %v53_v26 = vsel %vm52_vm4, %v137_v19, %v49_v24 }
 0x108   :  { %v54_v27 = vmul.f32 %v53_v26, %v37_v11 }
 0x10a   :  { %v58_v29 = vmul.f32 %v131_v25, %v54_v27 }
 0x10c   :  { %v62_v30 = vadd.f32 %v132_v28, %v58_v29 }
 0x10e   :  { %v63_v31 = vpack.c.bf16 %v62_v30, %v62_v30 }
 0x110   :  { %126 = vmatmul.msk.bf16.vlgmr.msra.gmra.mxu0 %vm25_vm0, %v63_v31 }
 0x18d   :  { %v96_v33 = vpop.f32.mrf.mxu0 }
 0x18e   :  { %v97_v34 = vadd.f32 %v133_v32, %v96_v33 }
 0x190   :  { %101 = vst.msk [vmem:[#allocation2] sm:$0xff] %vm100_vm5, %v97_v34 }
 0x191   :  { %112 = dma.vmem_to_hbm [thread:$0]  %s108_s29, 128, %s110_s1, [#allocation3]  }
 0x195   :  { %v98_v35 = vpop.f32.mrf.mxu0 }
 0x196   :  { %162 = dma.done.wait [#allocation3], 128  }
 0x197   :  { %163 = vsyncadd [#allocation3], 4294967168 }
 0x198   :  { %117 = vsyncpa [#allocation3], 1 }

</bundles_post_ra>
